<compile_context>
chip_gen: v5e
topology: v5e:2x2
jax: 0.10.0
libtpu: 0.0.40
codegen_flags: <defaults>
</compile_context>

<pallas_src>
import functools

import jax
import jax.numpy as jnp
from jax.experimental import pallas as pl
from jax.experimental.pallas import tpu as pltpu


def _round_up(x, m):
    return (x + m - 1) // m * m


# --------------------------------------------------------------------------
# Pallas kernel: fused (bf16 x bf16 -> f32) matmul + bias + activation
# --------------------------------------------------------------------------
def _gemm_bias_act_kernel(x_ref, w_ref, b_ref, o_ref, *, activation):
    acc = jnp.dot(x_ref[...], w_ref[...], preferred_element_type=jnp.float32)
    acc = acc + b_ref[...]  # (1, Np) broadcasts over rows
    if activation == "relu":
        acc = jnp.maximum(acc, 0.0)
    elif activation == "sigmoid":
        # stable branchless sigmoid: exp on EUP, no overflow for any input
        z = jnp.exp(-jnp.abs(acc))
        acc = jnp.where(acc >= 0.0, 1.0, z) / (1.0 + z)
    o_ref[...] = acc.astype(o_ref.dtype)


def fused_matmul_bias_act(patches, w, b, activation, *, tm_max=256):
    """patches: (M, K) f32, w: (K, N) f32, b: (N,) f32 -> (M, N) f32."""
    M, K = patches.shape
    K2, N = w.shape
    assert K == K2

    # Lane/sublane friendly padding: K, N -> multiple of 128 (lane-dense
    # stores + aligned contraction), M -> multiple of the row tile.
    k_pad = _round_up(K, 128)
    n_pad = _round_up(N, 128)
    tm = min(tm_max, _round_up(M, 8))
    m_pad = _round_up(M, tm)

    xp = (jnp.zeros((m_pad, k_pad), jnp.bfloat16)
          .at[:M, :K].set(patches.astype(jnp.bfloat16)))
    wp = (jnp.zeros((k_pad, n_pad), jnp.bfloat16)
          .at[:K, :N].set(w.astype(jnp.bfloat16)))
    bp = (jnp.zeros((1, n_pad), jnp.float32)
          .at[0, :N].set(b.astype(jnp.float32)))

    kernel = functools.partial(_gemm_bias_act_kernel, activation=activation)
    cost = pl.CostEstimate(
        flops=2 * m_pad * k_pad * n_pad,
        transcendentals=m_pad * n_pad if activation == "sigmoid" else 0,
        bytes_accessed=(m_pad * k_pad * 2 + k_pad * n_pad * 2
                        + n_pad * 4 + m_pad * n_pad * 4),
    )

    out = pl.pallas_call(
        kernel,
        out_shape=jax.ShapeDtypeStruct((m_pad, n_pad), jnp.float32),
        grid=(m_pad // tm,),
        in_specs=[
            pl.BlockSpec((tm, k_pad), lambda i: (i, 0)),
            pl.BlockSpec((k_pad, n_pad), lambda i: (0, 0)),
            pl.BlockSpec((1, n_pad), lambda i: (0, 0)),
        ],
        out_specs=pl.BlockSpec((tm, n_pad), lambda i: (i, 0)),
        compiler_params=pltpu.CompilerParams(
            dimension_semantics=("parallel",),
        ),
        cost_estimate=cost,
    )(xp, wp, bp)
    return out[:M, :N]


# --------------------------------------------------------------------------
# JAX glue: NHWC im2col, conv, transposed conv
# --------------------------------------------------------------------------
def _im2col_nhwc(xp, k, stride, oh, ow):
    """xp: (N, Hp, Wp, C) -> (N*oh*ow, k*k*C) with K ordered (ki, kj, c)."""
    n, _, _, c = xp.shape
    cols = []
    for ki in range(k):
        for kj in range(k):
            cols.append(xp[:, ki:ki + stride * oh:stride,
                           kj:kj + stride * ow:stride, :])  # (N, oh, ow, C)
    patches = jnp.stack(cols, axis=3)  # (N, oh, ow, k*k, C) -- C stays on lanes
    return patches.reshape(n * oh * ow, k * k * c)


def conv2d_nhwc(x, w, b, stride, pad, activation):
    """x: (N, H, W, C_in); w: (C_out, C_in, kH, kW) (PyTorch layout)."""
    n, h, wd, ci = x.shape
    co, ci2, kh, kw = w.shape
    assert ci == ci2
    oh = (h + 2 * pad - kh) // stride + 1
    ow = (wd + 2 * pad - kw) // stride + 1
    xp = jnp.pad(x, ((0, 0), (pad, pad), (pad, pad), (0, 0)))
    patches = _im2col_nhwc(xp, kh, stride, oh, ow)
    wmat = w.transpose(2, 3, 1, 0).reshape(kh * kw * ci, co)  # (K, C_out)
    out = fused_matmul_bias_act(patches, wmat, b, activation)
    return out.reshape(n, oh, ow, co)


def conv_transpose2d_nhwc(x, w, b, stride, pad, out_pad, activation):
    """x: (N, H, W, C_in); w: (C_in, C_out, kH, kW) (PyTorch ConvTranspose)."""
    n, h, wd, ci = x.shape
    ci2, co, kh, kw = w.shape
    assert ci == ci2
    # zero-dilate the input by `stride`, asymmetric pad, stride-1 conv with
    # the spatially flipped / channel-swapped weight (exact PyTorch semantics)
    # TODO(synk): sub-pixel (stride^2) decomposition would skip the ~75%
    # all-zero patch columns introduced by the dilation; kept the exact
    # dilated form for simplicity/correctness.
    hd = (h - 1) * stride + 1
    wdd = (wd - 1) * stride + 1
    xd = jnp.zeros((n, hd, wdd, ci), x.dtype).at[:, ::stride, ::stride, :].set(x)
    pb = kh - 1 - pad
    pa = kh - 1 - pad + out_pad
    xp = jnp.pad(xd, ((0, 0), (pb, pa), (pb, pa), (0, 0)))
    oh = (h - 1) * stride - 2 * pad + kh + out_pad
    ow = (wd - 1) * stride - 2 * pad + kw + out_pad
    w_eq = jnp.flip(w, axis=(2, 3)).transpose(1, 0, 2, 3)  # (C_out, C_in, kH, kW)
    patches = _im2col_nhwc(xp, kh, 1, oh, ow)
    wmat = w_eq.transpose(2, 3, 1, 0).reshape(kh * kw * ci, co)
    out = fused_matmul_bias_act(patches, wmat, b, activation)
    return out.reshape(n, oh, ow, co)


# --------------------------------------------------------------------------
# Autoencoder: params + forward (NCHW boundary, NHWC internally)
# --------------------------------------------------------------------------
def init_params(key):
    def w_init(k, shape, fan_in):
        bound = 1.0 / (fan_in ** 0.5)
        return jax.random.uniform(k, shape, jnp.float32, -bound, bound)

    ks = jax.random.split(key, 12)
    p = {}
    # encoder: Conv2d(3,32,3,s2,p1), Conv2d(32,64,3,s2,p1), Conv2d(64,128,3,s2,p1)
    p["e1_w"] = w_init(ks[0], (32, 3, 3, 3), 3 * 9)
    p["e1_b"] = w_init(ks[1], (32,), 3 * 9)
    p["e2_w"] = w_init(ks[2], (64, 32, 3, 3), 32 * 9)
    p["e2_b"] = w_init(ks[3], (64,), 32 * 9)
    p["e3_w"] = w_init(ks[4], (128, 64, 3, 3), 64 * 9)
    p["e3_b"] = w_init(ks[5], (128,), 64 * 9)
    # decoder: ConvTranspose2d(128,64), (64,32), (32,3) all 3x3 s2 p1 op1
    p["d1_w"] = w_init(ks[6], (128, 64, 3, 3), 64 * 9)
    p["d1_b"] = w_init(ks[7], (64,), 64 * 9)
    p["d2_w"] = w_init(ks[8], (64, 32, 3, 3), 32 * 9)
    p["d2_b"] = w_init(ks[9], (32,), 32 * 9)
    p["d3_w"] = w_init(ks[10], (32, 3, 3, 3), 3 * 9)
    p["d3_b"] = w_init(ks[11], (3,), 3 * 9)
    return p


def autoencoder_forward(p, x_nchw):
    x = x_nchw.transpose(0, 2, 3, 1)  # NCHW -> NHWC once at the boundary
    # encoder
    h = conv2d_nhwc(x, p["e1_w"], p["e1_b"], stride=2, pad=1, activation="relu")
    h = conv2d_nhwc(h, p["e2_w"], p["e2_b"], stride=2, pad=1, activation="relu")
    lat = conv2d_nhwc(h, p["e3_w"], p["e3_b"], stride=2, pad=1, activation="relu")
    # decoder
    d = conv_transpose2d_nhwc(lat, p["d1_w"], p["d1_b"], 2, 1, 1, activation="relu")
    d = conv_transpose2d_nhwc(d, p["d2_w"], p["d2_b"], 2, 1, 1, activation="relu")
    rec = conv_transpose2d_nhwc(d, p["d3_w"], p["d3_b"], 2, 1, 1, activation="sigmoid")
    # back to NCHW to match the PyTorch module's return convention
    recon = rec.transpose(0, 3, 1, 2)
    latent = lat.transpose(0, 3, 1, 2)
    return recon, latent


if __name__ == "__main__":
    key = jax.random.PRNGKey(0)
    pkey, xkey = jax.random.split(key)
    params = init_params(pkey)

    # small NCHW input consistent with the module (3 input channels)
    x = jax.random.normal(xkey, (2, 3, 16, 16), jnp.float32)

    recon, latent = jax.jit(autoencoder_forward)(params, x)
    recon = jax.block_until_ready(recon)
    latent = jax.block_until_ready(latent)

    assert recon.shape == (2, 3, 16, 16), recon.shape
    assert latent.shape == (2, 128, 2, 2), latent.shape
    assert bool(jnp.all(jnp.isfinite(recon))) and bool(jnp.all(jnp.isfinite(latent)))
    assert bool(jnp.all(recon >= 0.0)) and bool(jnp.all(recon <= 1.0))  # sigmoid range
    assert bool(jnp.all(latent >= 0.0))  # ReLU range

    print("KERNEL_OK")
</pallas_src>

<mosaic_0001>
module attributes {stable_mosaic.version = 11 : i64} {
  func.func @_gemm_bias_act_kernel(%arg0: i32, %arg1: memref<128x128xbf16, #tpu.memory_space<vmem>>, %arg2: memref<128x128xbf16, #tpu.memory_space<vmem>>, %arg3: memref<1x128xf32, #tpu.memory_space<vmem>>, %arg4: memref<128x128xf32, #tpu.memory_space<vmem>>) attributes {dimension_semantics = [#tpu.dimension_semantics<parallel>], iteration_bounds = array<i64: 1>, scalar_prefetch = 0 : i64, scratch_operands = 0 : i64, tpu.core_type = #tpu.core_type<tc>, window_params = [{transform_indices = @transform_0, window_bounds = array<i64: 128, 128>}, {pipeline_mode = #tpu.pipeline_mode<synchronous>, transform_indices = @transform_1, window_bounds = array<i64: 128, 128>}, {pipeline_mode = #tpu.pipeline_mode<synchronous>, transform_indices = @transform_2, window_bounds = array<i64: 1, 128>}, {transform_indices = @transform_3, window_bounds = array<i64: 128, 128>}]} {
    %c0 = arith.constant 0 : index
    %c0_0 = arith.constant 0 : index
    %0 = vector.load %arg1[%c0, %c0_0] : memref<128x128xbf16, #tpu.memory_space<vmem>>, vector<128x128xbf16>
    %c0_1 = arith.constant 0 : index
    %c0_2 = arith.constant 0 : index
    %1 = vector.load %arg2[%c0_1, %c0_2] : memref<128x128xbf16, #tpu.memory_space<vmem>>, vector<128x128xbf16>
    %cst = arith.constant dense<0.000000e+00> : vector<128x128xf32>
    %2 = tpu.matmul %0, %1, %cst {dimension_numbers = #tpu.dot_dimension_numbers<[1], [0], [0], [1], [0, 0, 1, 1], [], []>} : vector<128x128xbf16>, vector<128x128xbf16>, vector<128x128xf32> -> vector<128x128xf32>
    %c0_3 = arith.constant 0 : index
    %c0_4 = arith.constant 0 : index
    %3 = vector.load %arg3[%c0_3, %c0_4] : memref<1x128xf32, #tpu.memory_space<vmem>>, vector<1x128xf32>
    %4 = vector.broadcast %3 : vector<1x128xf32> to vector<128x128xf32>
    %5 = arith.addf %2, %4 : vector<128x128xf32>
    %cst_5 = arith.constant 0.000000e+00 : f32
    %6 = vector.broadcast %cst_5 : f32 to vector<128x128xf32>
    %7 = arith.maximumf %5, %6 : vector<128x128xf32>
    %c0_6 = arith.constant 0 : index
    %c0_7 = arith.constant 0 : index
    %8 = vector.load %arg4[%c0_6, %c0_7] : memref<128x128xf32, #tpu.memory_space<vmem>>, vector<128x128xf32>
    tpu.vector_store %arg4[%c0_6, %c0_7], %7 {strides = array<i32>} : memref<128x128xf32, #tpu.memory_space<vmem>>, vector<128x128xf32>,
    return
  }
  func.func @transform_0(%arg0: i32) -> (i32, i32) {
    %c0_i32 = arith.constant 0 : i32
    %c0_i32_0 = arith.constant 0 : i32
    return %arg0, %c0_i32 : i32, i32
  }
  func.func @transform_1(%arg0: i32) -> (i32, i32) {
    %c0_i32 = arith.constant 0 : i32
    %c0_i32_0 = arith.constant 0 : i32
    %c0_i32_1 = arith.constant 0 : i32
    return %c0_i32, %c0_i32_0 : i32, i32
  }
  func.func @transform_2(%arg0: i32) -> (i32, i32) {
    %c0_i32 = arith.constant 0 : i32
    %c0_i32_0 = arith.constant 0 : i32
    %c0_i32_1 = arith.constant 0 : i32
    return %c0_i32, %c0_i32_0 : i32, i32
  }
  func.func @transform_3(%arg0: i32) -> (i32, i32) {
    %c0_i32 = arith.constant 0 : i32
    %c0_i32_0 = arith.constant 0 : i32
    return %arg0, %c0_i32 : i32, i32
  }
}

module attributes {stable_mosaic.version = 11 : i64} {
  func.func @_gemm_bias_act_kernel(%arg0: i32, %arg1: memref<32x384xbf16, #tpu.memory_space<vmem>>, %arg2: memref<384x128xbf16, #tpu.memory_space<vmem>>, %arg3: memref<1x128xf32, #tpu.memory_space<vmem>>, %arg4: memref<32x128xf32, #tpu.memory_space<vmem>>) attributes {dimension_semantics = [#tpu.dimension_semantics<parallel>], iteration_bounds = array<i64: 1>, scalar_prefetch = 0 : i64, scratch_operands = 0 : i64, tpu.core_type = #tpu.core_type<tc>, window_params = [{transform_indices = @transform_0, window_bounds = array<i64: 32, 384>}, {pipeline_mode = #tpu.pipeline_mode<synchronous>, transform_indices = @transform_1, window_bounds = array<i64: 384, 128>}, {pipeline_mode = #tpu.pipeline_mode<synchronous>, transform_indices = @transform_2, window_bounds = array<i64: 1, 128>}, {transform_indices = @transform_3, window_bounds = array<i64: 32, 128>}]} {
    %c0 = arith.constant 0 : index
    %c0_0 = arith.constant 0 : index
    %0 = vector.load %arg1[%c0, %c0_0] : memref<32x384xbf16, #tpu.memory_space<vmem>>, vector<32x384xbf16>
    %c0_1 = arith.constant 0 : index
    %c0_2 = arith.constant 0 : index
    %1 = vector.load %arg2[%c0_1, %c0_2] : memref<384x128xbf16, #tpu.memory_space<vmem>>, vector<384x128xbf16>
    %cst = arith.constant dense<0.000000e+00> : vector<32x128xf32>
    %2 = tpu.matmul %0, %1, %cst {dimension_numbers = #tpu.dot_dimension_numbers<[1], [0], [0], [1], [0, 0, 1, 1], [], []>} : vector<32x384xbf16>, vector<384x128xbf16>, vector<32x128xf32> -> vector<32x128xf32>
    %c0_3 = arith.constant 0 : index
    %c0_4 = arith.constant 0 : index
    %3 = vector.load %arg3[%c0_3, %c0_4] : memref<1x128xf32, #tpu.memory_space<vmem>>, vector<1x128xf32>
    %4 = vector.broadcast %3 : vector<1x128xf32> to vector<32x128xf32>
    %5 = arith.addf %2, %4 : vector<32x128xf32>
    %cst_5 = arith.constant 0.000000e+00 : f32
    %6 = vector.broadcast %cst_5 : f32 to vector<32x128xf32>
    %7 = arith.maximumf %5, %6 : vector<32x128xf32>
    %c0_6 = arith.constant 0 : index
    %c0_7 = arith.constant 0 : index
    %8 = vector.load %arg4[%c0_6, %c0_7] : memref<32x128xf32, #tpu.memory_space<vmem>>, vector<32x128xf32>
    tpu.vector_store %arg4[%c0_6, %c0_7], %7 {strides = array<i32>} : memref<32x128xf32, #tpu.memory_space<vmem>>, vector<32x128xf32>,
    return
  }
  func.func @transform_0(%arg0: i32) -> (i32, i32) {
    %c0_i32 = arith.constant 0 : i32
    %c0_i32_0 = arith.constant 0 : i32
    return %arg0, %c0_i32 : i32, i32
  }
  func.func @transform_1(%arg0: i32) -> (i32, i32) {
    %c0_i32 = arith.constant 0 : i32
    %c0_i32_0 = arith.constant 0 : i32
    %c0_i32_1 = arith.constant 0 : i32
    return %c0_i32, %c0_i32_0 : i32, i32
  }
  func.func @transform_2(%arg0: i32) -> (i32, i32) {
    %c0_i32 = arith.constant 0 : i32
    %c0_i32_0 = arith.constant 0 : i32
    %c0_i32_1 = arith.constant 0 : i32
    return %c0_i32, %c0_i32_0 : i32, i32
  }
  func.func @transform_3(%arg0: i32) -> (i32, i32) {
    %c0_i32 = arith.constant 0 : i32
    %c0_i32_0 = arith.constant 0 : i32
    return %arg0, %c0_i32 : i32, i32
  }
}

module attributes {stable_mosaic.version = 11 : i64} {
  func.func @_gemm_bias_act_kernel(%arg0: i32, %arg1: memref<8x640xbf16, #tpu.memory_space<vmem>>, %arg2: memref<640x128xbf16, #tpu.memory_space<vmem>>, %arg3: memref<1x128xf32, #tpu.memory_space<vmem>>, %arg4: memref<8x128xf32, #tpu.memory_space<vmem>>) attributes {dimension_semantics = [#tpu.dimension_semantics<parallel>], iteration_bounds = array<i64: 1>, scalar_prefetch = 0 : i64, scratch_operands = 0 : i64, tpu.core_type = #tpu.core_type<tc>, window_params = [{transform_indices = @transform_0, window_bounds = array<i64: 8, 640>}, {pipeline_mode = #tpu.pipeline_mode<synchronous>, transform_indices = @transform_1, window_bounds = array<i64: 640, 128>}, {pipeline_mode = #tpu.pipeline_mode<synchronous>, transform_indices = @transform_2, window_bounds = array<i64: 1, 128>}, {transform_indices = @transform_3, window_bounds = array<i64: 8, 128>}]} {
    %c0 = arith.constant 0 : index
    %c0_0 = arith.constant 0 : index
    %0 = vector.load %arg1[%c0, %c0_0] : memref<8x640xbf16, #tpu.memory_space<vmem>>, vector<8x640xbf16>
    %c0_1 = arith.constant 0 : index
    %c0_2 = arith.constant 0 : index
    %1 = vector.load %arg2[%c0_1, %c0_2] : memref<640x128xbf16, #tpu.memory_space<vmem>>, vector<640x128xbf16>
    %cst = arith.constant dense<0.000000e+00> : vector<8x128xf32>
    %2 = tpu.matmul %0, %1, %cst {dimension_numbers = #tpu.dot_dimension_numbers<[1], [0], [0], [1], [0, 0, 1, 1], [], []>} : vector<8x640xbf16>, vector<640x128xbf16>, vector<8x128xf32> -> vector<8x128xf32>
    %c0_3 = arith.constant 0 : index
    %c0_4 = arith.constant 0 : index
    %3 = vector.load %arg3[%c0_3, %c0_4] : memref<1x128xf32, #tpu.memory_space<vmem>>, vector<1x128xf32>
    %4 = vector.broadcast %3 : vector<1x128xf32> to vector<8x128xf32>
    %5 = arith.addf %2, %4 : vector<8x128xf32>
    %cst_5 = arith.constant 0.000000e+00 : f32
    %6 = vector.broadcast %cst_5 : f32 to vector<8x128xf32>
    %7 = arith.maximumf %5, %6 : vector<8x128xf32>
    %c0_6 = arith.constant 0 : index
    %c0_7 = arith.constant 0 : index
    %8 = vector.load %arg4[%c0_6, %c0_7] : memref<8x128xf32, #tpu.memory_space<vmem>>, vector<8x128xf32>
    tpu.vector_store %arg4[%c0_6, %c0_7], %7 {strides = array<i32>} : memref<8x128xf32, #tpu.memory_space<vmem>>, vector<8x128xf32>,
    return
  }
  func.func @transform_0(%arg0: i32) -> (i32, i32) {
    %c0_i32 = arith.constant 0 : i32
    %c0_i32_0 = arith.constant 0 : i32
    return %arg0, %c0_i32 : i32, i32
  }
  func.func @transform_1(%arg0: i32) -> (i32, i32) {
    %c0_i32 = arith.constant 0 : i32
    %c0_i32_0 = arith.constant 0 : i32
    %c0_i32_1 = arith.constant 0 : i32
    return %c0_i32, %c0_i32_0 : i32, i32
  }
  func.func @transform_2(%arg0: i32) -> (i32, i32) {
    %c0_i32 = arith.constant 0 : i32
    %c0_i32_0 = arith.constant 0 : i32
    %c0_i32_1 = arith.constant 0 : i32
    return %c0_i32, %c0_i32_0 : i32, i32
  }
  func.func @transform_3(%arg0: i32) -> (i32, i32) {
    %c0_i32 = arith.constant 0 : i32
    %c0_i32_0 = arith.constant 0 : i32
    return %arg0, %c0_i32 : i32, i32
  }
}

module attributes {stable_mosaic.version = 11 : i64} {
  func.func @_gemm_bias_act_kernel(%arg0: i32, %arg1: memref<32x1152xbf16, #tpu.memory_space<vmem>>, %arg2: memref<1152x128xbf16, #tpu.memory_space<vmem>>, %arg3: memref<1x128xf32, #tpu.memory_space<vmem>>, %arg4: memref<32x128xf32, #tpu.memory_space<vmem>>) attributes {dimension_semantics = [#tpu.dimension_semantics<parallel>], iteration_bounds = array<i64: 1>, scalar_prefetch = 0 : i64, scratch_operands = 0 : i64, tpu.core_type = #tpu.core_type<tc>, window_params = [{transform_indices = @transform_0, window_bounds = array<i64: 32, 1152>}, {pipeline_mode = #tpu.pipeline_mode<synchronous>, transform_indices = @transform_1, window_bounds = array<i64: 1152, 128>}, {pipeline_mode = #tpu.pipeline_mode<synchronous>, transform_indices = @transform_2, window_bounds = array<i64: 1, 128>}, {transform_indices = @transform_3, window_bounds = array<i64: 32, 128>}]} {
    %c0 = arith.constant 0 : index
    %c0_0 = arith.constant 0 : index
    %0 = vector.load %arg1[%c0, %c0_0] : memref<32x1152xbf16, #tpu.memory_space<vmem>>, vector<32x1152xbf16>
    %c0_1 = arith.constant 0 : index
    %c0_2 = arith.constant 0 : index
    %1 = vector.load %arg2[%c0_1, %c0_2] : memref<1152x128xbf16, #tpu.memory_space<vmem>>, vector<1152x128xbf16>
    %cst = arith.constant dense<0.000000e+00> : vector<32x128xf32>
    %2 = tpu.matmul %0, %1, %cst {dimension_numbers = #tpu.dot_dimension_numbers<[1], [0], [0], [1], [0, 0, 1, 1], [], []>} : vector<32x1152xbf16>, vector<1152x128xbf16>, vector<32x128xf32> -> vector<32x128xf32>
    %c0_3 = arith.constant 0 : index
    %c0_4 = arith.constant 0 : index
    %3 = vector.load %arg3[%c0_3, %c0_4] : memref<1x128xf32, #tpu.memory_space<vmem>>, vector<1x128xf32>
    %4 = vector.broadcast %3 : vector<1x128xf32> to vector<32x128xf32>
    %5 = arith.addf %2, %4 : vector<32x128xf32>
    %cst_5 = arith.constant 0.000000e+00 : f32
    %6 = vector.broadcast %cst_5 : f32 to vector<32x128xf32>
    %7 = arith.maximumf %5, %6 : vector<32x128xf32>
    %c0_6 = arith.constant 0 : index
    %c0_7 = arith.constant 0 : index
    %8 = vector.load %arg4[%c0_6, %c0_7] : memref<32x128xf32, #tpu.memory_space<vmem>>, vector<32x128xf32>
    tpu.vector_store %arg4[%c0_6, %c0_7], %7 {strides = array<i32>} : memref<32x128xf32, #tpu.memory_space<vmem>>, vector<32x128xf32>,
    return
  }
  func.func @transform_0(%arg0: i32) -> (i32, i32) {
    %c0_i32 = arith.constant 0 : i32
    %c0_i32_0 = arith.constant 0 : i32
    return %arg0, %c0_i32 : i32, i32
  }
  func.func @transform_1(%arg0: i32) -> (i32, i32) {
    %c0_i32 = arith.constant 0 : i32
    %c0_i32_0 = arith.constant 0 : i32
    %c0_i32_1 = arith.constant 0 : i32
    return %c0_i32, %c0_i32_0 : i32, i32
  }
  func.func @transform_2(%arg0: i32) -> (i32, i32) {
    %c0_i32 = arith.constant 0 : i32
    %c0_i32_0 = arith.constant 0 : i32
    %c0_i32_1 = arith.constant 0 : i32
    return %c0_i32, %c0_i32_0 : i32, i32
  }
  func.func @transform_3(%arg0: i32) -> (i32, i32) {
    %c0_i32 = arith.constant 0 : i32
    %c0_i32_0 = arith.constant 0 : i32
    return %arg0, %c0_i32 : i32, i32
  }
}

module attributes {stable_mosaic.version = 11 : i64} {
  func.func @_gemm_bias_act_kernel(%arg0: i32, %arg1: memref<128x640xbf16, #tpu.memory_space<vmem>>, %arg2: memref<640x128xbf16, #tpu.memory_space<vmem>>, %arg3: memref<1x128xf32, #tpu.memory_space<vmem>>, %arg4: memref<128x128xf32, #tpu.memory_space<vmem>>) attributes {dimension_semantics = [#tpu.dimension_semantics<parallel>], iteration_bounds = array<i64: 1>, scalar_prefetch = 0 : i64, scratch_operands = 0 : i64, tpu.core_type = #tpu.core_type<tc>, window_params = [{transform_indices = @transform_0, window_bounds = array<i64: 128, 640>}, {pipeline_mode = #tpu.pipeline_mode<synchronous>, transform_indices = @transform_1, window_bounds = array<i64: 640, 128>}, {pipeline_mode = #tpu.pipeline_mode<synchronous>, transform_indices = @transform_2, window_bounds = array<i64: 1, 128>}, {transform_indices = @transform_3, window_bounds = array<i64: 128, 128>}]} {
    %c0 = arith.constant 0 : index
    %c0_0 = arith.constant 0 : index
    %0 = vector.load %arg1[%c0, %c0_0] : memref<128x640xbf16, #tpu.memory_space<vmem>>, vector<128x640xbf16>
    %c0_1 = arith.constant 0 : index
    %c0_2 = arith.constant 0 : index
    %1 = vector.load %arg2[%c0_1, %c0_2] : memref<640x128xbf16, #tpu.memory_space<vmem>>, vector<640x128xbf16>
    %cst = arith.constant dense<0.000000e+00> : vector<128x128xf32>
    %2 = tpu.matmul %0, %1, %cst {dimension_numbers = #tpu.dot_dimension_numbers<[1], [0], [0], [1], [0, 0, 1, 1], [], []>} : vector<128x640xbf16>, vector<640x128xbf16>, vector<128x128xf32> -> vector<128x128xf32>
    %c0_3 = arith.constant 0 : index
    %c0_4 = arith.constant 0 : index
    %3 = vector.load %arg3[%c0_3, %c0_4] : memref<1x128xf32, #tpu.memory_space<vmem>>, vector<1x128xf32>
    %4 = vector.broadcast %3 : vector<1x128xf32> to vector<128x128xf32>
    %5 = arith.addf %2, %4 : vector<128x128xf32>
    %cst_5 = arith.constant 0.000000e+00 : f32
    %6 = vector.broadcast %cst_5 : f32 to vector<128x128xf32>
    %7 = arith.maximumf %5, %6 : vector<128x128xf32>
    %c0_6 = arith.constant 0 : index
    %c0_7 = arith.constant 0 : index
    %8 = vector.load %arg4[%c0_6, %c0_7] : memref<128x128xf32, #tpu.memory_space<vmem>>, vector<128x128xf32>
    tpu.vector_store %arg4[%c0_6, %c0_7], %7 {strides = array<i32>} : memref<128x128xf32, #tpu.memory_space<vmem>>, vector<128x128xf32>,
    return
  }
  func.func @transform_0(%arg0: i32) -> (i32, i32) {
    %c0_i32 = arith.constant 0 : i32
    %c0_i32_0 = arith.constant 0 : i32
    return %arg0, %c0_i32 : i32, i32
  }
  func.func @transform_1(%arg0: i32) -> (i32, i32) {
    %c0_i32 = arith.constant 0 : i32
    %c0_i32_0 = arith.constant 0 : i32
    %c0_i32_1 = arith.constant 0 : i32
    return %c0_i32, %c0_i32_0 : i32, i32
  }
  func.func @transform_2(%arg0: i32) -> (i32, i32) {
    %c0_i32 = arith.constant 0 : i32
    %c0_i32_0 = arith.constant 0 : i32
    %c0_i32_1 = arith.constant 0 : i32
    return %c0_i32, %c0_i32_0 : i32, i32
  }
  func.func @transform_3(%arg0: i32) -> (i32, i32) {
    %c0_i32 = arith.constant 0 : i32
    %c0_i32_0 = arith.constant 0 : i32
    return %arg0, %c0_i32 : i32, i32
  }
}

module attributes {stable_mosaic.version = 11 : i64} {
  func.func @_gemm_bias_act_kernel(%arg0: i32, %arg1: memref<256x384xbf16, #tpu.memory_space<vmem>>, %arg2: memref<384x128xbf16, #tpu.memory_space<vmem>>, %arg3: memref<1x128xf32, #tpu.memory_space<vmem>>, %arg4: memref<256x128xf32, #tpu.memory_space<vmem>>) attributes {dimension_semantics = [#tpu.dimension_semantics<parallel>], iteration_bounds = array<i64: 2>, scalar_prefetch = 0 : i64, scratch_operands = 0 : i64, tpu.core_type = #tpu.core_type<tc>, window_params = [{transform_indices = @transform_0, window_bounds = array<i64: 256, 384>}, {pipeline_mode = #tpu.pipeline_mode<synchronous>, transform_indices = @transform_1, window_bounds = array<i64: 384, 128>}, {pipeline_mode = #tpu.pipeline_mode<synchronous>, transform_indices = @transform_2, window_bounds = array<i64: 1, 128>}, {transform_indices = @transform_3, window_bounds = array<i64: 256, 128>}]} {
    %c0 = arith.constant 0 : index
    %c0_0 = arith.constant 0 : index
    %0 = vector.load %arg1[%c0, %c0_0] : memref<256x384xbf16, #tpu.memory_space<vmem>>, vector<256x384xbf16>
    %c0_1 = arith.constant 0 : index
    %c0_2 = arith.constant 0 : index
    %1 = vector.load %arg2[%c0_1, %c0_2] : memref<384x128xbf16, #tpu.memory_space<vmem>>, vector<384x128xbf16>
    %cst = arith.constant dense<0.000000e+00> : vector<256x128xf32>
    %2 = tpu.matmul %0, %1, %cst {dimension_numbers = #tpu.dot_dimension_numbers<[1], [0], [0], [1], [0, 0, 1, 1], [], []>} : vector<256x384xbf16>, vector<384x128xbf16>, vector<256x128xf32> -> vector<256x128xf32>
    %c0_3 = arith.constant 0 : index
    %c0_4 = arith.constant 0 : index
    %3 = vector.load %arg3[%c0_3, %c0_4] : memref<1x128xf32, #tpu.memory_space<vmem>>, vector<1x128xf32>
    %4 = vector.broadcast %3 : vector<1x128xf32> to vector<256x128xf32>
    %5 = arith.addf %2, %4 : vector<256x128xf32>
    %6 = math.absf %5 : vector<256x128xf32>
    %cst_5 = arith.constant 0.000000e+00 : f32
    %7 = vector.broadcast %cst_5 : f32 to vector<256x128xf32>
    %8 = arith.subf %7, %6 : vector<256x128xf32>
    %9 = math.exp %8 : vector<256x128xf32>
    %cst_6 = arith.constant 0.000000e+00 : f32
    %10 = vector.broadcast %cst_6 : f32 to vector<256x128xf32>
    %11 = arith.cmpf oge, %5, %10 : vector<256x128xf32>
    %cst_7 = arith.constant 1.000000e+00 : f32
    %12 = vector.broadcast %cst_7 : f32 to vector<256x128xf32>
    %13 = arith.select %11, %12, %9 : vector<256x128xi1>, vector<256x128xf32>
    %cst_8 = arith.constant 1.000000e+00 : f32
    %14 = vector.broadcast %cst_8 : f32 to vector<256x128xf32>
    %15 = arith.addf %14, %9 : vector<256x128xf32>
    %16 = arith.divf %13, %15 : vector<256x128xf32>
    %c0_9 = arith.constant 0 : index
    %c0_10 = arith.constant 0 : index
    %17 = vector.load %arg4[%c0_9, %c0_10] : memref<256x128xf32, #tpu.memory_space<vmem>>, vector<256x128xf32>
    tpu.vector_store %arg4[%c0_9, %c0_10], %16 {strides = array<i32>} : memref<256x128xf32, #tpu.memory_space<vmem>>, vector<256x128xf32>,
    return
  }
  func.func @transform_0(%arg0: i32) -> (i32, i32) {
    %c0_i32 = arith.constant 0 : i32
    %c0_i32_0 = arith.constant 0 : i32
    return %arg0, %c0_i32 : i32, i32
  }
  func.func @transform_1(%arg0: i32) -> (i32, i32) {
    %c0_i32 = arith.constant 0 : i32
    %c0_i32_0 = arith.constant 0 : i32
    %c0_i32_1 = arith.constant 0 : i32
    return %c0_i32, %c0_i32_0 : i32, i32
  }
  func.func @transform_2(%arg0: i32) -> (i32, i32) {
    %c0_i32 = arith.constant 0 : i32
    %c0_i32_0 = arith.constant 0 : i32
    %c0_i32_1 = arith.constant 0 : i32
    return %c0_i32, %c0_i32_0 : i32, i32
  }
  func.func @transform_3(%arg0: i32) -> (i32, i32) {
    %c0_i32 = arith.constant 0 : i32
    %c0_i32_0 = arith.constant 0 : i32
    return %arg0, %c0_i32 : i32, i32
  }
}

</mosaic_0001>

<bundles_post_ra>
// kernel: autoencoder_forward.6
= control target key start
LH: loop header
LB: loop body
LE: loop exit
PB: predicated region body
PF: predicated region fallthrough
CT: control target
= control target key end

     0   :  { %s455_s1 = inlined_call_operand.vmem [shape: bf16[128,128], index: 1, kind: input, shape index: {}]   ;;  %s456_s2 = inlined_call_operand.vmem [shape: f32[1,128], index: 2, kind: input, shape index: {}]   ;;  %s457_s0 = inlined_call_operand.vmem [shape: bf16[128,128], index: 0, kind: input, shape index: {}]   ;;  %s458_s3 = inlined_call_operand.vmem [shape: f32[128,128], index: 3, kind: output, shape index: {}]  }
   0x1   :  { %v310_v0 = vld [vmem:[%s455_s1 + $0x38] sm:$0xff]  ;;  %v309_v1 = vld [vmem:[%s455_s1 + $0x30] sm:$0xff]  ;;  %v308_v2 = vld [vmem:[%s455_s1 + $0x28] sm:$0xff] }
   0x2   :  { %146 = vmatpush.bf16.msra.mxu0 %v310_v0  ;;  %311 = vmatpush.bf16.msra.mxu1 %v310_v0  ;;  %v307_v3 = vld [vmem:[%s455_s1 + $0x20] sm:$0xff]  ;;  %v306_v4 = vld [vmem:[%s455_s1 + $0x18] sm:$0xff]  ;;  %v305_v5 = vld [vmem:[%s455_s1 + $0x10] sm:$0xff] }
   0x3   :  { %312 = vmatpush.bf16.msra.mxu2 %v310_v0  ;;  %313 = vmatpush.bf16.msra.mxu3 %v310_v0  ;;  %v304_v6 = vld [vmem:[%s455_s1 + $0x8] sm:$0xff]  ;;  %v303_v7 = vld [vmem:[%s455_s1] sm:$0xff]  ;;  %v297_v9 = vld [vmem:[%s457_s0 + $0x10] sm:$0xff] }
   0x4   :  { %v295_v8 = vld [vmem:[%s457_s0] sm:$0xff]  ;;  %v301_v11 = vld [vmem:[%s457_s0 + $0x30] sm:$0xff]  ;;  %v296_v12 = vld [vmem:[%s457_s0 + $0x8] sm:$0xff] }
   0x5   :  { %v299_v10 = vld [vmem:[%s457_s0 + $0x20] sm:$0xff]  ;;  %v298_v13 = vld [vmem:[%s457_s0 + $0x18] sm:$0xff]  ;;  %v300_v14 = vld [vmem:[%s457_s0 + $0x28] sm:$0xff] }
   0x6   :  { %147 = vmatpush.bf16.msra.mxu0 %v309_v1  ;;  %314 = vmatpush.bf16.msra.mxu1 %v309_v1  ;;  %v302_v15 = vld [vmem:[%s457_s0 + $0x38] sm:$0xff]  ;;  %v335_v16 = vld [vmem:[%s456_s2] ss:$0 sm:$0xff] }
   0x7   :  { %315 = vmatpush.bf16.msra.mxu2 %v309_v1  ;;  %316 = vmatpush.bf16.msra.mxu3 %v309_v1 }
   0xa   :  { %148 = vmatpush.bf16.msra.mxu0 %v308_v2  ;;  %317 = vmatpush.bf16.msra.mxu1 %v308_v2 }
   0xb   :  { %318 = vmatpush.bf16.msra.mxu2 %v308_v2  ;;  %319 = vmatpush.bf16.msra.mxu3 %v308_v2 }
   0xe   :  { %149 = vmatpush.bf16.msra.mxu0 %v307_v3  ;;  %320 = vmatpush.bf16.msra.mxu1 %v307_v3 }
   0xf   :  { %321 = vmatpush.bf16.msra.mxu2 %v307_v3  ;;  %322 = vmatpush.bf16.msra.mxu3 %v307_v3 }
  0x12   :  { %150 = vmatpush.bf16.msra.mxu0 %v306_v4  ;;  %323 = vmatpush.bf16.msra.mxu1 %v306_v4 }
  0x13   :  { %324 = vmatpush.bf16.msra.mxu2 %v306_v4  ;;  %325 = vmatpush.bf16.msra.mxu3 %v306_v4 }
  0x16   :  { %151 = vmatpush.bf16.msra.mxu0 %v305_v5  ;;  %326 = vmatpush.bf16.msra.mxu1 %v305_v5 }
  0x17   :  { %327 = vmatpush.bf16.msra.mxu2 %v305_v5  ;;  %328 = vmatpush.bf16.msra.mxu3 %v305_v5 }
  0x1a   :  { %152 = vmatpush.bf16.msra.mxu0 %v304_v6  ;;  %329 = vmatpush.bf16.msra.mxu1 %v304_v6 }
  0x1b   :  { %330 = vmatpush.bf16.msra.mxu2 %v304_v6  ;;  %331 = vmatpush.bf16.msra.mxu3 %v304_v6 }
  0x1e   :  { %153 = vmatpush.bf16.msra.mxu0 %v303_v7  ;;  %332 = vmatpush.bf16.msra.mxu1 %v303_v7 }
  0x1f   :  { %333 = vmatpush.bf16.msra.mxu2 %v303_v7  ;;  %334 = vmatpush.bf16.msra.mxu3 %v303_v7 }
  0x21   :  { %154 = vmatmul.bf16.vlgmr.msra.gmra.mxu0 %v295_v8  ;;  %164 = vmatmul.bf16.vlgmr.msra.gmra.mxu1 %v297_v9 }
  0x22   :  { %174 = vmatmul.bf16.vlgmr.msra.gmra.mxu2 %v299_v10  ;;  %184 = vmatmul.bf16.vlgmr.msra.gmra.mxu3 %v301_v11 }
  0x31   :  { %159 = vmatmul.bf16.gmra.mxu0 %v296_v12  ;;  %169 = vmatmul.bf16.gmra.mxu1 %v298_v13 }
  0x32   :  { %179 = vmatmul.bf16.gmra.mxu2 %v300_v14  ;;  %189 = vmatmul.bf16.gmra.mxu3 %v302_v15 }
  0x9e   :  { %v155_v17 = vpop.f32.mrf.mxu0  ;;  %v165_v18 = vpop.f32.mrf.mxu1 }
  0x9f   :  { %v156_v19 = vadd.f32 %v335_v16, %v155_v17  ;;  %v166_v20 = vadd.f32 %v335_v16, %v165_v18 }
  0xa1   :  { %v195_v21 = vmax.f32 %v156_v19, 0.0  ;;  %v199_v22 = vmax.f32 %v166_v20, 0.0 }
  0xa3   :  { %211 = vst [vmem:[%s458_s3] sm:$0xff] %v195_v21 }
  0xa4   :  { %215 = vst [vmem:[%s458_s3 + $0x20] sm:$0xff] %v199_v22 }
  0xa5   :  { %v175_v23 = vpop.f32.mrf.mxu2  ;;  %v185_v24 = vpop.f32.mrf.mxu3 }
  0xa6   :  { %v176_v25 = vadd.f32 %v335_v16, %v175_v23  ;;  %v186_v26 = vadd.f32 %v335_v16, %v185_v24  ;;  %v157_v27 = vpop.f32.mrf.mxu0  ;;  %v167_v28 = vpop.f32.mrf.mxu1 }
  0xa7   :  { %v158_v29 = vadd.f32 %v335_v16, %v157_v27  ;;  %v168_v30 = vadd.f32 %v335_v16, %v167_v28 }
  0xa8   :  { %v203_v31 = vmax.f32 %v176_v25, 0.0  ;;  %v207_v32 = vmax.f32 %v186_v26, 0.0 }
  0xa9   :  { %v196_v33 = vmax.f32 %v158_v29, 0.0  ;;  %v200_v34 = vmax.f32 %v168_v30, 0.0 }
  0xaa   :  { %219 = vst [vmem:[%s458_s3 + $0x40] sm:$0xff] %v203_v31 }
  0xab   :  { %223 = vst [vmem:[%s458_s3 + $0x60] sm:$0xff] %v207_v32 }
  0xac   :  { %212 = vst [vmem:[%s458_s3 + $0x8] sm:$0xff] %v196_v33 }
  0xad   :  { %216 = vst [vmem:[%s458_s3 + $0x28] sm:$0xff] %v200_v34  ;;  %v177_v35 = vpop.f32.mrf.mxu2  ;;  %v187_v36 = vpop.f32.mrf.mxu3 }
  0xae   :  { %v178_v37 = vadd.f32 %v335_v16, %v177_v35  ;;  %v188_v38 = vadd.f32 %v335_v16, %v187_v36  ;;  %v160_v39 = vpop.f32.mrf.mxu0  ;;  %v170_v40 = vpop.f32.mrf.mxu1 }
  0xaf   :  { %v161_v41 = vadd.f32 %v335_v16, %v160_v39  ;;  %v171_v42 = vadd.f32 %v335_v16, %v170_v40 }
  0xb0   :  { %v204_v43 = vmax.f32 %v178_v37, 0.0  ;;  %v208_v44 = vmax.f32 %v188_v38, 0.0 }
  0xb1   :  { %v197_v45 = vmax.f32 %v161_v41, 0.0  ;;  %v201_v46 = vmax.f32 %v171_v42, 0.0 }
  0xb2   :  { %220 = vst [vmem:[%s458_s3 + $0x48] sm:$0xff] %v204_v43 }
  0xb3   :  { %224 = vst [vmem:[%s458_s3 + $0x68] sm:$0xff] %v208_v44 }
  0xb4   :  { %213 = vst [vmem:[%s458_s3 + $0x10] sm:$0xff] %v197_v45 }
  0xb5   :  { %217 = vst [vmem:[%s458_s3 + $0x30] sm:$0xff] %v201_v46  ;;  %v180_v47 = vpop.f32.mrf.mxu2  ;;  %v190_v48 = vpop.f32.mrf.mxu3 }
  0xb6   :  { %v181_v49 = vadd.f32 %v335_v16, %v180_v47  ;;  %v191_v50 = vadd.f32 %v335_v16, %v190_v48  ;;  %v162_v51 = vpop.f32.mrf.mxu0  ;;  %v172_v52 = vpop.f32.mrf.mxu1 }
  0xb7   :  { %v163_v53 = vadd.f32 %v335_v16, %v162_v51  ;;  %v173_v54 = vadd.f32 %v335_v16, %v172_v52 }
  0xb8   :  { %v205_v55 = vmax.f32 %v181_v49, 0.0  ;;  %v209_v56 = vmax.f32 %v191_v50, 0.0 }
  0xb9   :  { %v198_v57 = vmax.f32 %v163_v53, 0.0  ;;  %v202_v58 = vmax.f32 %v173_v54, 0.0 }
  0xba   :  { %221 = vst [vmem:[%s458_s3 + $0x50] sm:$0xff] %v205_v55 }
  0xbb   :  { %225 = vst [vmem:[%s458_s3 + $0x70] sm:$0xff] %v209_v56 }
  0xbc   :  { %214 = vst [vmem:[%s458_s3 + $0x18] sm:$0xff] %v198_v57 }
  0xbd   :  { %218 = vst [vmem:[%s458_s3 + $0x38] sm:$0xff] %v202_v58  ;;  %v182_v59 = vpop.f32.mrf.mxu2  ;;  %v192_v60 = vpop.f32.mrf.mxu3 }
  0xbe   :  { %v183_v61 = vadd.f32 %v335_v16, %v182_v59  ;;  %v193_v62 = vadd.f32 %v335_v16, %v192_v60 }
  0xc0   :  { %v206_v63 = vmax.f32 %v183_v61, 0.0  ;;  %v210_v0 = vmax.f32 %v193_v62, 0.0 }
  0xc2   :  { %222 = vst [vmem:[%s458_s3 + $0x58] sm:$0xff] %v206_v63 }
  0xc3   :  { %226 = vst [vmem:[%s458_s3 + $0x78] sm:$0xff] %v210_v0 }

// kernel: autoencoder_forward.7
= control target key start
LH: loop header
LB: loop body
LE: loop exit
PB: predicated region body
PF: predicated region fallthrough
CT: control target
= control target key end

     0   :  { %s621_s1 = inlined_call_operand.vmem [shape: bf16[384,128], index: 1, kind: input, shape index: {}]   ;;  %s622_s2 = inlined_call_operand.vmem [shape: f32[1,128], index: 2, kind: input, shape index: {}]   ;;  %s623_s0 = inlined_call_operand.vmem [shape: bf16[32,384], index: 0, kind: input, shape index: {}]   ;;  %s624_s3 = inlined_call_operand.vmem [shape: f32[32,128], index: 3, kind: output, shape index: {}]  }
   0x1   :  { %v452_v0 = vld [vmem:[%s621_s1 + $0x38] sm:$0xff]  ;;  %v451_v3 = vld [vmem:[%s621_s1 + $0x30] sm:$0xff]  ;;  %v450_v6 = vld [vmem:[%s621_s1 + $0x28] sm:$0xff] }
   0x2   :  { %v460_v1 = vld [vmem:[%s621_s1 + $0x78] sm:$0xff]  ;;  %250 = vmatpush.bf16.msra.mxu0 %v452_v0  ;;  %v459_v4 = vld [vmem:[%s621_s1 + $0x70] sm:$0xff]  ;;  %469 = vmatpush.bf16.msra.mxu3 %v452_v0  ;;  %v458_v7 = vld [vmem:[%s621_s1 + $0x68] sm:$0xff] }
   0x3   :  { %v468_v2 = vld [vmem:[%s621_s1 + $0xb8] sm:$0xff]  ;;  %269 = vmatpush.bf16.msra.mxu1 %v460_v1  ;;  %v467_v5 = vld [vmem:[%s621_s1 + $0xb0] sm:$0xff]  ;;  %v466_v8 = vld [vmem:[%s621_s1 + $0xa8] sm:$0xff] }
   0x4   :  { %288 = vmatpush.bf16.msra.mxu2 %v468_v2  ;;  %v449_v9 = vld [vmem:[%s621_s1 + $0x20] sm:$0xff]  ;;  %v448_v12 = vld [vmem:[%s621_s1 + $0x18] sm:$0xff]  ;;  %v447_v15 = vld [vmem:[%s621_s1 + $0x10] sm:$0xff] }
   0x5   :  { %v457_v10 = vld [vmem:[%s621_s1 + $0x60] sm:$0xff]  ;;  %v456_v13 = vld [vmem:[%s621_s1 + $0x58] sm:$0xff]  ;;  %v455_v16 = vld [vmem:[%s621_s1 + $0x50] sm:$0xff] }
   0x6   :  { %251 = vmatpush.bf16.msra.mxu0 %v451_v3  ;;  %470 = vmatpush.bf16.msra.mxu3 %v451_v3  ;;  %v465_v11 = vld [vmem:[%s621_s1 + $0xa0] sm:$0xff]  ;;  %v464_v14 = vld [vmem:[%s621_s1 + $0x98] sm:$0xff]  ;;  %v463_v17 = vld [vmem:[%s621_s1 + $0x90] sm:$0xff] }
   0x7   :  { %270 = vmatpush.bf16.msra.mxu1 %v459_v4  ;;  %v446_v18 = vld [vmem:[%s621_s1 + $0x8] sm:$0xff]  ;;  %v445_v21 = vld [vmem:[%s621_s1] sm:$0xff]  ;;  %v323_v27 = vld [vmem:[%s623_s0 + $0xc] sm:$0xf0] }
   0x8   :  { %289 = vmatpush.bf16.msra.mxu2 %v467_v5  ;;  %v454_v19 = vld [vmem:[%s621_s1 + $0x48] sm:$0xff]  ;;  %v453_v22 = vld [vmem:[%s621_s1 + $0x40] sm:$0xff]  ;;  %v441_v29 = vld [vmem:[%s623_s0 + $0x10] sm:$0xf0] }
   0x9   :  { %v462_v20 = vld [vmem:[%s621_s1 + $0x88] sm:$0xff]  ;;  %v461_v23 = vld [vmem:[%s621_s1 + $0x80] sm:$0xff]  ;;  %v333_v30 = vld [vmem:[%s623_s0 + $0x18] sm:$0xf] }
   0xa   :  { %252 = vmatpush.bf16.msra.mxu0 %v450_v6  ;;  %471 = vmatpush.bf16.msra.mxu3 %v450_v6  ;;  %v321_v24 = vld [vmem:[%s623_s0] sm:$0xf]  ;;  %v440_v25 = vld [vmem:[%s623_s0 + $0x8] sm:$0xf0]  ;;  %v439_v26 = vld [vmem:[%s623_s0 + $0x4] sm:$0xf] }
   0xb   :  { %271 = vmatpush.bf16.msra.mxu1 %v458_v7  ;;  %v329_v28 = vld [vmem:[%s623_s0 + $0x8] sm:$0xf]  ;;  %v443_v31 = vld [vmem:[%s623_s0 + $0x20] sm:$0xf0]  ;;  %v322_v32 = vor.u32 %v440_v25, %v321_v24  ;;  %v326_v33 = vor.u32 %v439_v26, %v323_v27  ;;  %v442_v36 = vld [vmem:[%s623_s0 + $0x1c] sm:$0xf] }
   0xc   :  { %290 = vmatpush.bf16.msra.mxu2 %v466_v8  ;;  %v330_v34 = vor.u32 %v441_v29, %v329_v28  ;;  %v334_v35 = vor.u32 %v443_v31, %v333_v30  ;;  %v335_v37 = vld [vmem:[%s623_s0 + $0x24] sm:$0xf0]  ;;  %v341_v38 = vld [vmem:[%s623_s0 + $0x20] sm:$0xf]  ;;  %v444_v39 = vld [vmem:[%s623_s0 + $0x28] sm:$0xf0] }
   0xd   :  { %v338_v40 = vor.u32 %v442_v36, %v335_v37  ;;  %v342_v41 = vor.u32 %v444_v39, %v341_v38  ;;  %v477_v42 = vld [vmem:[%s622_s2] ss:$0 sm:$0xff] }
   0xe   :  { %253 = vmatpush.bf16.msra.mxu0 %v449_v9  ;;  %472 = vmatpush.bf16.msra.mxu3 %v449_v9 }
   0xf   :  { %272 = vmatpush.bf16.msra.mxu1 %v457_v10 }
  0x10   :  { %291 = vmatpush.bf16.msra.mxu2 %v465_v11 }
  0x12   :  { %254 = vmatpush.bf16.msra.mxu0 %v448_v12  ;;  %473 = vmatpush.bf16.msra.mxu3 %v448_v12 }
  0x13   :  { %273 = vmatpush.bf16.msra.mxu1 %v456_v13 }
  0x14   :  { %292 = vmatpush.bf16.msra.mxu2 %v464_v14 }
  0x16   :  { %255 = vmatpush.bf16.msra.mxu0 %v447_v15  ;;  %474 = vmatpush.bf16.msra.mxu3 %v447_v15 }
  0x17   :  { %274 = vmatpush.bf16.msra.mxu1 %v455_v16 }
  0x18   :  { %293 = vmatpush.bf16.msra.mxu2 %v463_v17 }
  0x1a   :  { %256 = vmatpush.bf16.msra.mxu0 %v446_v18  ;;  %475 = vmatpush.bf16.msra.mxu3 %v446_v18 }
  0x1b   :  { %275 = vmatpush.bf16.msra.mxu1 %v454_v19 }
  0x1c   :  { %294 = vmatpush.bf16.msra.mxu2 %v462_v20 }
  0x1e   :  { %257 = vmatpush.bf16.msra.mxu0 %v445_v21  ;;  %476 = vmatpush.bf16.msra.mxu3 %v445_v21 }
  0x1f   :  { %276 = vmatpush.bf16.msra.mxu1 %v453_v22 }
  0x20   :  { %295 = vmatpush.bf16.msra.mxu2 %v461_v23 }
  0x21   :  { %258 = vmatmul.bf16.vlgmr.msra.gmra.mxu0 %v322_v32  ;;  %263 = vmatmul.bf16.vlgmr.msra.gmra.mxu3 %v334_v35 }
  0x22   :  { %277 = vmatmul.bf16.vlgmr.msra.gmra.mxu1 %v326_v33 }
  0x23   :  { %296 = vmatmul.bf16.vlgmr.msra.gmra.mxu2 %v330_v34 }
  0x32   :  { %282 = vmatmul.bf16.gmra.mxu1 %v338_v40 }
  0x33   :  { %301 = vmatmul.bf16.gmra.mxu2 %v342_v41 }
  0x9e   :  { %v259_v43 = vpop.f32.mrf.mxu0 }
  0x9f   :  { %v278_v44 = vpop.f32.mrf.mxu1  ;;  %v260_v45 = vadd.f32 %v477_v42, %v259_v43 }
  0xa1   :  { %v279_v46 = vadd.f32 %v278_v44, %v260_v45 }
  0xa4   :  { %v264_v54 = vpop.f32.mrf.mxu3 }
  0xa5   :  { %v265_v56 = vadd.f32 %v477_v42, %v264_v54 }
  0xa6   :  { %v297_v47 = vpop.f32.mrf.mxu2  ;;  %v261_v49 = vpop.f32.mrf.mxu0 }
  0xa7   :  { %v298_v48 = vadd.f32 %v297_v47, %v279_v46  ;;  %v280_v50 = vpop.f32.mrf.mxu1  ;;  %v262_v52 = vadd.f32 %v477_v42, %v261_v49 }
  0xa9   :  { %v307_v51 = vmax.f32 %v298_v48, 0.0  ;;  %v281_v53 = vadd.f32 %v280_v50, %v262_v52 }
  0xab   :  { %311 = vst [vmem:[%s624_s3] sm:$0xff] %v307_v51 }
  0xac   :  { %v266_v63 = vpop.f32.mrf.mxu3 }
  0xad   :  { %v267_v2 = vadd.f32 %v477_v42, %v266_v63 }
  0xae   :  { %v299_v55 = vpop.f32.mrf.mxu2 }
  0xaf   :  { %v300_v57 = vadd.f32 %v299_v55, %v281_v53  ;;  %v283_v58 = vpop.f32.mrf.mxu1 }
  0xb0   :  { %v284_v60 = vadd.f32 %v283_v58, %v265_v56 }
  0xb1   :  { %v308_v59 = vmax.f32 %v300_v57, 0.0 }
  0xb3   :  { %312 = vst [vmem:[%s624_s3 + $0x8] sm:$0xff] %v308_v59 }
  0xb6   :  { %v302_v61 = vpop.f32.mrf.mxu2 }
  0xb7   :  { %v303_v62 = vadd.f32 %v302_v61, %v284_v60  ;;  %v285_v1 = vpop.f32.mrf.mxu1 }
  0xb8   :  { %v286_v3 = vadd.f32 %v285_v1, %v267_v2 }
  0xb9   :  { %v309_v0 = vmax.f32 %v303_v62, 0.0 }
  0xbb   :  { %313 = vst [vmem:[%s624_s3 + $0x10] sm:$0xff] %v309_v0 }
  0xbe   :  { %v304_v4 = vpop.f32.mrf.mxu2 }
  0xbf   :  { %v305_v5 = vadd.f32 %v304_v4, %v286_v3 }
  0xc1   :  { %v310_v6 = vmax.f32 %v305_v5, 0.0 }
  0xc3   :  { %314 = vst [vmem:[%s624_s3 + $0x18] sm:$0xff] %v310_v6 }

// kernel: autoencoder_forward.8
= control target key start
LH: loop header
LB: loop body
LE: loop exit
PB: predicated region body
PF: predicated region fallthrough
CT: control target
= control target key end

     0   :  { %s786_s1 = inlined_call_operand.vmem [shape: bf16[640,128], index: 1, kind: input, shape index: {}]   ;;  %s787_s2 = inlined_call_operand.vmem [shape: f32[1,128], index: 2, kind: input, shape index: {}]   ;;  %s788_s0 = inlined_call_operand.vmem [shape: bf16[8,640], index: 0, kind: input, shape index: {}]   ;;  %s789_s3 = inlined_call_operand.vmem [shape: f32[8,128], index: 3, kind: output, shape index: {}]  }
   0x1   :  { %v597_v0 = vld [vmem:[%s786_s1 + $0x38] sm:$0xff]  ;;  %v596_v3 = vld [vmem:[%s786_s1 + $0x30] sm:$0xff]  ;;  %v595_v8 = vld [vmem:[%s786_s1 + $0x28] sm:$0xff] }
   0x2   :  { %v613_v1 = vld [vmem:[%s786_s1 + $0xb8] sm:$0xff]  ;;  %359 = vmatpush.bf16.msra.mxu0 %v597_v0  ;;  %v612_v5 = vld [vmem:[%s786_s1 + $0xb0] sm:$0xff]  ;;  %v611_v9 = vld [vmem:[%s786_s1 + $0xa8] sm:$0xff] }
   0x3   :  { %v621_v2 = vld [vmem:[%s786_s1 + $0xf8] sm:$0xff]  ;;  %385 = vmatpush.bf16.msra.mxu2 %v613_v1  ;;  %v620_v6 = vld [vmem:[%s786_s1 + $0xf0] sm:$0xff]  ;;  %v619_v10 = vld [vmem:[%s786_s1 + $0xe8] sm:$0xff] }
   0x4   :  { %v605_v4 = vld [vmem:[%s786_s1 + $0x78] sm:$0xff]  ;;  %398 = vmatpush.bf16.msra.mxu3 %v621_v2  ;;  %v604_v7 = vld [vmem:[%s786_s1 + $0x70] sm:$0xff]  ;;  %v603_v11 = vld [vmem:[%s786_s1 + $0x68] sm:$0xff] }
   0x5   :  { %372 = vmatpush.bf16.msra.mxu1 %v605_v4  ;;  %v594_v12 = vld [vmem:[%s786_s1 + $0x20] sm:$0xff]  ;;  %v593_v16 = vld [vmem:[%s786_s1 + $0x18] sm:$0xff]  ;;  %v592_v20 = vld [vmem:[%s786_s1 + $0x10] sm:$0xff] }
   0x6   :  { %360 = vmatpush.bf16.msra.mxu0 %v596_v3  ;;  %v610_v13 = vld [vmem:[%s786_s1 + $0xa0] sm:$0xff]  ;;  %v609_v17 = vld [vmem:[%s786_s1 + $0x98] sm:$0xff]  ;;  %v608_v21 = vld [vmem:[%s786_s1 + $0x90] sm:$0xff] }
   0x7   :  { %386 = vmatpush.bf16.msra.mxu2 %v612_v5  ;;  %v618_v14 = vld [vmem:[%s786_s1 + $0xe0] sm:$0xff]  ;;  %v617_v18 = vld [vmem:[%s786_s1 + $0xd8] sm:$0xff]  ;;  %v616_v22 = vld [vmem:[%s786_s1 + $0xd0] sm:$0xff] }
   0x8   :  { %399 = vmatpush.bf16.msra.mxu3 %v620_v6  ;;  %v602_v15 = vld [vmem:[%s786_s1 + $0x60] sm:$0xff]  ;;  %v601_v19 = vld [vmem:[%s786_s1 + $0x58] sm:$0xff]  ;;  %v600_v23 = vld [vmem:[%s786_s1 + $0x50] sm:$0xff] }
   0x9   :  { %373 = vmatpush.bf16.msra.mxu1 %v604_v7  ;;  %v591_v24 = vld [vmem:[%s786_s1 + $0x8] sm:$0xff]  ;;  %v14_v25 = vld [vmem:[%s788_s0] sm:$0xff]  ;;  %v629_v33 = vld [vmem:[%s786_s1 + $0x138] sm:$0xff] }
   0xa   :  { %361 = vmatpush.bf16.msra.mxu0 %v595_v8  ;;  %v607_v26 = vld [vmem:[%s786_s1 + $0x88] sm:$0xff]  ;;  %v104_v30 = vunpack.c.l.b16 %v14_v25  ;;  %v590_v31 = vld [vmem:[%s786_s1] sm:$0xff]  ;;  %v105_v38 = vunpack.c.h.b16 %v14_v25  ;;  %v628_v41 = vld [vmem:[%s786_s1 + $0x130] sm:$0xff] }
   0xb   :  { %387 = vmatpush.bf16.msra.mxu2 %v611_v9  ;;  %v615_v27 = vld [vmem:[%s786_s1 + $0xc8] sm:$0xff]  ;;  %v606_v34 = vld [vmem:[%s786_s1 + $0x80] sm:$0xff]  ;;  %v625_v46 = vld [vmem:[%s786_s1 + $0x118] sm:$0xff] }
   0xc   :  { %400 = vmatpush.bf16.msra.mxu3 %v619_v10  ;;  %v15_v28 = vld [vmem:[%s788_s0 + $0x8] sm:$0xff]  ;;  %v614_v36 = vld [vmem:[%s786_s1 + $0xc0] sm:$0xff]  ;;  %v109_v39 = vpack.c.b16 %v104_v30, %v104_v30  ;;  %v110_v43 = vpack.c.b16 %v105_v38, %v105_v38  ;;  %v624_v47 = vld [vmem:[%s786_s1 + $0x110] sm:$0xff] }
   0xd   :  { %374 = vmatpush.bf16.msra.mxu1 %v603_v11  ;;  %v599_v29 = vld [vmem:[%s786_s1 + $0x48] sm:$0xff]  ;;  %v106_v32 = vunpack.c.l.b16 %v15_v28  ;;  %v107_v35 = vunpack.c.h.b16 %v15_v28  ;;  %v598_v37 = vld [vmem:[%s786_s1 + $0x40] sm:$0xff]  ;;  %v16_v49 = vld [vmem:[%s788_s0 + $0x10] sm:$0xf] }
   0xe   :  { %362 = vmatpush.bf16.msra.mxu0 %v594_v12  ;;  %v627_v44 = vld [vmem:[%s786_s1 + $0x128] sm:$0xff]  ;;  %v626_v45 = vld [vmem:[%s786_s1 + $0x120] sm:$0xff]  ;;  %v108_v50 = vunpack.c.l.b16 %v16_v49 }
   0xf   :  { %388 = vmatpush.bf16.msra.mxu2 %v610_v13  ;;  %v111_v40 = vpack.c.b16 %v106_v32, %v106_v32  ;;  %v112_v42 = vpack.c.b16 %v107_v35, %v107_v35  ;;  %v623_v48 = vld [vmem:[%s786_s1 + $0x108] sm:$0xff]  ;;  %v622_v51 = vld [vmem:[%s786_s1 + $0x100] sm:$0xff] }
  0x10   :  { %401 = vmatpush.bf16.msra.mxu3 %v618_v14  ;;  %v113_v52 = vpack.c.b16 %v108_v50, %v108_v50  ;;  %v630_v59 = vld [vmem:[%s787_s2] ss:$0 sm:$0xff] }
  0x11   :  { %375 = vmatpush.bf16.msra.mxu1 %v602_v15 }
  0x12   :  { %363 = vmatpush.bf16.msra.mxu0 %v593_v16 }
  0x13   :  { %389 = vmatpush.bf16.msra.mxu2 %v609_v17 }
  0x14   :  { %402 = vmatpush.bf16.msra.mxu3 %v617_v18 }
  0x15   :  { %376 = vmatpush.bf16.msra.mxu1 %v601_v19 }
  0x16   :  { %364 = vmatpush.bf16.msra.mxu0 %v592_v20 }
  0x17   :  { %390 = vmatpush.bf16.msra.mxu2 %v608_v21 }
  0x18   :  { %403 = vmatpush.bf16.msra.mxu3 %v616_v22 }
  0x19   :  { %377 = vmatpush.bf16.msra.mxu1 %v600_v23 }
  0x1a   :  { %365 = vmatpush.bf16.msra.mxu0 %v591_v24 }
  0x1b   :  { %391 = vmatpush.bf16.msra.mxu2 %v607_v26 }
  0x1c   :  { %404 = vmatpush.bf16.msra.mxu3 %v615_v27 }
  0x1d   :  { %378 = vmatpush.bf16.msra.mxu1 %v599_v29 }
  0x1e   :  { %366 = vmatpush.bf16.msra.mxu0 %v590_v31 }
  0x1f   :  { %392 = vmatpush.bf16.msra.mxu2 %v606_v34 }
  0x20   :  { %405 = vmatpush.bf16.msra.mxu3 %v614_v36 }
  0x21   :  { %379 = vmatpush.bf16.msra.mxu1 %v598_v37  ;;  %367 = vmatmul.bf16.vlgmr.msra.gmra.mxu0 %v109_v39 }
  0x22   :  { %411 = vmatpush.bf16.msrb.mxu0 %v629_v33  ;;  %393 = vmatmul.bf16.vlgmr.msra.gmra.mxu2 %v111_v40 }
  0x23   :  { %406 = vmatmul.bf16.vlgmr.msra.gmra.mxu3 %v112_v42 }
  0x24   :  { %380 = vmatmul.bf16.vlgmr.msra.gmra.mxu1 %v110_v43 }
  0x26   :  { %412 = vmatpush.bf16.msrb.mxu0 %v628_v41 }
  0x2a   :  { %413 = vmatpush.bf16.msrb.mxu0 %v627_v44 }
  0x2e   :  { %414 = vmatpush.bf16.msrb.mxu0 %v626_v45 }
  0x32   :  { %415 = vmatpush.bf16.msrb.mxu0 %v625_v46 }
  0x36   :  { %416 = vmatpush.bf16.msrb.mxu0 %v624_v47 }
  0x3a   :  { %417 = vmatpush.bf16.msrb.mxu0 %v623_v48 }
  0x3e   :  { %418 = vmatpush.bf16.msrb.mxu0 %v622_v51 }
  0x41   :  { %419 = vmatmul.bf16.vlgmr.msrb.gmra.mxu0 %v113_v52 }
  0x9e   :  { %v368_v53 = vpop.f32.mrf.mxu0 }
  0x9f   :  { %v369_v61 = vadd.f32 %v630_v59, %v368_v53 }
  0xa1   :  { %v381_v54 = vpop.f32.mrf.mxu1 }
  0xa2   :  { %v382_v63 = vadd.f32 %v381_v54, %v369_v61 }
  0xa5   :  { %v394_v55 = vpop.f32.mrf.mxu2 }
  0xa6   :  { %v370_v56 = vpop.f32.mrf.mxu0  ;;  %v407_v57 = vpop.f32.mrf.mxu3  ;;  %v395_v0 = vadd.f32 %v394_v55, %v382_v63 }
  0xa8   :  { %v408_v1 = vadd.f32 %v407_v57, %v395_v0 }
  0xa9   :  { %v383_v58 = vpop.f32.mrf.mxu1 }
  0xad   :  { %v396_v60 = vpop.f32.mrf.mxu2 }
  0xae   :  { %v409_v62 = vpop.f32.mrf.mxu3 }
  0xbe   :  { %v420_v2 = vpop.f32.mrf.mxu0 }
  0xbf   :  { %v421_v3 = vadd.f32 %v420_v2, %v408_v1 }
  0xc1   :  { %v424_v4 = vmax.f32 %v421_v3, 0.0 }
  0xc3   :  { %425 = vst [vmem:[%s789_s3] sm:$0xff] %v424_v4 }
  0xc6   :  { %v422_v5 = vpop.f32.mrf.mxu0 }

// kernel: autoencoder_forward.9
= control target key start
LH: loop header
LB: loop body
LE: loop exit
PB: predicated region body
PF: predicated region fallthrough
CT: control target
= control target key end

     0   :  { %s1707_s1 = inlined_call_operand.vmem [shape: bf16[1152,128], index: 1, kind: input, shape index: {}]   ;;  %s1708_s0 = inlined_call_operand.vmem [shape: bf16[32,1152], index: 0, kind: input, shape index: {}]   ;;  %s1709_s2 = inlined_call_operand.vmem [shape: f32[1,128], index: 2, kind: input, shape index: {}]   ;;  %s1710_s3 = inlined_call_operand.vmem [shape: f32[32,128], index: 3, kind: output, shape index: {}]  }
   0x1   :  { %v1274_v0 = vld [vmem:[%s1707_s1 + $0x38] sm:$0xff]  ;;  %v1273_v4 = vld [vmem:[%s1707_s1 + $0x30] sm:$0xff]  ;;  %v1272_v8 = vld [vmem:[%s1707_s1 + $0x28] sm:$0xff] }
   0x2   :  { %v1282_v1 = vld [vmem:[%s1707_s1 + $0x78] sm:$0xff]  ;;  %706 = vmatpush.bf16.msra.mxu0 %v1274_v0  ;;  %v1281_v5 = vld [vmem:[%s1707_s1 + $0x70] sm:$0xff]  ;;  %v1280_v9 = vld [vmem:[%s1707_s1 + $0x68] sm:$0xff] }
   0x3   :  { %v1290_v2 = vld [vmem:[%s1707_s1 + $0xb8] sm:$0xff]  ;;  %725 = vmatpush.bf16.msra.mxu1 %v1282_v1  ;;  %v1289_v6 = vld [vmem:[%s1707_s1 + $0xb0] sm:$0xff]  ;;  %v1288_v10 = vld [vmem:[%s1707_s1 + $0xa8] sm:$0xff] }
   0x4   :  { %v1298_v3 = vld [vmem:[%s1707_s1 + $0xf8] sm:$0xff]  ;;  %744 = vmatpush.bf16.msra.mxu2 %v1290_v2  ;;  %v1297_v7 = vld [vmem:[%s1707_s1 + $0xf0] sm:$0xff]  ;;  %v1296_v11 = vld [vmem:[%s1707_s1 + $0xe8] sm:$0xff] }
   0x5   :  { %763 = vmatpush.bf16.msra.mxu3 %v1298_v3  ;;  %v1271_v12 = vld [vmem:[%s1707_s1 + $0x20] sm:$0xff]  ;;  %v1270_v16 = vld [vmem:[%s1707_s1 + $0x18] sm:$0xff]  ;;  %v1269_v20 = vld [vmem:[%s1707_s1 + $0x10] sm:$0xff] }
   0x6   :  { %707 = vmatpush.bf16.msra.mxu0 %v1273_v4  ;;  %v1279_v13 = vld [vmem:[%s1707_s1 + $0x60] sm:$0xff]  ;;  %v1278_v17 = vld [vmem:[%s1707_s1 + $0x58] sm:$0xff]  ;;  %v1277_v21 = vld [vmem:[%s1707_s1 + $0x50] sm:$0xff] }
   0x7   :  { %726 = vmatpush.bf16.msra.mxu1 %v1281_v5  ;;  %v1287_v14 = vld [vmem:[%s1707_s1 + $0xa0] sm:$0xff]  ;;  %v1286_v18 = vld [vmem:[%s1707_s1 + $0x98] sm:$0xff]  ;;  %v1285_v22 = vld [vmem:[%s1707_s1 + $0x90] sm:$0xff] }
   0x8   :  { %745 = vmatpush.bf16.msra.mxu2 %v1289_v6  ;;  %v1295_v15 = vld [vmem:[%s1707_s1 + $0xe0] sm:$0xff]  ;;  %v1294_v19 = vld [vmem:[%s1707_s1 + $0xd8] sm:$0xff]  ;;  %v1293_v23 = vld [vmem:[%s1707_s1 + $0xd0] sm:$0xff] }
   0x9   :  { %764 = vmatpush.bf16.msra.mxu3 %v1297_v7  ;;  %v1268_v24 = vld [vmem:[%s1707_s1 + $0x8] sm:$0xff]  ;;  %v1267_v28 = vld [vmem:[%s1707_s1] sm:$0xff]  ;;  %v901_v39 = vld [vmem:[%s1708_s0 + $0x2c] sm:$0xf0] }
   0xa   :  { %708 = vmatpush.bf16.msra.mxu0 %v1272_v8  ;;  %v1276_v25 = vld [vmem:[%s1707_s1 + $0x48] sm:$0xff]  ;;  %v1275_v29 = vld [vmem:[%s1707_s1 + $0x40] sm:$0xff]  ;;  %v1306_v40 = vld [vmem:[%s1707_s1 + $0x138] sm:$0xff] }
   0xb   :  { %727 = vmatpush.bf16.msra.mxu1 %v1280_v9  ;;  %v1284_v26 = vld [vmem:[%s1707_s1 + $0x88] sm:$0xff]  ;;  %v1283_v30 = vld [vmem:[%s1707_s1 + $0x80] sm:$0xff]  ;;  %v1314_v41 = vld [vmem:[%s1707_s1 + $0x178] sm:$0xff] }
   0xc   :  { %746 = vmatpush.bf16.msra.mxu2 %v1288_v10  ;;  %v1292_v27 = vld [vmem:[%s1707_s1 + $0xc8] sm:$0xff]  ;;  %v1291_v31 = vld [vmem:[%s1707_s1 + $0xc0] sm:$0xff]  ;;  %v1322_v46 = vld [vmem:[%s1707_s1 + $0x1b8] sm:$0xff] }
   0xd   :  { %765 = vmatpush.bf16.msra.mxu3 %v1296_v11  ;;  %v891_v32 = vld [vmem:[%s1708_s0] sm:$0xf]  ;;  %v1253_v33 = vld [vmem:[%s1708_s0 + $0x20] sm:$0xf0]  ;;  %v893_v35 = vld [vmem:[%s1708_s0 + $0x24] sm:$0xf0] }
   0xe   :  { %709 = vmatpush.bf16.msra.mxu0 %v1271_v12  ;;  %v1249_v34 = vld [vmem:[%s1708_s0 + $0x4] sm:$0xf]  ;;  %v899_v36 = vld [vmem:[%s1708_s0 + $0x8] sm:$0xf]  ;;  %v1254_v37 = vld [vmem:[%s1708_s0 + $0x28] sm:$0xf0]  ;;  %v892_v42 = vor.u32 %v1253_v33, %v891_v32 }
   0xf   :  { %728 = vmatpush.bf16.msra.mxu1 %v1279_v13  ;;  %v1250_v38 = vld [vmem:[%s1708_s0 + $0xc] sm:$0xf]  ;;  %v896_v43 = vor.u32 %v1249_v34, %v893_v35  ;;  %v900_v44 = vor.u32 %v1254_v37, %v899_v36  ;;  %v1330_v47 = vld [vmem:[%s1707_s1 + $0x1f8] sm:$0xff]  ;;  %v1305_v48 = vld [vmem:[%s1707_s1 + $0x130] sm:$0xff] }
  0x10   :  { %747 = vmatpush.bf16.msra.mxu2 %v1287_v14  ;;  %v904_v45 = vor.u32 %v1250_v38, %v901_v39  ;;  %v1313_v49 = vld [vmem:[%s1707_s1 + $0x170] sm:$0xff]  ;;  %v1304_v52 = vld [vmem:[%s1707_s1 + $0x128] sm:$0xff]  ;;  %v1303_v56 = vld [vmem:[%s1707_s1 + $0x120] sm:$0xff] }
  0x11   :  { %766 = vmatpush.bf16.msra.mxu3 %v1295_v15  ;;  %v1321_v50 = vld [vmem:[%s1707_s1 + $0x1b0] sm:$0xff]  ;;  %v1312_v53 = vld [vmem:[%s1707_s1 + $0x168] sm:$0xff]  ;;  %v1311_v57 = vld [vmem:[%s1707_s1 + $0x160] sm:$0xff] }
  0x12   :  { %710 = vmatpush.bf16.msra.mxu0 %v1270_v16  ;;  %v1329_v51 = vld [vmem:[%s1707_s1 + $0x1f0] sm:$0xff]  ;;  %v1320_v54 = vld [vmem:[%s1707_s1 + $0x1a8] sm:$0xff]  ;;  %v1319_v58 = vld [vmem:[%s1707_s1 + $0x1a0] sm:$0xff] }
  0x13   :  { %729 = vmatpush.bf16.msra.mxu1 %v1278_v17  ;;  %v1328_v55 = vld [vmem:[%s1707_s1 + $0x1e8] sm:$0xff]  ;;  %v1327_v59 = vld [vmem:[%s1707_s1 + $0x1e0] sm:$0xff]  ;;  %v929_v63 = vld [vmem:[%s1708_s0 + $0x6c] sm:$0xf0] }
  0x14   :  { %748 = vmatpush.bf16.msra.mxu2 %v1286_v18  ;;  %v927_v60 = vld [vmem:[%s1708_s0 + $0x48] sm:$0xf]  ;;  %v1262_v61 = vld [vmem:[%s1708_s0 + $0x68] sm:$0xf0]  ;;  %v935_v0 = vld [vmem:[%s1708_s0 + $0x50] sm:$0xf] }
  0x15   :  { %767 = vmatpush.bf16.msra.mxu3 %v1294_v19  ;;  %v1258_v62 = vld [vmem:[%s1708_s0 + $0x4c] sm:$0xf]  ;;  %v1263_v1 = vld [vmem:[%s1708_s0 + $0x70] sm:$0xf0]  ;;  %v937_v3 = vld [vmem:[%s1708_s0 + $0x74] sm:$0xf0]  ;;  %v928_v6 = vor.u32 %v1262_v61, %v927_v60 }
  0x16   :  { %711 = vmatpush.bf16.msra.mxu0 %v1269_v20  ;;  %v1259_v2 = vld [vmem:[%s1708_s0 + $0x54] sm:$0xf]  ;;  %v1302_v4 = vld [vmem:[%s1707_s1 + $0x118] sm:$0xff]  ;;  %v932_v7 = vor.u32 %v1258_v62, %v929_v63  ;;  %v936_v8 = vor.u32 %v1263_v1, %v935_v0  ;;  %v1300_v16 = vld [vmem:[%s1707_s1 + $0x108] sm:$0xff] }
  0x17   :  { %730 = vmatpush.bf16.msra.mxu1 %v1277_v21  ;;  %v1310_v5 = vld [vmem:[%s1707_s1 + $0x158] sm:$0xff]  ;;  %v940_v9 = vor.u32 %v1259_v2, %v937_v3  ;;  %v1301_v12 = vld [vmem:[%s1707_s1 + $0x110] sm:$0xff]  ;;  %v1308_v17 = vld [vmem:[%s1707_s1 + $0x148] sm:$0xff] }
  0x18   :  { %749 = vmatpush.bf16.msra.mxu2 %v1285_v22  ;;  %v1318_v10 = vld [vmem:[%s1707_s1 + $0x198] sm:$0xff]  ;;  %v1309_v13 = vld [vmem:[%s1707_s1 + $0x150] sm:$0xff]  ;;  %v1316_v18 = vld [vmem:[%s1707_s1 + $0x188] sm:$0xff] }
  0x19   :  { %768 = vmatpush.bf16.msra.mxu3 %v1293_v23  ;;  %v1326_v11 = vld [vmem:[%s1707_s1 + $0x1d8] sm:$0xff]  ;;  %v1317_v14 = vld [vmem:[%s1707_s1 + $0x190] sm:$0xff]  ;;  %v1324_v19 = vld [vmem:[%s1707_s1 + $0x1c8] sm:$0xff] }
  0x1a   :  { %712 = vmatpush.bf16.msra.mxu0 %v1268_v24  ;;  %v1325_v15 = vld [vmem:[%s1707_s1 + $0x1d0] sm:$0xff]  ;;  %v1299_v20 = vld [vmem:[%s1707_s1 + $0x100] sm:$0xff]  ;;  %v1336_v38 = vld [vmem:[%s1707_s1 + $0x228] sm:$0xff] }
  0x1b   :  { %731 = vmatpush.bf16.msra.mxu1 %v1276_v25  ;;  %v1307_v21 = vld [vmem:[%s1707_s1 + $0x140] sm:$0xff]  ;;  %v907_v24 = vld [vmem:[%s1708_s0 + $0x10] sm:$0xf]  ;;  %v1255_v25 = vld [vmem:[%s1708_s0 + $0x30] sm:$0xf0] }
  0x1c   :  { %750 = vmatpush.bf16.msra.mxu2 %v1284_v26  ;;  %v1315_v22 = vld [vmem:[%s1707_s1 + $0x180] sm:$0xff]  ;;  %v1338_v26 = vld [vmem:[%s1707_s1 + $0x238] sm:$0xff]  ;;  %v908_v33 = vor.u32 %v1255_v25, %v907_v24  ;;  %v1337_v37 = vld [vmem:[%s1707_s1 + $0x230] sm:$0xff] }
  0x1d   :  { %769 = vmatpush.bf16.msra.mxu3 %v1292_v27  ;;  %v1323_v23 = vld [vmem:[%s1707_s1 + $0x1c0] sm:$0xff]  ;;  %v1251_v27 = vld [vmem:[%s1708_s0 + $0x14] sm:$0xf] }
  0x1e   :  { %713 = vmatpush.bf16.msra.mxu0 %v1267_v28  ;;  %v909_v28 = vld [vmem:[%s1708_s0 + $0x34] sm:$0xf0]  ;;  %v917_v32 = vld [vmem:[%s1708_s0 + $0x3c] sm:$0xf0] }
  0x1f   :  { %732 = vmatpush.bf16.msra.mxu1 %v1275_v29  ;;  %v915_v29 = vld [vmem:[%s1708_s0 + $0x18] sm:$0xf]  ;;  %v912_v34 = vor.u32 %v1251_v27, %v909_v28  ;;  %v1335_v39 = vld [vmem:[%s1707_s1 + $0x220] sm:$0xff] }
  0x20   :  { %751 = vmatpush.bf16.msra.mxu2 %v1283_v30  ;;  %v1256_v30 = vld [vmem:[%s1708_s0 + $0x38] sm:$0xf0] }
  0x21   :  { %770 = vmatpush.bf16.msra.mxu3 %v1291_v31  ;;  %714 = vmatmul.bf16.vlgmr.msra.gmra.mxu0 %v892_v42  ;;  %v1252_v31 = vld [vmem:[%s1708_s0 + $0x1c] sm:$0xf]  ;;  %v916_v35 = vor.u32 %v1256_v30, %v915_v29 }
  0x22   :  { %782 = vmatpush.bf16.msrb.mxu0 %v1306_v40  ;;  %733 = vmatmul.bf16.vlgmr.msra.gmra.mxu1 %v896_v43  ;;  %v920_v36 = vor.u32 %v1252_v31, %v917_v32  ;;  %v943_v40 = vld [vmem:[%s1708_s0 + $0x58] sm:$0xf]  ;;  %v1260_v42 = vld [vmem:[%s1708_s0 + $0x5c] sm:$0xf]  ;;  %v945_v43 = vld [vmem:[%s1708_s0 + $0x7c] sm:$0xf0] }
  0x23   :  { %801 = vmatpush.bf16.msrb.mxu1 %v1314_v41  ;;  %752 = vmatmul.bf16.vlgmr.msra.gmra.mxu2 %v900_v44  ;;  %v1264_v41 = vld [vmem:[%s1708_s0 + $0x78] sm:$0xf0]  ;;  %v951_v44 = vld [vmem:[%s1708_s0 + $0x60] sm:$0xf] }
  0x24   :  { %771 = vmatmul.bf16.vlgmr.msra.gmra.mxu3 %v904_v45  ;;  %820 = vmatpush.bf16.msrb.mxu2 %v1322_v46  ;;  %v1265_v45 = vld [vmem:[%s1708_s0 + $0x80] sm:$0xf0] }
  0x25   :  { %839 = vmatpush.bf16.msrb.mxu3 %v1330_v47  ;;  %v1261_v46 = vld [vmem:[%s1708_s0 + $0x64] sm:$0xf]  ;;  %v953_v47 = vld [vmem:[%s1708_s0 + $0x84] sm:$0xf0] }
  0x26   :  { %783 = vmatpush.bf16.msrb.mxu0 %v1305_v48  ;;  %v1334_v48 = vld [vmem:[%s1707_s1 + $0x218] sm:$0xff] }
  0x27   :  { %802 = vmatpush.bf16.msrb.mxu1 %v1313_v49  ;;  %v944_v49 = vor.u32 %v1264_v41, %v943_v40 }
  0x28   :  { %821 = vmatpush.bf16.msrb.mxu2 %v1321_v50  ;;  %v948_v50 = vor.u32 %v1260_v42, %v945_v43 }
  0x29   :  { %840 = vmatpush.bf16.msrb.mxu3 %v1329_v51  ;;  %v952_v51 = vor.u32 %v1265_v45, %v951_v44 }
  0x2a   :  { %784 = vmatpush.bf16.msrb.mxu0 %v1304_v52  ;;  %v956_v52 = vor.u32 %v1261_v46, %v953_v47 }
  0x2b   :  { %803 = vmatpush.bf16.msrb.mxu1 %v1312_v53  ;;  %v1333_v53 = vld [vmem:[%s1707_s1 + $0x210] sm:$0xff] }
  0x2c   :  { %822 = vmatpush.bf16.msrb.mxu2 %v1320_v54  ;;  %v1332_v54 = vld [vmem:[%s1707_s1 + $0x208] sm:$0xff] }
  0x2d   :  { %841 = vmatpush.bf16.msrb.mxu3 %v1328_v55  ;;  %v1331_v55 = vld [vmem:[%s1707_s1 + $0x200] sm:$0xff] }
  0x2e   :  { %785 = vmatpush.bf16.msrb.mxu0 %v1303_v56  ;;  %v923_v56 = vld [vmem:[%s1708_s0 + $0x20] sm:$0xf] }
  0x2f   :  { %804 = vmatpush.bf16.msrb.mxu1 %v1311_v57  ;;  %v1257_v57 = vld [vmem:[%s1708_s0 + $0x40] sm:$0xf0] }
  0x30   :  { %823 = vmatpush.bf16.msrb.mxu2 %v1319_v58  ;;  %v959_v58 = vld [vmem:[%s1708_s0 + $0x68] sm:$0xf]  ;;  %v924_v60 = vor.u32 %v1257_v57, %v923_v56 }
  0x31   :  { %842 = vmatpush.bf16.msrb.mxu3 %v1327_v59  ;;  %719 = vmatmul.bf16.gmra.mxu0 %v928_v6  ;;  %v1266_v59 = vld [vmem:[%s1708_s0 + $0x88] sm:$0xf0] }
  0x32   :  { %786 = vmatpush.bf16.msrb.mxu0 %v1302_v4  ;;  %738 = vmatmul.bf16.gmra.mxu1 %v932_v7  ;;  %v960_v61 = vor.u32 %v1266_v59, %v959_v58 }
  0x33   :  { %805 = vmatpush.bf16.msrb.mxu1 %v1310_v5  ;;  %757 = vmatmul.bf16.gmra.mxu2 %v936_v8 }
  0x34   :  { %776 = vmatmul.bf16.gmra.mxu3 %v940_v9  ;;  %824 = vmatpush.bf16.msrb.mxu2 %v1318_v10 }
  0x35   :  { %843 = vmatpush.bf16.msrb.mxu3 %v1326_v11 }
  0x36   :  { %787 = vmatpush.bf16.msrb.mxu0 %v1301_v12 }
  0x37   :  { %806 = vmatpush.bf16.msrb.mxu1 %v1309_v13 }
  0x38   :  { %825 = vmatpush.bf16.msrb.mxu2 %v1317_v14 }
  0x39   :  { %844 = vmatpush.bf16.msrb.mxu3 %v1325_v15 }
  0x3a   :  { %788 = vmatpush.bf16.msrb.mxu0 %v1300_v16  ;;  %v1347_v16 = vld [vmem:[%s1709_s2] ss:$0 sm:$0xff] }
  0x3b   :  { %807 = vmatpush.bf16.msrb.mxu1 %v1308_v17 }
  0x3c   :  { %826 = vmatpush.bf16.msrb.mxu2 %v1316_v18 }
  0x3d   :  { %845 = vmatpush.bf16.msrb.mxu3 %v1324_v19 }
  0x3e   :  { %789 = vmatpush.bf16.msrb.mxu0 %v1299_v20 }
  0x3f   :  { %808 = vmatpush.bf16.msrb.mxu1 %v1307_v21 }
  0x40   :  { %827 = vmatpush.bf16.msrb.mxu2 %v1315_v22 }
  0x41   :  { %846 = vmatpush.bf16.msrb.mxu3 %v1323_v23  ;;  %790 = vmatmul.bf16.vlgmr.msrb.gmra.mxu0 %v908_v33 }
  0x42   :  { %858 = vmatpush.bf16.msra.mxu0 %v1338_v26  ;;  %809 = vmatmul.bf16.vlgmr.msrb.gmra.mxu1 %v912_v34 }
  0x43   :  { %1339 = vmatpush.bf16.msra.mxu1 %v1338_v26  ;;  %828 = vmatmul.bf16.vlgmr.msrb.gmra.mxu2 %v916_v35 }
  0x44   :  { %847 = vmatmul.bf16.vlgmr.msrb.gmra.mxu3 %v920_v36 }
  0x46   :  { %859 = vmatpush.bf16.msra.mxu0 %v1337_v37 }
  0x47   :  { %1340 = vmatpush.bf16.msra.mxu1 %v1337_v37 }
  0x4a   :  { %860 = vmatpush.bf16.msra.mxu0 %v1336_v38 }
  0x4b   :  { %1341 = vmatpush.bf16.msra.mxu1 %v1336_v38 }
  0x4e   :  { %861 = vmatpush.bf16.msra.mxu0 %v1335_v39 }
  0x4f   :  { %1342 = vmatpush.bf16.msra.mxu1 %v1335_v39 }
  0x51   :  { %795 = vmatmul.bf16.gmra.mxu0 %v944_v49 }
  0x52   :  { %862 = vmatpush.bf16.msra.mxu0 %v1334_v48  ;;  %814 = vmatmul.bf16.gmra.mxu1 %v948_v50 }
  0x53   :  { %1343 = vmatpush.bf16.msra.mxu1 %v1334_v48  ;;  %833 = vmatmul.bf16.gmra.mxu2 %v952_v51 }
  0x54   :  { %852 = vmatmul.bf16.gmra.mxu3 %v956_v52 }
  0x56   :  { %863 = vmatpush.bf16.msra.mxu0 %v1333_v53 }
  0x57   :  { %1344 = vmatpush.bf16.msra.mxu1 %v1333_v53 }
  0x5a   :  { %864 = vmatpush.bf16.msra.mxu0 %v1332_v54 }
  0x5b   :  { %1345 = vmatpush.bf16.msra.mxu1 %v1332_v54 }
  0x5e   :  { %865 = vmatpush.bf16.msra.mxu0 %v1331_v55 }
  0x5f   :  { %1346 = vmatpush.bf16.msra.mxu1 %v1331_v55 }
  0x61   :  { %866 = vmatmul.bf16.vlgmr.msra.gmra.mxu0 %v924_v60 }
  0x62   :  { %871 = vmatmul.bf16.vlgmr.msra.gmra.mxu1 %v960_v61 }
  0x9e   :  { %v715_v62 = vpop.f32.mrf.mxu0 }
  0x9f   :  { %v734_v63 = vpop.f32.mrf.mxu1  ;;  %v716_v21 = vadd.f32 %v1347_v16, %v715_v62 }
  0xa1   :  { %v735_v23 = vadd.f32 %v734_v63, %v716_v21 }
  0xa6   :  { %v753_v0 = vpop.f32.mrf.mxu2  ;;  %v717_v2 = vpop.f32.mrf.mxu0 }
  0xa7   :  { %v772_v1 = vpop.f32.mrf.mxu3  ;;  %v736_v3 = vpop.f32.mrf.mxu1  ;;  %v754_v25 = vadd.f32 %v753_v0, %v735_v23  ;;  %v718_v30 = vadd.f32 %v1347_v16, %v717_v2 }
  0xa9   :  { %v773_v33 = vadd.f32 %v772_v1, %v754_v25  ;;  %v737_v35 = vadd.f32 %v736_v3, %v718_v30 }
  0xae   :  { %v755_v4 = vpop.f32.mrf.mxu2  ;;  %v720_v6 = vpop.f32.mrf.mxu0 }
  0xaf   :  { %v774_v5 = vpop.f32.mrf.mxu3  ;;  %v739_v7 = vpop.f32.mrf.mxu1  ;;  %v721_v22 = vadd.f32 %v1347_v16, %v720_v6  ;;  %v756_v39 = vadd.f32 %v755_v4, %v737_v35 }
  0xb1   :  { %v740_v24 = vadd.f32 %v739_v7, %v721_v22  ;;  %v775_v46 = vadd.f32 %v774_v5, %v756_v39 }
  0xb6   :  { %v758_v8 = vpop.f32.mrf.mxu2  ;;  %v722_v10 = vpop.f32.mrf.mxu0 }
  0xb7   :  { %v777_v9 = vpop.f32.mrf.mxu3  ;;  %v741_v11 = vpop.f32.mrf.mxu1  ;;  %v759_v26 = vadd.f32 %v758_v8, %v740_v24  ;;  %v723_v31 = vadd.f32 %v1347_v16, %v722_v10 }
  0xb9   :  { %v778_v34 = vadd.f32 %v777_v9, %v759_v26  ;;  %v742_v36 = vadd.f32 %v741_v11, %v723_v31 }
  0xbe   :  { %v760_v12 = vpop.f32.mrf.mxu2  ;;  %v791_v14 = vpop.f32.mrf.mxu0 }
  0xbf   :  { %v779_v13 = vpop.f32.mrf.mxu3  ;;  %v810_v15 = vpop.f32.mrf.mxu1  ;;  %v792_v37 = vadd.f32 %v791_v14, %v773_v33  ;;  %v761_v40 = vadd.f32 %v760_v12, %v742_v36 }
  0xc1   :  { %v811_v44 = vadd.f32 %v810_v15, %v792_v37  ;;  %v780_v47 = vadd.f32 %v779_v13, %v761_v40 }
  0xc6   :  { %v829_v17 = vpop.f32.mrf.mxu2  ;;  %v793_v19 = vpop.f32.mrf.mxu0 }
  0xc7   :  { %v848_v18 = vpop.f32.mrf.mxu3  ;;  %v812_v20 = vpop.f32.mrf.mxu1  ;;  %v830_v48 = vadd.f32 %v829_v17, %v811_v44  ;;  %v794_v51 = vadd.f32 %v793_v19, %v775_v46 }
  0xc9   :  { %v849_v53 = vadd.f32 %v848_v18, %v830_v48  ;;  %v813_v58 = vadd.f32 %v812_v20, %v794_v51 }
  0xce   :  { %v831_v27 = vpop.f32.mrf.mxu2  ;;  %v796_v28 = vpop.f32.mrf.mxu0 }
  0xcf   :  { %v815_v29 = vpop.f32.mrf.mxu1  ;;  %v850_v32 = vpop.f32.mrf.mxu3  ;;  %v797_v38 = vadd.f32 %v796_v28, %v778_v34  ;;  %v832_v62 = vadd.f32 %v831_v27, %v813_v58 }
  0xd1   :  { %v816_v45 = vadd.f32 %v815_v29, %v797_v38  ;;  %v851_v3 = vadd.f32 %v850_v32, %v832_v62 }
  0xd6   :  { %v834_v41 = vpop.f32.mrf.mxu2  ;;  %v798_v42 = vpop.f32.mrf.mxu0 }
  0xd7   :  { %v817_v43 = vpop.f32.mrf.mxu1  ;;  %v835_v49 = vadd.f32 %v834_v41, %v816_v45  ;;  %v853_v50 = vpop.f32.mrf.mxu3  ;;  %v799_v52 = vadd.f32 %v798_v42, %v780_v47 }
  0xd9   :  { %v854_v54 = vadd.f32 %v853_v50, %v835_v49  ;;  %v818_v59 = vadd.f32 %v817_v43, %v799_v52 }
  0xde   :  { %v836_v55 = vpop.f32.mrf.mxu2  ;;  %v867_v56 = vpop.f32.mrf.mxu0 }
  0xdf   :  { %v872_v57 = vpop.f32.mrf.mxu1  ;;  %v868_v60 = vadd.f32 %v867_v56, %v849_v53  ;;  %v837_v63 = vadd.f32 %v836_v55, %v818_v59  ;;  %v855_v2 = vpop.f32.mrf.mxu3 }
  0xe0   :  { %v873_v61 = vadd.f32 %v872_v57, %v854_v54 }
  0xe1   :  { %v877_v0 = vmax.f32 %v868_v60, 0.0  ;;  %v856_v4 = vadd.f32 %v855_v2, %v837_v63 }
  0xe2   :  { %v879_v1 = vmax.f32 %v873_v61, 0.0 }
  0xe3   :  { %881 = vst [vmem:[%s1710_s3] sm:$0xff] %v877_v0 }
  0xe4   :  { %883 = vst [vmem:[%s1710_s3 + $0x10] sm:$0xff] %v879_v1 }
  0xe6   :  { %v869_v5 = vpop.f32.mrf.mxu0 }
  0xe7   :  { %v874_v6 = vpop.f32.mrf.mxu1  ;;  %v870_v7 = vadd.f32 %v869_v5, %v851_v3 }
  0xe8   :  { %v875_v8 = vadd.f32 %v874_v6, %v856_v4 }
  0xe9   :  { %v878_v9 = vmax.f32 %v870_v7, 0.0 }
  0xea   :  { %v880_v10 = vmax.f32 %v875_v8, 0.0 }
  0xeb   :  { %882 = vst [vmem:[%s1710_s3 + $0x8] sm:$0xff] %v878_v9 }
  0xec   :  { %884 = vst [vmem:[%s1710_s3 + $0x18] sm:$0xff] %v880_v10 }

// kernel: autoencoder_forward.10
= control target key start
LH: loop header
LB: loop body
LE: loop exit
PB: predicated region body
PF: predicated region fallthrough
CT: control target
= control target key end

     0   :  { %s1785_s1 = inlined_call_operand.vmem [shape: bf16[640,128], index: 1, kind: input, shape index: {}]   ;;  %s1786_s2 = inlined_call_operand.vmem [shape: f32[1,128], index: 2, kind: input, shape index: {}]   ;;  %s1787_s0 = inlined_call_operand.vmem [shape: bf16[128,640], index: 0, kind: input, shape index: {}]   ;;  %s1788_s3 = inlined_call_operand.vmem [shape: f32[128,128], index: 3, kind: output, shape index: {}]  }
   0x1   :  { %v1242_v0 = vld [vmem:[%s1785_s1 + $0x38] sm:$0xff]  ;;  %v1241_v1 = vld [vmem:[%s1785_s1 + $0x30] sm:$0xff]  ;;  %v1240_v2 = vld [vmem:[%s1785_s1 + $0x28] sm:$0xff] }
   0x2   :  { %1275 = vmatpush.bf16.msra.mxu1 %v1242_v0  ;;  %1276 = vmatpush.bf16.msra.mxu2 %v1242_v0  ;;  %v1239_v3 = vld [vmem:[%s1785_s1 + $0x20] sm:$0xff]  ;;  %v1238_v4 = vld [vmem:[%s1785_s1 + $0x18] sm:$0xff]  ;;  %v1237_v5 = vld [vmem:[%s1785_s1 + $0x10] sm:$0xff] }
   0x3   :  { %1277 = vmatpush.bf16.msra.mxu3 %v1242_v0  ;;  %594 = vmatpush.bf16.msra.mxu0 %v1242_v0  ;;  %v1236_v6 = vld [vmem:[%s1785_s1 + $0x8] sm:$0xff]  ;;  %v1235_v7 = vld [vmem:[%s1785_s1] sm:$0xff]  ;;  %v917_v8 = vld [vmem:[%s1787_s0 + $0x50] sm:$0xf] }
   0x4   :  { %v1207_v9 = vld [vmem:[%s1787_s0 + $0x60] sm:$0xf0]  ;;  %v957_v10 = vld [vmem:[%s1787_s0 + $0xa0] sm:$0xf]  ;;  %v1217_v11 = vld [vmem:[%s1787_s0 + $0xb0] sm:$0xf0] }
   0x5   :  { %v997_v12 = vld [vmem:[%s1787_s0 + $0xf0] sm:$0xf]  ;;  %v1227_v13 = vld [vmem:[%s1787_s0 + $0x100] sm:$0xf0]  ;;  %v877_v14 = vld [vmem:[%s1787_s0] sm:$0xf]  ;;  %v918_v18 = vor.u32 %v1207_v9, %v917_v8  ;;  %v958_v19 = vor.u32 %v1217_v11, %v957_v10 }
   0x6   :  { %1278 = vmatpush.bf16.msra.mxu1 %v1241_v1  ;;  %1279 = vmatpush.bf16.msra.mxu2 %v1241_v1  ;;  %v1197_v15 = vld [vmem:[%s1787_s0 + $0x10] sm:$0xf0]  ;;  %v1258_v16 = vld [vmem:[%s1785_s1 + $0xb8] sm:$0xff]  ;;  %v998_v20 = vor.u32 %v1227_v13, %v997_v12  ;;  %v1256_v28 = vld [vmem:[%s1785_s1 + $0xa8] sm:$0xff] }
   0x7   :  { %1280 = vmatpush.bf16.msra.mxu3 %v1241_v1  ;;  %595 = vmatpush.bf16.msra.mxu0 %v1241_v1  ;;  %v1250_v17 = vld [vmem:[%s1785_s1 + $0x78] sm:$0xff]  ;;  %v878_v21 = vor.u32 %v1197_v15, %v877_v14  ;;  %v1257_v24 = vld [vmem:[%s1785_s1 + $0xb0] sm:$0xff]  ;;  %v1248_v29 = vld [vmem:[%s1785_s1 + $0x68] sm:$0xff] }
   0x8   :  { %v1266_v22 = vld [vmem:[%s1785_s1 + $0xf8] sm:$0xff]  ;;  %v1249_v25 = vld [vmem:[%s1785_s1 + $0x70] sm:$0xff]  ;;  %v1264_v30 = vld [vmem:[%s1785_s1 + $0xe8] sm:$0xff] }
   0x9   :  { %v1274_v23 = vld [vmem:[%s1785_s1 + $0x138] sm:$0xff]  ;;  %v1265_v26 = vld [vmem:[%s1785_s1 + $0xf0] sm:$0xff]  ;;  %v1272_v31 = vld [vmem:[%s1785_s1 + $0x128] sm:$0xff] }
   0xa   :  { %1281 = vmatpush.bf16.msra.mxu1 %v1240_v2  ;;  %1282 = vmatpush.bf16.msra.mxu2 %v1240_v2  ;;  %v1273_v27 = vld [vmem:[%s1785_s1 + $0x130] sm:$0xff]  ;;  %v1255_v32 = vld [vmem:[%s1785_s1 + $0xa0] sm:$0xff]  ;;  %v937_v36 = vld [vmem:[%s1787_s0 + $0x78] sm:$0xf] }
   0xb   :  { %1283 = vmatpush.bf16.msra.mxu3 %v1240_v2  ;;  %596 = vmatpush.bf16.msra.mxu0 %v1240_v2  ;;  %v1247_v33 = vld [vmem:[%s1785_s1 + $0x60] sm:$0xff]  ;;  %v1212_v37 = vld [vmem:[%s1787_s0 + $0x88] sm:$0xf0]  ;;  %v977_v38 = vld [vmem:[%s1787_s0 + $0xc8] sm:$0xf] }
   0xc   :  { %v1263_v34 = vld [vmem:[%s1785_s1 + $0xe0] sm:$0xff]  ;;  %v1222_v39 = vld [vmem:[%s1787_s0 + $0xd8] sm:$0xf0]  ;;  %v1017_v40 = vld [vmem:[%s1787_s0 + $0x118] sm:$0xf]  ;;  %v938_v46 = vor.u32 %v1212_v37, %v937_v36 }
   0xd   :  { %v1271_v35 = vld [vmem:[%s1785_s1 + $0x120] sm:$0xff]  ;;  %v1232_v41 = vld [vmem:[%s1787_s0 + $0x128] sm:$0xf0]  ;;  %v897_v42 = vld [vmem:[%s1787_s0 + $0x28] sm:$0xf]  ;;  %v978_v47 = vor.u32 %v1222_v39, %v977_v38 }
   0xe   :  { %1284 = vmatpush.bf16.msra.mxu1 %v1239_v3  ;;  %1285 = vmatpush.bf16.msra.mxu2 %v1239_v3  ;;  %v1202_v43 = vld [vmem:[%s1787_s0 + $0x38] sm:$0xf0]  ;;  %v1018_v48 = vor.u32 %v1232_v41, %v1017_v40  ;;  %v1253_v52 = vld [vmem:[%s1785_s1 + $0x90] sm:$0xff]  ;;  %v1252_v56 = vld [vmem:[%s1785_s1 + $0x88] sm:$0xff] }
   0xf   :  { %1286 = vmatpush.bf16.msra.mxu3 %v1239_v3  ;;  %597 = vmatpush.bf16.msra.mxu0 %v1239_v3  ;;  %v1254_v44 = vld [vmem:[%s1785_s1 + $0x98] sm:$0xff]  ;;  %v898_v49 = vor.u32 %v1202_v43, %v897_v42  ;;  %v1245_v53 = vld [vmem:[%s1785_s1 + $0x50] sm:$0xff]  ;;  %v1244_v57 = vld [vmem:[%s1785_s1 + $0x48] sm:$0xff] }
  0x10   :  { %v1246_v45 = vld [vmem:[%s1785_s1 + $0x58] sm:$0xff]  ;;  %v1261_v54 = vld [vmem:[%s1785_s1 + $0xd0] sm:$0xff]  ;;  %v1260_v58 = vld [vmem:[%s1785_s1 + $0xc8] sm:$0xff] }
  0x11   :  { %v1262_v50 = vld [vmem:[%s1785_s1 + $0xd8] sm:$0xff]  ;;  %v1269_v55 = vld [vmem:[%s1785_s1 + $0x110] sm:$0xff]  ;;  %v1268_v59 = vld [vmem:[%s1785_s1 + $0x108] sm:$0xff] }
  0x12   :  { %1287 = vmatpush.bf16.msra.mxu1 %v1238_v4  ;;  %1288 = vmatpush.bf16.msra.mxu2 %v1238_v4  ;;  %v1270_v51 = vld [vmem:[%s1785_s1 + $0x118] sm:$0xff]  ;;  %v1251_v60 = vld [vmem:[%s1785_s1 + $0x80] sm:$0xff]  ;;  %v885_v2 = vld [vmem:[%s1787_s0 + $0x8] sm:$0xf] }
  0x13   :  { %1289 = vmatpush.bf16.msra.mxu3 %v1238_v4  ;;  %598 = vmatpush.bf16.msra.mxu0 %v1238_v4  ;;  %v1243_v61 = vld [vmem:[%s1785_s1 + $0x40] sm:$0xff]  ;;  %v879_v1 = vld [vmem:[%s1787_s0 + $0x14] sm:$0xf0]  ;;  %v1198_v3 = vld [vmem:[%s1787_s0 + $0x18] sm:$0xf0] }
  0x14   :  { %v1259_v62 = vld [vmem:[%s1785_s1 + $0xc0] sm:$0xff]  ;;  %v1196_v4 = vld [vmem:[%s1787_s0 + $0xc] sm:$0xf]  ;;  %v886_v9 = vor.u32 %v1198_v3, %v885_v2  ;;  %v905_v14 = vld [vmem:[%s1787_s0 + $0x30] sm:$0xf] }
  0x15   :  { %v1267_v63 = vld [vmem:[%s1785_s1 + $0x100] sm:$0xff]  ;;  %v1200_v12 = vld [vmem:[%s1787_s0 + $0x2c] sm:$0xf]  ;;  %v1210_v36 = vld [vmem:[%s1787_s0 + $0x7c] sm:$0xf] }
  0x16   :  { %1290 = vmatpush.bf16.msra.mxu1 %v1237_v5  ;;  %1291 = vmatpush.bf16.msra.mxu2 %v1237_v5  ;;  %v1195_v0 = vld [vmem:[%s1787_s0 + $0x4] sm:$0xf]  ;;  %v899_v13 = vld [vmem:[%s1787_s0 + $0x3c] sm:$0xf0]  ;;  %v939_v37 = vld [vmem:[%s1787_s0 + $0x8c] sm:$0xf0] }
  0x17   :  { %1292 = vmatpush.bf16.msra.mxu3 %v1237_v5  ;;  %599 = vmatpush.bf16.msra.mxu0 %v1237_v5  ;;  %v887_v5 = vld [vmem:[%s1787_s0 + $0x1c] sm:$0xf0]  ;;  %v882_v8 = vor.u32 %v1195_v0, %v879_v1  ;;  %v1203_v15 = vld [vmem:[%s1787_s0 + $0x40] sm:$0xf0]  ;;  %v1213_v39 = vld [vmem:[%s1787_s0 + $0x90] sm:$0xf0] }
  0x18   :  { %v890_v10 = vor.u32 %v1196_v4, %v887_v5  ;;  %v945_v38 = vld [vmem:[%s1787_s0 + $0x80] sm:$0xf]  ;;  %v1211_v40 = vld [vmem:[%s1787_s0 + $0x84] sm:$0xf]  ;;  %v947_v41 = vld [vmem:[%s1787_s0 + $0x94] sm:$0xf0] }
  0x19   :  { %v953_v42 = vld [vmem:[%s1787_s0 + $0x88] sm:$0xf]  ;;  %v1214_v43 = vld [vmem:[%s1787_s0 + $0x98] sm:$0xf0]  ;;  %v1221_v0 = vld [vmem:[%s1787_s0 + $0xd4] sm:$0xf] }
  0x1a   :  { %1293 = vmatpush.bf16.msra.mxu1 %v1236_v6  ;;  %1294 = vmatpush.bf16.msra.mxu2 %v1236_v6  ;;  %v987_v1 = vld [vmem:[%s1787_s0 + $0xe4] sm:$0xf0]  ;;  %v993_v2 = vld [vmem:[%s1787_s0 + $0xd8] sm:$0xf]  ;;  %v1224_v3 = vld [vmem:[%s1787_s0 + $0xe8] sm:$0xf0] }
  0x1b   :  { %1295 = vmatpush.bf16.msra.mxu3 %v1236_v6  ;;  %600 = vmatpush.bf16.msra.mxu0 %v1236_v6  ;;  %v893_v6 = vld [vmem:[%s1787_s0 + $0x10] sm:$0xf] }
  0x1e   :  { %1296 = vmatpush.bf16.msra.mxu1 %v1235_v7  ;;  %1297 = vmatpush.bf16.msra.mxu2 %v1235_v7 }
  0x1f   :  { %1298 = vmatpush.bf16.msra.mxu3 %v1235_v7  ;;  %601 = vmatpush.bf16.msra.mxu0 %v1235_v7  ;;  %v1199_v7 = vld [vmem:[%s1787_s0 + $0x20] sm:$0xf0] }
  0x20   :  { %v894_v11 = vor.u32 %v1199_v7, %v893_v6  ;;  %v990_v6 = vor.u32 %v1221_v0, %v987_v1  ;;  %v994_v7 = vor.u32 %v1224_v3, %v993_v2 }
  0x21   :  { %612 = vmatmul.bf16.vlgmr.msra.gmra.mxu1 %v918_v18  ;;  %622 = vmatmul.bf16.vlgmr.msra.gmra.mxu2 %v958_v19  ;;  %v913_v18 = vld [vmem:[%s1787_s0 + $0x38] sm:$0xf]  ;;  %v1204_v19 = vld [vmem:[%s1787_s0 + $0x48] sm:$0xf0] }
  0x22   :  { %692 = vmatpush.bf16.msrb.mxu2 %v1258_v16  ;;  %643 = vmatpush.bf16.msrb.mxu1 %v1250_v17  ;;  %v1201_v16 = vld [vmem:[%s1787_s0 + $0x34] sm:$0xf]  ;;  %v907_v17 = vld [vmem:[%s1787_s0 + $0x44] sm:$0xf0] }
  0x23   :  { %632 = vmatmul.bf16.vlgmr.msra.gmra.mxu3 %v998_v20  ;;  %602 = vmatmul.bf16.vlgmr.msra.gmra.mxu0 %v878_v21  ;;  %v902_v20 = vor.u32 %v1200_v12, %v899_v13  ;;  %v906_v21 = vor.u32 %v1203_v15, %v905_v14  ;;  %v1226_v12 = vld [vmem:[%s1787_s0 + $0xfc] sm:$0xf]  ;;  %v1007_v13 = vld [vmem:[%s1787_s0 + $0x10c] sm:$0xf0]  ;;  %v1013_v14 = vld [vmem:[%s1787_s0 + $0x100] sm:$0xf] }
  0x24   :  { %741 = vmatpush.bf16.msrb.mxu3 %v1266_v22  ;;  %790 = vmatpush.bf16.msrb.mxu0 %v1274_v23  ;;  %v910_v22 = vor.u32 %v1201_v16, %v907_v17  ;;  %v914_v23 = vor.u32 %v1204_v19, %v913_v18  ;;  %v1229_v15 = vld [vmem:[%s1787_s0 + $0x110] sm:$0xf0]  ;;  %v1010_v19 = vor.u32 %v1226_v12, %v1007_v13 }
  0x26   :  { %693 = vmatpush.bf16.msrb.mxu2 %v1257_v24  ;;  %644 = vmatpush.bf16.msrb.mxu1 %v1249_v25  ;;  %v1205_v24 = vld [vmem:[%s1787_s0 + $0x54] sm:$0xf]  ;;  %v919_v25 = vld [vmem:[%s1787_s0 + $0x64] sm:$0xf0] }
  0x28   :  { %742 = vmatpush.bf16.msrb.mxu3 %v1265_v26  ;;  %791 = vmatpush.bf16.msrb.mxu0 %v1273_v27  ;;  %v925_v26 = vld [vmem:[%s1787_s0 + $0x58] sm:$0xf]  ;;  %v1208_v27 = vld [vmem:[%s1787_s0 + $0x68] sm:$0xf0] }
  0x2a   :  { %694 = vmatpush.bf16.msrb.mxu2 %v1256_v28  ;;  %645 = vmatpush.bf16.msrb.mxu1 %v1248_v29  ;;  %v1206_v28 = vld [vmem:[%s1787_s0 + $0x5c] sm:$0xf]  ;;  %v927_v29 = vld [vmem:[%s1787_s0 + $0x6c] sm:$0xf0] }
  0x2c   :  { %743 = vmatpush.bf16.msrb.mxu3 %v1264_v30  ;;  %792 = vmatpush.bf16.msrb.mxu0 %v1272_v31  ;;  %v933_v30 = vld [vmem:[%s1787_s0 + $0x60] sm:$0xf]  ;;  %v1209_v31 = vld [vmem:[%s1787_s0 + $0x70] sm:$0xf0] }
  0x2e   :  { %695 = vmatpush.bf16.msrb.mxu2 %v1255_v32  ;;  %646 = vmatpush.bf16.msrb.mxu1 %v1247_v33  ;;  %v922_v32 = vor.u32 %v1205_v24, %v919_v25  ;;  %v926_v33 = vor.u32 %v1208_v27, %v925_v26 }
  0x30   :  { %744 = vmatpush.bf16.msrb.mxu3 %v1263_v34  ;;  %793 = vmatpush.bf16.msrb.mxu0 %v1271_v35  ;;  %v930_v34 = vor.u32 %v1206_v28, %v927_v29  ;;  %v934_v35 = vor.u32 %v1209_v31, %v933_v30  ;;  %v1230_v29 = vld [vmem:[%s1787_s0 + $0x11c] sm:$0xf]  ;;  %v1019_v30 = vld [vmem:[%s1787_s0 + $0x12c] sm:$0xf0]  ;;  %v1025_v31 = vld [vmem:[%s1787_s0 + $0x120] sm:$0xf] }
  0x31   :  { %617 = vmatmul.bf16.gmra.mxu1 %v938_v46  ;;  %627 = vmatmul.bf16.gmra.mxu2 %v978_v47  ;;  %v950_v46 = vor.u32 %v1211_v40, %v947_v41  ;;  %v954_v47 = vor.u32 %v1214_v43, %v953_v42  ;;  %v1022_v40 = vor.u32 %v1230_v29, %v1019_v30 }
  0x32   :  { %696 = vmatpush.bf16.msrb.mxu2 %v1254_v44  ;;  %647 = vmatpush.bf16.msrb.mxu1 %v1246_v45  ;;  %v942_v44 = vor.u32 %v1210_v36, %v939_v37  ;;  %v946_v45 = vor.u32 %v1213_v39, %v945_v38  ;;  %v1234_v36 = vld [vmem:[%s1787_s0 + $0x138] sm:$0xf0] }
  0x33   :  { %637 = vmatmul.bf16.gmra.mxu3 %v1018_v48  ;;  %607 = vmatmul.bf16.gmra.mxu0 %v898_v49  ;;  %v1215_v48 = vld [vmem:[%s1787_s0 + $0xa4] sm:$0xf]  ;;  %v959_v49 = vld [vmem:[%s1787_s0 + $0xb4] sm:$0xf0] }
  0x34   :  { %745 = vmatpush.bf16.msrb.mxu3 %v1262_v50  ;;  %794 = vmatpush.bf16.msrb.mxu0 %v1270_v51  ;;  %v965_v50 = vld [vmem:[%s1787_s0 + $0xa8] sm:$0xf]  ;;  %v1218_v51 = vld [vmem:[%s1787_s0 + $0xb8] sm:$0xf0] }
  0x36   :  { %697 = vmatpush.bf16.msrb.mxu2 %v1253_v52  ;;  %648 = vmatpush.bf16.msrb.mxu1 %v1245_v53  ;;  %v1216_v52 = vld [vmem:[%s1787_s0 + $0xac] sm:$0xf]  ;;  %v967_v53 = vld [vmem:[%s1787_s0 + $0xbc] sm:$0xf0] }
  0x38   :  { %746 = vmatpush.bf16.msrb.mxu3 %v1261_v54  ;;  %795 = vmatpush.bf16.msrb.mxu0 %v1269_v55  ;;  %v973_v54 = vld [vmem:[%s1787_s0 + $0xb0] sm:$0xf]  ;;  %v1219_v55 = vld [vmem:[%s1787_s0 + $0xc0] sm:$0xf0] }
  0x3a   :  { %698 = vmatpush.bf16.msrb.mxu2 %v1252_v56  ;;  %649 = vmatpush.bf16.msrb.mxu1 %v1244_v57  ;;  %v962_v56 = vor.u32 %v1215_v48, %v959_v49  ;;  %v966_v57 = vor.u32 %v1218_v51, %v965_v50 }
  0x3c   :  { %747 = vmatpush.bf16.msrb.mxu3 %v1260_v58  ;;  %796 = vmatpush.bf16.msrb.mxu0 %v1268_v59  ;;  %v970_v58 = vor.u32 %v1216_v52, %v967_v53  ;;  %v974_v59 = vor.u32 %v1219_v55, %v973_v54 }
  0x3e   :  { %699 = vmatpush.bf16.msrb.mxu2 %v1251_v60  ;;  %650 = vmatpush.bf16.msrb.mxu1 %v1243_v61  ;;  %v1220_v60 = vld [vmem:[%s1787_s0 + $0xcc] sm:$0xf]  ;;  %v979_v61 = vld [vmem:[%s1787_s0 + $0xdc] sm:$0xf0] }
  0x3f   :  { %v982_v4 = vor.u32 %v1220_v60, %v979_v61 }
  0x40   :  { %748 = vmatpush.bf16.msrb.mxu3 %v1259_v62  ;;  %797 = vmatpush.bf16.msrb.mxu0 %v1267_v63  ;;  %v985_v62 = vld [vmem:[%s1787_s0 + $0xd0] sm:$0xf]  ;;  %v1223_v63 = vld [vmem:[%s1787_s0 + $0xe0] sm:$0xf0] }
  0x41   :  { %651 = vmatmul.bf16.vlgmr.msrb.gmra.mxu1 %v882_v8  ;;  %700 = vmatmul.bf16.vlgmr.msrb.gmra.mxu2 %v886_v9  ;;  %v986_v5 = vor.u32 %v1223_v63, %v985_v62  ;;  %v1225_v8 = vld [vmem:[%s1787_s0 + $0xf4] sm:$0xf]  ;;  %v999_v9 = vld [vmem:[%s1787_s0 + $0x104] sm:$0xf0] }
  0x42   :  { %v1002_v16 = vor.u32 %v1225_v8, %v999_v9 }
  0x43   :  { %749 = vmatmul.bf16.vlgmr.msrb.gmra.mxu3 %v890_v10  ;;  %798 = vmatmul.bf16.vlgmr.msrb.gmra.mxu0 %v894_v11  ;;  %v1005_v10 = vld [vmem:[%s1787_s0 + $0xf8] sm:$0xf]  ;;  %v1228_v11 = vld [vmem:[%s1787_s0 + $0x108] sm:$0xf0] }
  0x44   :  { %v1006_v17 = vor.u32 %v1228_v11, %v1005_v10 }
  0x51   :  { %656 = vmatmul.bf16.gmra.mxu1 %v902_v20  ;;  %705 = vmatmul.bf16.gmra.mxu2 %v906_v21  ;;  %v1014_v20 = vor.u32 %v1229_v15, %v1013_v14 }
  0x53   :  { %754 = vmatmul.bf16.gmra.mxu3 %v910_v22  ;;  %803 = vmatmul.bf16.gmra.mxu0 %v914_v23  ;;  %v1661_v22 = vld [vmem:[%s1786_s2] ss:$0 sm:$0xff] }
  0x61   :  { %661 = vmatmul.bf16.gmra.mxu1 %v922_v32  ;;  %710 = vmatmul.bf16.gmra.mxu2 %v926_v33  ;;  %v1233_v32 = vld [vmem:[%s1787_s0 + $0x130] sm:$0xf0]  ;;  %v1231_v33 = vld [vmem:[%s1787_s0 + $0x124] sm:$0xf] }
  0x62   :  { %v1026_v41 = vor.u32 %v1233_v32, %v1025_v31 }
  0x63   :  { %759 = vmatmul.bf16.gmra.mxu3 %v930_v34  ;;  %808 = vmatmul.bf16.gmra.mxu0 %v934_v35  ;;  %v1027_v34 = vld [vmem:[%s1787_s0 + $0x134] sm:$0xf0]  ;;  %v1033_v35 = vld [vmem:[%s1787_s0 + $0x128] sm:$0xf] }
  0x71   :  { %666 = vmatmul.bf16.gmra.mxu1 %v942_v44  ;;  %715 = vmatmul.bf16.gmra.mxu2 %v946_v45  ;;  %v1030_v44 = vor.u32 %v1231_v33, %v1027_v34  ;;  %v1034_v45 = vor.u32 %v1234_v36, %v1033_v35 }
  0x73   :  { %764 = vmatmul.bf16.gmra.mxu3 %v950_v46  ;;  %813 = vmatmul.bf16.gmra.mxu0 %v954_v47 }
  0x81   :  { %671 = vmatmul.bf16.gmra.mxu1 %v962_v56  ;;  %720 = vmatmul.bf16.gmra.mxu2 %v966_v57 }
  0x83   :  { %769 = vmatmul.bf16.gmra.mxu3 %v970_v58  ;;  %818 = vmatmul.bf16.gmra.mxu0 %v974_v59 }
  0x91   :  { %676 = vmatmul.bf16.gmra.mxu1 %v982_v4  ;;  %725 = vmatmul.bf16.gmra.mxu2 %v986_v5 }
  0x93   :  { %774 = vmatmul.bf16.gmra.mxu3 %v990_v6  ;;  %823 = vmatmul.bf16.gmra.mxu0 %v994_v7 }
  0x9e   :  { %v1656_v18 = vpop.f32.mrf.mxu1 }
  0xa0   :  { %v603_v21 = vpop.f32.mrf.mxu0 }
  0xa1   :  { %681 = vmatmul.bf16.gmra.mxu1 %v1002_v16  ;;  %730 = vmatmul.bf16.gmra.mxu2 %v1006_v17  ;;  %v604_v59 = vadd.f32 %v1661_v22, %v603_v21 }
  0xa3   :  { %779 = vmatmul.bf16.gmra.mxu3 %v1010_v19  ;;  %828 = vmatmul.bf16.gmra.mxu0 %v1014_v20 }
  0xa4   :  { %v623_v23 = vpop.f32.mrf.mxu2 }
  0xa5   :  { %v1664_v24 = vadd.f32 %v1661_v22, %v623_v23 }
  0xa6   :  { %v633_v25 = vpop.f32.mrf.mxu3  ;;  %v1669_v27 = vpop.f32.mrf.mxu1 }
  0xa7   :  { %v1667_v26 = vadd.f32 %v1661_v22, %v633_v25 }
  0xa8   :  { %v605_v28 = vpop.f32.mrf.mxu0 }
  0xa9   :  { %v606_v3 = vadd.f32 %v1661_v22, %v605_v28 }
  0xac   :  { %v625_v37 = vpop.f32.mrf.mxu2 }
  0xad   :  { %v1696_v38 = vadd.f32 %v1661_v22, %v625_v37 }
  0xae   :  { %v635_v39 = vpop.f32.mrf.mxu3  ;;  %v1701_v43 = vpop.f32.mrf.mxu1 }
  0xaf   :  { %v1699_v42 = vadd.f32 %v1661_v22, %v635_v39  ;;  %v614_v39 = vadd.f32 %v1661_v22, %v1656_v18 }
  0xb0   :  { %v608_v46 = vpop.f32.mrf.mxu0 }
  0xb1   :  { %686 = vmatmul.bf16.gmra.mxu1 %v1022_v40  ;;  %735 = vmatmul.bf16.gmra.mxu2 %v1026_v41  ;;  %v609_v13 = vadd.f32 %v1661_v22, %v608_v46 }
  0xb3   :  { %784 = vmatmul.bf16.gmra.mxu3 %v1030_v44  ;;  %833 = vmatmul.bf16.gmra.mxu0 %v1034_v45 }
  0xb4   :  { %v628_v47 = vpop.f32.mrf.mxu2 }
  0xb5   :  { %v1704_v48 = vadd.f32 %v1661_v22, %v628_v47 }
  0xb6   :  { %v638_v49 = vpop.f32.mrf.mxu3  ;;  %v1709_v51 = vpop.f32.mrf.mxu1 }
  0xb7   :  { %v1707_v50 = vadd.f32 %v1661_v22, %v638_v49 }
  0xb8   :  { %v610_v52 = vpop.f32.mrf.mxu0 }
  0xb9   :  { %v611_v28 = vadd.f32 %v1661_v22, %v610_v52 }
  0xbc   :  { %v630_v53 = vpop.f32.mrf.mxu2 }
  0xbd   :  { %v1712_v54 = vadd.f32 %v1661_v22, %v630_v53 }
  0xbe   :  { %v640_v55 = vpop.f32.mrf.mxu3  ;;  %v652_v57 = vpop.f32.mrf.mxu1 }
  0xbf   :  { %v1715_v56 = vadd.f32 %v1661_v22, %v640_v55  ;;  %v653_v60 = vadd.f32 %v652_v57, %v604_v59  ;;  %v616_v55 = vadd.f32 %v1661_v22, %v1669_v27 }
  0xc0   :  { %v799_v58 = vpop.f32.mrf.mxu0 }
  0xc4   :  { %v701_v61 = vpop.f32.mrf.mxu2 }
  0xc5   :  { %v702_v62 = vadd.f32 %v701_v61, %v653_v60 }
  0xc6   :  { %v750_v63 = vpop.f32.mrf.mxu3  ;;  %v654_v0 = vpop.f32.mrf.mxu1 }
  0xc7   :  { %v751_v1 = vadd.f32 %v750_v63, %v702_v62  ;;  %v655_v6 = vadd.f32 %v654_v0, %v606_v3 }
  0xc8   :  { %v801_v2 = vpop.f32.mrf.mxu0 }
  0xc9   :  { %v800_v4 = vadd.f32 %v799_v58, %v751_v1  ;;  %v619_v1 = vadd.f32 %v1661_v22, %v1701_v43 }
  0xcb   :  { %v839_v5 = vmax.f32 %v800_v4, 0.0 }
  0xcc   :  { %v703_v7 = vpop.f32.mrf.mxu2 }
  0xcd   :  { %855 = vst [vmem:[%s1788_s3] sm:$0xff] %v839_v5  ;;  %v704_v8 = vadd.f32 %v703_v7, %v655_v6 }
  0xce   :  { %v752_v9 = vpop.f32.mrf.mxu3  ;;  %v657_v10 = vpop.f32.mrf.mxu1 }
  0xcf   :  { %v753_v11 = vadd.f32 %v752_v9, %v704_v8  ;;  %v658_v16 = vadd.f32 %v657_v10, %v609_v13  ;;  %v621_v10 = vadd.f32 %v1661_v22, %v1709_v51 }
  0xd0   :  { %v804_v12 = vpop.f32.mrf.mxu0 }
  0xd1   :  { %v802_v14 = vadd.f32 %v801_v2, %v753_v11 }
  0xd3   :  { %v840_v15 = vmax.f32 %v802_v14, 0.0 }
  0xd4   :  { %v706_v17 = vpop.f32.mrf.mxu2 }
  0xd5   :  { %856 = vst [vmem:[%s1788_s3 + $0x8] sm:$0xff] %v840_v15  ;;  %v707_v19 = vadd.f32 %v706_v17, %v658_v16 }
  0xd6   :  { %v755_v20 = vpop.f32.mrf.mxu3  ;;  %v659_v21 = vpop.f32.mrf.mxu1 }
  0xd7   :  { %v756_v23 = vadd.f32 %v755_v20, %v707_v19  ;;  %v660_v31 = vadd.f32 %v659_v21, %v611_v28 }
  0xd8   :  { %v806_v25 = vpop.f32.mrf.mxu0 }
  0xd9   :  { %v805_v29 = vadd.f32 %v804_v12, %v756_v23 }
  0xdb   :  { %v841_v30 = vmax.f32 %v805_v29, 0.0 }
  0xdc   :  { %v708_v32 = vpop.f32.mrf.mxu2 }
  0xdd   :  { %857 = vst [vmem:[%s1788_s3 + $0x10] sm:$0xff] %v841_v30  ;;  %v709_v33 = vadd.f32 %v708_v32, %v660_v31 }
  0xde   :  { %v757_v34 = vpop.f32.mrf.mxu3  ;;  %v662_v35 = vpop.f32.mrf.mxu1 }
  0xdf   :  { %v758_v36 = vadd.f32 %v757_v34, %v709_v33  ;;  %v663_v44 = vadd.f32 %v662_v35, %v614_v39 }
  0xe0   :  { %v809_v37 = vpop.f32.mrf.mxu0 }
  0xe1   :  { %v807_v40 = vadd.f32 %v806_v25, %v758_v36 }
  0xe3   :  { %v842_v41 = vmax.f32 %v807_v40, 0.0 }
  0xe4   :  { %v711_v45 = vpop.f32.mrf.mxu2 }
  0xe5   :  { %858 = vst [vmem:[%s1788_s3 + $0x18] sm:$0xff] %v842_v41  ;;  %v712_v46 = vadd.f32 %v711_v45, %v663_v44 }
  0xe6   :  { %v760_v47 = vpop.f32.mrf.mxu3  ;;  %v664_v49 = vpop.f32.mrf.mxu1 }
  0xe7   :  { %v761_v52 = vadd.f32 %v760_v47, %v712_v46  ;;  %v665_v59 = vadd.f32 %v664_v49, %v616_v55 }
  0xe8   :  { %v811_v53 = vpop.f32.mrf.mxu0 }
  0xe9   :  { %v810_v57 = vadd.f32 %v809_v37, %v761_v52 }
  0xeb   :  { %v843_v58 = vmax.f32 %v810_v57, 0.0 }
  0xec   :  { %v713_v18 = vpop.f32.mrf.mxu2 }
  0xed   :  { %859 = vst [vmem:[%s1788_s3 + $0x20] sm:$0xff] %v843_v58  ;;  %v714_v60 = vadd.f32 %v713_v18, %v665_v59 }
  0xee   :  { %v762_v61 = vpop.f32.mrf.mxu3  ;;  %v667_v62 = vpop.f32.mrf.mxu1 }
  0xef   :  { %v763_v63 = vadd.f32 %v762_v61, %v714_v60  ;;  %v668_v4 = vadd.f32 %v667_v62, %v619_v1 }
  0xf0   :  { %v814_v0 = vpop.f32.mrf.mxu0 }
  0xf1   :  { %v812_v2 = vadd.f32 %v811_v53, %v763_v63 }
  0xf3   :  { %v844_v3 = vmax.f32 %v812_v2, 0.0 }
  0xf4   :  { %v716_v27 = vpop.f32.mrf.mxu2 }
  0xf5   :  { %860 = vst [vmem:[%s1788_s3 + $0x28] sm:$0xff] %v844_v3  ;;  %v717_v5 = vadd.f32 %v716_v27, %v668_v4 }
  0xf6   :  { %v765_v6 = vpop.f32.mrf.mxu3  ;;  %v669_v7 = vpop.f32.mrf.mxu1 }
  0xf7   :  { %v766_v8 = vadd.f32 %v765_v6, %v717_v5  ;;  %v670_v13 = vadd.f32 %v669_v7, %v621_v10 }
  0xf8   :  { %v816_v9 = vpop.f32.mrf.mxu0 }
  0xf9   :  { %v815_v11 = vadd.f32 %v814_v0, %v766_v8 }
  0xfb   :  { %v845_v12 = vmax.f32 %v815_v11, 0.0 }
  0xfc   :  { %v718_v43 = vpop.f32.mrf.mxu2 }
  0xfd   :  { %861 = vst [vmem:[%s1788_s3 + $0x30] sm:$0xff] %v845_v12  ;;  %v719_v14 = vadd.f32 %v718_v43, %v670_v13 }
  0xfe   :  { %v767_v15 = vpop.f32.mrf.mxu3  ;;  %v672_v16 = vpop.f32.mrf.mxu1 }
  0xff   :  { %v768_v17 = vadd.f32 %v767_v15, %v719_v14  ;;  %v673_v23 = vadd.f32 %v672_v16, %v1664_v24 }
 0x100   :  { %v819_v19 = vpop.f32.mrf.mxu0 }
 0x101   :  { %v817_v20 = vadd.f32 %v816_v9, %v768_v17 }
 0x103   :  { %v846_v21 = vmax.f32 %v817_v20, 0.0 }
 0x104   :  { %v721_v25 = vpop.f32.mrf.mxu2 }
 0x105   :  { %862 = vst [vmem:[%s1788_s3 + $0x38] sm:$0xff] %v846_v21  ;;  %v722_v22 = vadd.f32 %v721_v25, %v673_v23 }
 0x106   :  { %v770_v51 = vpop.f32.mrf.mxu3  ;;  %v674_v28 = vpop.f32.mrf.mxu1 }
 0x107   :  { %v771_v29 = vadd.f32 %v770_v51, %v722_v22  ;;  %v675_v33 = vadd.f32 %v674_v28, %v1696_v38 }
 0x108   :  { %v821_v30 = vpop.f32.mrf.mxu0 }
 0x109   :  { %v820_v31 = vadd.f32 %v819_v19, %v771_v29 }
 0x10b   :  { %v847_v32 = vmax.f32 %v820_v31, 0.0 }
 0x10c   :  { %v723_v34 = vpop.f32.mrf.mxu2 }
 0x10d   :  { %863 = vst [vmem:[%s1788_s3 + $0x40] sm:$0xff] %v847_v32  ;;  %v724_v24 = vadd.f32 %v723_v34, %v675_v33 }
 0x10e   :  { %v772_v35 = vpop.f32.mrf.mxu3  ;;  %v677_v36 = vpop.f32.mrf.mxu1 }
 0x10f   :  { %v773_v37 = vadd.f32 %v772_v35, %v724_v24  ;;  %v678_v44 = vadd.f32 %v677_v36, %v1704_v48 }
 0x110   :  { %v824_v39 = vpop.f32.mrf.mxu0 }
 0x111   :  { %v822_v40 = vadd.f32 %v821_v30, %v773_v37 }
 0x113   :  { %v848_v41 = vmax.f32 %v822_v40, 0.0 }
 0x114   :  { %v726_v45 = vpop.f32.mrf.mxu2 }
 0x115   :  { %864 = vst [vmem:[%s1788_s3 + $0x48] sm:$0xff] %v848_v41  ;;  %v727_v38 = vadd.f32 %v726_v45, %v678_v44 }
 0x116   :  { %v775_v46 = vpop.f32.mrf.mxu3  ;;  %v679_v47 = vpop.f32.mrf.mxu1 }
 0x117   :  { %v776_v49 = vadd.f32 %v775_v46, %v727_v38  ;;  %v680_v57 = vadd.f32 %v679_v47, %v1712_v54 }
 0x118   :  { %v826_v52 = vpop.f32.mrf.mxu0 }
 0x119   :  { %v825_v53 = vadd.f32 %v824_v39, %v776_v49 }
 0x11b   :  { %v849_v55 = vmax.f32 %v825_v53, 0.0 }
 0x11c   :  { %v728_v58 = vpop.f32.mrf.mxu2 }
 0x11d   :  { %865 = vst [vmem:[%s1788_s3 + $0x50] sm:$0xff] %v849_v55  ;;  %v729_v48 = vadd.f32 %v728_v58, %v680_v57 }
 0x11e   :  { %v777_v59 = vpop.f32.mrf.mxu3  ;;  %v682_v18 = vpop.f32.mrf.mxu1 }
 0x11f   :  { %v778_v60 = vadd.f32 %v777_v59, %v729_v48  ;;  %v683_v0 = vadd.f32 %v682_v18, %v1667_v26 }
 0x120   :  { %v829_v62 = vpop.f32.mrf.mxu0 }
 0x121   :  { %v827_v61 = vadd.f32 %v826_v52, %v778_v60 }
 0x123   :  { %v850_v63 = vmax.f32 %v827_v61, 0.0 }
 0x124   :  { %v731_v1 = vpop.f32.mrf.mxu2 }
 0x125   :  { %866 = vst [vmem:[%s1788_s3 + $0x58] sm:$0xff] %v850_v63  ;;  %v732_v54 = vadd.f32 %v731_v1, %v683_v0 }
 0x126   :  { %v780_v2 = vpop.f32.mrf.mxu3  ;;  %v684_v3 = vpop.f32.mrf.mxu1 }
 0x127   :  { %v781_v4 = vadd.f32 %v780_v2, %v732_v54  ;;  %v685_v6 = vadd.f32 %v684_v3, %v1699_v42 }
 0x128   :  { %v831_v7 = vpop.f32.mrf.mxu0 }
 0x129   :  { %v830_v27 = vadd.f32 %v829_v62, %v781_v4 }
 0x12b   :  { %v851_v5 = vmax.f32 %v830_v27, 0.0 }
 0x12c   :  { %v733_v8 = vpop.f32.mrf.mxu2 }
 0x12d   :  { %867 = vst [vmem:[%s1788_s3 + $0x60] sm:$0xff] %v851_v5  ;;  %v734_v26 = vadd.f32 %v733_v8, %v685_v6 }
 0x12e   :  { %v782_v9 = vpop.f32.mrf.mxu3  ;;  %v687_v10 = vpop.f32.mrf.mxu1 }
 0x12f   :  { %v783_v11 = vadd.f32 %v782_v9, %v734_v26  ;;  %v688_v43 = vadd.f32 %v687_v10, %v1707_v50 }
 0x130   :  { %v834_v16 = vpop.f32.mrf.mxu0 }
 0x131   :  { %v832_v12 = vadd.f32 %v831_v7, %v783_v11 }
 0x133   :  { %v852_v13 = vmax.f32 %v832_v12, 0.0 }
 0x134   :  { %v736_v14 = vpop.f32.mrf.mxu2 }
 0x135   :  { %868 = vst [vmem:[%s1788_s3 + $0x68] sm:$0xff] %v852_v13  ;;  %v737_v42 = vadd.f32 %v736_v14, %v688_v43 }
 0x136   :  { %v785_v15 = vpop.f32.mrf.mxu3  ;;  %v689_v19 = vpop.f32.mrf.mxu1 }
 0x137   :  { %v786_v17 = vadd.f32 %v785_v15, %v737_v42  ;;  %v690_v23 = vadd.f32 %v689_v19, %v1715_v56 }
 0x138   :  { %v836_v28 = vpop.f32.mrf.mxu0 }
 0x139   :  { %v835_v20 = vadd.f32 %v834_v16, %v786_v17 }
 0x13b   :  { %v853_v21 = vmax.f32 %v835_v20, 0.0 }
 0x13c   :  { %v738_v25 = vpop.f32.mrf.mxu2 }
 0x13d   :  { %869 = vst [vmem:[%s1788_s3 + $0x70] sm:$0xff] %v853_v21  ;;  %v739_v50 = vadd.f32 %v738_v25, %v690_v23 }
 0x13e   :  { %v787_v22 = vpop.f32.mrf.mxu3 }
 0x13f   :  { %v788_v51 = vadd.f32 %v787_v22, %v739_v50 }
 0x141   :  { %v837_v29 = vadd.f32 %v836_v28, %v788_v51 }
 0x143   :  { %v854_v30 = vmax.f32 %v837_v29, 0.0 }
 0x145   :  { %870 = vst [vmem:[%s1788_s3 + $0x78] sm:$0xff] %v854_v30 }

// kernel: autoencoder_forward.11
= control target key start
LH: loop header
LB: loop body
LE: loop exit
PB: predicated region body
PF: predicated region fallthrough
CT: control target
= control target key end

     0   :  { %s2314_s12 = smov 0   ;;  %s3193_s0 = inlined_call_operand.vmem [shape: bf16[512,384], index: 0, kind: input, shape index: {}]   ;;  %s3194_s1 = inlined_call_operand.vmem [shape: bf16[384,128], index: 1, kind: input, shape index: {}]   ;;  %s3195_s2 = inlined_call_operand.vmem [shape: f32[1,128], index: 2, kind: input, shape index: {}]   ;;  %s3196_s3 = inlined_call_operand.vmem [shape: f32[512,128], index: 3, kind: output, shape index: {}]  }
   0x1 LB: > { %s1752_s13 = sadd.s32 4294967295, %s2292_s12   ;;  %p1756_p0 = scmp.ge.s32.totalorder %s2292_s12, 1  ;;  %s2292_s12 = sphi %s2314_s12, %s13_s12  }
   0x2   : > { %p139_p1 = scmp.lt.s32.totalorder %s2292_s12, 3 }
   0x4   : > { %p140_p2 = pnand %p1756_p0, %p139_p1 }
   0x5   : > { %s1757_s5 = sshll.u32 (!%p140_p2), %s1752_s13, 5 }
   0x6   : > { %143 = sbr.rel (%p140_p2) target bundleno = 421 (0x1a5), region = 32  ;;  %p165_p3 = scmp.lt.s32.totalorder (!%p140_p2), %s1757_s5, 63 }
   0xb   : > { %v2106_v0 = vld [vmem:[%s3194_s1 + $0x38] sm:$0xff]  ;;  %v2105_v3 = vld [vmem:[%s3194_s1 + $0x30] sm:$0xff]  ;;  %v2104_v6 = vld [vmem:[%s3194_s1 + $0x28] sm:$0xff]  ;;  %s3212_s5 = smov (!%p165_p3, %s1757_s5), 63 }
   0xc   : > { %v2328_v1 = vld [vmem:[%s3194_s1 + $0x78] sm:$0xff]  ;;  %693 = vmatpush.bf16.msra.mxu0 %v2106_v0  ;;  %2123 = vmatpush.bf16.msra.mxu3 %v2106_v0  ;;  %v2343_v4 = vld [vmem:[%s3194_s1 + $0x70] sm:$0xff]  ;;  %v2358_v7 = vld [vmem:[%s3194_s1 + $0x68] sm:$0xff]  ;;  %s2147_s21 = smul.u32 12, %s3212_s5  ;;  %s1760_s18 = sshll.u32 %s3212_s5, 3 }
   0xd   : > { %v2333_v2 = vld [vmem:[%s3194_s1 + $0xb8] sm:$0xff]  ;;  %782 = vmatpush.bf16.msra.mxu1 %v2328_v1  ;;  %v2348_v5 = vld [vmem:[%s3194_s1 + $0xb0] sm:$0xff]  ;;  %v2363_v8 = vld [vmem:[%s3194_s1 + $0xa8] sm:$0xff]  ;;  %s2591_s20 = scalar_lea.vmem %s3196_s3, %s1760_s18 }
   0xe   : > { %871 = vmatpush.bf16.msra.mxu2 %v2333_v2  ;;  %v2103_v9 = vld [vmem:[%s3194_s1 + $0x20] sm:$0xff]  ;;  %v2102_v12 = vld [vmem:[%s3194_s1 + $0x18] sm:$0xff]  ;;  %v2101_v15 = vld [vmem:[%s3194_s1 + $0x10] sm:$0xff]  ;;  %s2414_s30 = scalar_lea.vmem %s3193_s0, %s2147_s21 }
   0xf   : > { %v2373_v10 = vld [vmem:[%s3194_s1 + $0x60] sm:$0xff]  ;;  %v2110_v13 = vld [vmem:[%s3194_s1 + $0x58] sm:$0xff]  ;;  %v2109_v16 = vld [vmem:[%s3194_s1 + $0x50] sm:$0xff] }
  0x10   : > { %694 = vmatpush.bf16.msra.mxu0 %v2105_v3  ;;  %2124 = vmatpush.bf16.msra.mxu3 %v2105_v3  ;;  %v2378_v11 = vld [vmem:[%s3194_s1 + $0xa0] sm:$0xff]  ;;  %v2393_v14 = vld [vmem:[%s3194_s1 + $0x98] sm:$0xff]  ;;  %v2406_v17 = vld [vmem:[%s3194_s1 + $0x90] sm:$0xff] }
  0x11   : > { %783 = vmatpush.bf16.msra.mxu1 %v2343_v4  ;;  %v2100_v18 = vld [vmem:[%s3194_s1 + $0x8] sm:$0xff]  ;;  %v2099_v21 = vld [vmem:[%s3194_s1] sm:$0xff]  ;;  %v1765_v29 = vld [vmem:[%s2414_s30 + $0xc] sm:$0xf0] }
  0x12   : > { %872 = vmatpush.bf16.msra.mxu2 %v2348_v5  ;;  %v2108_v19 = vld [vmem:[%s3194_s1 + $0x48] sm:$0xff]  ;;  %v2107_v22 = vld [vmem:[%s3194_s1 + $0x40] sm:$0xff]  ;;  %v2053_v31 = vld [vmem:[%s2414_s30 + $0x10] sm:$0xf0] }
  0x13   : > { %v2423_v20 = vld [vmem:[%s3194_s1 + $0x88] sm:$0xff]  ;;  %v2434_v23 = vld [vmem:[%s3194_s1 + $0x80] sm:$0xff]  ;;  %v1775_v36 = vld [vmem:[%s2414_s30 + $0x18] sm:$0xf] }
  0x14   : > { %695 = vmatpush.bf16.msra.mxu0 %v2104_v6  ;;  %2125 = vmatpush.bf16.msra.mxu3 %v2104_v6  ;;  %v1763_v24 = vld [vmem:[%s2414_s30] sm:$0xf]  ;;  %v2052_v25 = vld [vmem:[%s2414_s30 + $0x8] sm:$0xf0]  ;;  %v2051_v28 = vld [vmem:[%s2414_s30 + $0x4] sm:$0xf] }
  0x15   : > { %784 = vmatpush.bf16.msra.mxu1 %v2358_v7  ;;  %v1907_v26 = vld [vmem:[%s2414_s30 + $0x120] sm:$0xf]  ;;  %v2088_v27 = vld [vmem:[%s2414_s30 + $0x128] sm:$0xf0]  ;;  %v1771_v30 = vld [vmem:[%s2414_s30 + $0x8] sm:$0xf]  ;;  %v1764_v32 = vor.u32 %v2052_v25, %v1763_v24  ;;  %v1768_v34 = vor.u32 %v2051_v28, %v1765_v29 }
  0x16   : > { %873 = vmatpush.bf16.msra.mxu2 %v2363_v8  ;;  %v1908_v33 = vor.u32 %v2088_v27, %v1907_v26  ;;  %v1772_v35 = vor.u32 %v2053_v31, %v1771_v30  ;;  %v2055_v37 = vld [vmem:[%s2414_s30 + $0x20] sm:$0xf0]  ;;  %v1919_v38 = vld [vmem:[%s2414_s30 + $0x138] sm:$0xf]  ;;  %v2054_v40 = vld [vmem:[%s2414_s30 + $0x1c] sm:$0xf] }
  0x17   : > { %v2091_v39 = vld [vmem:[%s2414_s30 + $0x140] sm:$0xf0]  ;;  %v1777_v41 = vld [vmem:[%s2414_s30 + $0x24] sm:$0xf0]  ;;  %v1783_v42 = vld [vmem:[%s2414_s30 + $0x20] sm:$0xf]  ;;  %v1776_v44 = vor.u32 %v2055_v37, %v1775_v36 }
  0x18   : > { %696 = vmatpush.bf16.msra.mxu0 %v2103_v9  ;;  %2126 = vmatpush.bf16.msra.mxu3 %v2103_v9  ;;  %v2056_v43 = vld [vmem:[%s2414_s30 + $0x28] sm:$0xf0]  ;;  %v1920_v45 = vor.u32 %v2091_v39, %v1919_v38  ;;  %v1780_v46 = vor.u32 %v2054_v40, %v1777_v41  ;;  %v1787_v48 = vld [vmem:[%s2414_s30 + $0x30] sm:$0xf]  ;;  %v2058_v49 = vld [vmem:[%s2414_s30 + $0x38] sm:$0xf0] }
  0x19   : > { %785 = vmatpush.bf16.msra.mxu1 %v2373_v10  ;;  %v1784_v47 = vor.u32 %v2056_v43, %v1783_v42  ;;  %v1931_v50 = vld [vmem:[%s2414_s30 + $0x150] sm:$0xf]  ;;  %v2094_v51 = vld [vmem:[%s2414_s30 + $0x158] sm:$0xf0]  ;;  %v2057_v52 = vld [vmem:[%s2414_s30 + $0x34] sm:$0xf]  ;;  %v1788_v56 = vor.u32 %v2058_v49, %v1787_v48 }
  0x1a   : > { %874 = vmatpush.bf16.msra.mxu2 %v2378_v11  ;;  %v1789_v53 = vld [vmem:[%s2414_s30 + $0x3c] sm:$0xf0]  ;;  %v1795_v54 = vld [vmem:[%s2414_s30 + $0x38] sm:$0xf]  ;;  %v2059_v55 = vld [vmem:[%s2414_s30 + $0x40] sm:$0xf0]  ;;  %v1932_v57 = vor.u32 %v2094_v51, %v1931_v50 }
  0x1b   : > { %v1792_v58 = vor.u32 %v2057_v52, %v1789_v53  ;;  %v1796_v59 = vor.u32 %v2059_v55, %v1795_v54  ;;  %v1799_v60 = vld [vmem:[%s2414_s30 + $0x48] sm:$0xf]  ;;  %v2061_v61 = vld [vmem:[%s2414_s30 + $0x50] sm:$0xf0]  ;;  %v2060_v0 = vld [vmem:[%s2414_s30 + $0x4c] sm:$0xf] }
  0x1c   : > { %697 = vmatpush.bf16.msra.mxu0 %v2102_v12  ;;  %2127 = vmatpush.bf16.msra.mxu3 %v2102_v12  ;;  %v1943_v62 = vld [vmem:[%s2414_s30 + $0x168] sm:$0xf]  ;;  %v2097_v63 = vld [vmem:[%s2414_s30 + $0x170] sm:$0xf0]  ;;  %v2062_v3 = vld [vmem:[%s2414_s30 + $0x58] sm:$0xf0] }
  0x1d   : > { %786 = vmatpush.bf16.msra.mxu1 %v2110_v13  ;;  %v2064_v9 = vld [vmem:[%s2414_s30 + $0x68] sm:$0xf0]  ;;  %v1909_v12 = vld [vmem:[%s2414_s30 + $0x12c] sm:$0xf0]  ;;  %v2090_v24 = vld [vmem:[%s2414_s30 + $0x13c] sm:$0xf] }
  0x1e   : > { %875 = vmatpush.bf16.msra.mxu2 %v2393_v14  ;;  %v1921_v25 = vld [vmem:[%s2414_s30 + $0x144] sm:$0xf0]  ;;  %v1831_v26 = vld [vmem:[%s2414_s30 + $0x80] sm:$0xf]  ;;  %v2068_v27 = vld [vmem:[%s2414_s30 + $0x88] sm:$0xf0] }
  0x1f   : > { %v1924_v29 = vor.u32 %v2090_v24, %v1921_v25  ;;  %v1832_v31 = vor.u32 %v2068_v27, %v1831_v26  ;;  %v1933_v36 = vld [vmem:[%s2414_s30 + $0x15c] sm:$0xf0]  ;;  %v1843_v38 = vld [vmem:[%s2414_s30 + $0x98] sm:$0xf]  ;;  %v2071_v39 = vld [vmem:[%s2414_s30 + $0xa0] sm:$0xf0] }
  0x20   : > { %698 = vmatpush.bf16.msra.mxu0 %v2101_v15  ;;  %2128 = vmatpush.bf16.msra.mxu3 %v2101_v15  ;;  %v2065_v15 = vld [vmem:[%s2414_s30 + $0x70] sm:$0xf0]  ;;  %v1837_v37 = vld [vmem:[%s2414_s30 + $0x9c] sm:$0xf0]  ;;  %v1844_v43 = vor.u32 %v2071_v39, %v1843_v38  ;;  %v1945_v48 = vld [vmem:[%s2414_s30 + $0x174] sm:$0xf0] }
  0x21   : > { %787 = vmatpush.bf16.msra.mxu1 %v2109_v16  ;;  %v1849_v49 = vld [vmem:[%s2414_s30 + $0xb4] sm:$0xf0]  ;;  %v1855_v50 = vld [vmem:[%s2414_s30 + $0xb0] sm:$0xf]  ;;  %v2074_v51 = vld [vmem:[%s2414_s30 + $0xb8] sm:$0xf0] }
  0x22   : > { %876 = vmatpush.bf16.msra.mxu2 %v2406_v17  ;;  %v1856_v55 = vor.u32 %v2074_v51, %v1855_v50  ;;  %v1879_v24 = vld [vmem:[%s2414_s30 + $0xe0] sm:$0xf]  ;;  %v2080_v25 = vld [vmem:[%s2414_s30 + $0xe8] sm:$0xf0]  ;;  %v1883_v50 = vld [vmem:[%s2414_s30 + $0xf0] sm:$0xf] }
  0x23   : > { %v2082_v51 = vld [vmem:[%s2414_s30 + $0xf8] sm:$0xf0] }
  0x24   : > { %699 = vmatpush.bf16.msra.mxu0 %v2100_v18  ;;  %2129 = vmatpush.bf16.msra.mxu3 %v2100_v18 }
  0x25   : > { %788 = vmatpush.bf16.msra.mxu1 %v2108_v19 }
  0x26   : > { %877 = vmatpush.bf16.msra.mxu2 %v2423_v20 }
  0x28   : > { %700 = vmatpush.bf16.msra.mxu0 %v2099_v21  ;;  %2130 = vmatpush.bf16.msra.mxu3 %v2099_v21  ;;  %v2067_v21 = vld [vmem:[%s2414_s30 + $0x80] sm:$0xf0] }
  0x29   : > { %789 = vmatpush.bf16.msra.mxu1 %v2107_v22 }
  0x2a   : > { %878 = vmatpush.bf16.msra.mxu2 %v2434_v23 }
  0x2b   : > { %701 = vmatmul.bf16.vlgmr.msra.gmra.mxu0 %v1764_v32  ;;  %761 = vmatmul.bf16.vlgmr.msra.gmra.mxu3 %v1908_v33  ;;  %v1835_v32 = vld [vmem:[%s2414_s30 + $0x90] sm:$0xf]  ;;  %v2070_v33 = vld [vmem:[%s2414_s30 + $0x98] sm:$0xf0] }
  0x2c   : > { %2131 = vmatpush.bf16.msrb.mxu3 %v2328_v1  ;;  %790 = vmatmul.bf16.vlgmr.msra.gmra.mxu1 %v1768_v34  ;;  %v1801_v1 = vld [vmem:[%s2414_s30 + $0x54] sm:$0xf0]  ;;  %v2069_v34 = vld [vmem:[%s2414_s30 + $0x94] sm:$0xf]  ;;  %v1836_v40 = vor.u32 %v2070_v33, %v1835_v32 }
  0x2d   : > { %879 = vmatmul.bf16.vlgmr.msra.gmra.mxu2 %v1772_v35  ;;  %v1804_v6 = vor.u32 %v2060_v0, %v1801_v1  ;;  %v2093_v35 = vld [vmem:[%s2414_s30 + $0x154] sm:$0xf]  ;;  %v1840_v42 = vor.u32 %v2069_v34, %v1837_v37  ;;  %v1880_v34 = vor.u32 %v2080_v25, %v1879_v24 }
  0x2e   : > { %v1936_v41 = vor.u32 %v2093_v35, %v1933_v36  ;;  %v2077_v0 = vld [vmem:[%s2414_s30 + $0xd0] sm:$0xf0] }
  0x30   : > { %2132 = vmatpush.bf16.msrb.mxu3 %v2343_v4  ;;  %v1800_v4 = vor.u32 %v2061_v61, %v1799_v60  ;;  %v1915_v60 = vld [vmem:[%s2414_s30 + $0x128] sm:$0xf]  ;;  %v2089_v61 = vld [vmem:[%s2414_s30 + $0x130] sm:$0xf0] }
  0x34   : > { %2133 = vmatpush.bf16.msrb.mxu3 %v2358_v7 }
  0x38   : > { %2134 = vmatpush.bf16.msrb.mxu3 %v2373_v10  ;;  %v2063_v10 = vld [vmem:[%s2414_s30 + $0x64] sm:$0xf] }
  0x3b   : > { %706 = vmatmul.bf16.gmra.mxu0 %v1776_v44  ;;  %766 = vmatmul.bf16.gmra.mxu3 %v1920_v45  ;;  %v1847_v44 = vld [vmem:[%s2414_s30 + $0xa8] sm:$0xf]  ;;  %v2073_v45 = vld [vmem:[%s2414_s30 + $0xb0] sm:$0xf0] }
  0x3c   : > { %2135 = vmatpush.bf16.msrb.mxu3 %v2110_v13  ;;  %795 = vmatmul.bf16.gmra.mxu1 %v1780_v46  ;;  %v1813_v13 = vld [vmem:[%s2414_s30 + $0x6c] sm:$0xf0]  ;;  %v2072_v46 = vld [vmem:[%s2414_s30 + $0xac] sm:$0xf]  ;;  %v1848_v52 = vor.u32 %v2073_v45, %v1847_v44 }
  0x3d   : > { %884 = vmatmul.bf16.gmra.mxu2 %v1784_v47  ;;  %v1816_v18 = vor.u32 %v2063_v10, %v1813_v13  ;;  %v2096_v47 = vld [vmem:[%s2414_s30 + $0x16c] sm:$0xf]  ;;  %v1852_v54 = vor.u32 %v2072_v46, %v1849_v49 }
  0x3e   : > { %v1948_v53 = vor.u32 %v2096_v47, %v1945_v48 }
  0x40   : > { %2136 = vmatpush.bf16.msrb.mxu3 %v2109_v16 }
  0x44   : > { %2137 = vmatpush.bf16.msrb.mxu3 %v2108_v19 }
  0x48   : > { %2138 = vmatpush.bf16.msrb.mxu3 %v2107_v22  ;;  %v2066_v22 = vld [vmem:[%s2414_s30 + $0x7c] sm:$0xf] }
  0x4b   : > { %711 = vmatmul.bf16.gmra.mxu0 %v1788_v56  ;;  %771 = vmatmul.bf16.gmra.mxu3 %v1932_v57  ;;  %v2517_v56 = vld [vmem:[%s3195_s2] ss:$0 sm:$0xff] }
  0x4c   : > { %2139 = vmatpush.bf16.msra.mxu3 %v2333_v2  ;;  %800 = vmatmul.bf16.gmra.mxu1 %v1792_v58  ;;  %v1807_v2 = vld [vmem:[%s2414_s30 + $0x50] sm:$0xf]  ;;  %v1859_v57 = vld [vmem:[%s2414_s30 + $0xc0] sm:$0xf]  ;;  %v2076_v58 = vld [vmem:[%s2414_s30 + $0xc8] sm:$0xf0] }
  0x4d   : > { %889 = vmatmul.bf16.gmra.mxu2 %v1796_v59  ;;  %v1808_v7 = vor.u32 %v2062_v3, %v1807_v2  ;;  %v2075_v59 = vld [vmem:[%s2414_s30 + $0xc4] sm:$0xf]  ;;  %v1860_v1 = vor.u32 %v2076_v58, %v1859_v57  ;;  %v1916_v2 = vor.u32 %v2089_v61, %v1915_v60  ;;  %v1891_v58 = vld [vmem:[%s2414_s30 + $0xf8] sm:$0xf] }
  0x4e   : > { %v2095_v57 = vld [vmem:[%s2414_s30 + $0x160] sm:$0xf0] }
  0x50   : > { %2140 = vmatpush.bf16.msra.mxu3 %v2348_v5  ;;  %v1944_v5 = vor.u32 %v2097_v63, %v1943_v62  ;;  %v1861_v62 = vld [vmem:[%s2414_s30 + $0xcc] sm:$0xf0]  ;;  %v1867_v63 = vld [vmem:[%s2414_s30 + $0xc8] sm:$0xf] }
  0x54   : > { %2141 = vmatpush.bf16.msra.mxu3 %v2363_v8  ;;  %v1811_v8 = vld [vmem:[%s2414_s30 + $0x60] sm:$0xf] }
  0x55   : > { %v1812_v16 = vor.u32 %v2064_v9, %v1811_v8 }
  0x58   : > { %2142 = vmatpush.bf16.msra.mxu3 %v2378_v11  ;;  %v2087_v11 = vld [vmem:[%s2414_s30 + $0x124] sm:$0xf] }
  0x5b   : > { %716 = vmatmul.bf16.gmra.mxu0 %v1800_v4  ;;  %776 = vmatmul.bf16.gmra.mxu3 %v1944_v5  ;;  %v1864_v4 = vor.u32 %v2075_v59, %v1861_v62  ;;  %v1868_v5 = vor.u32 %v2077_v0, %v1867_v63  ;;  %v2083_v59 = vld [vmem:[%s2414_s30 + $0x100] sm:$0xf0] }
  0x5c   : > { %2143 = vmatpush.bf16.msra.mxu3 %v2393_v14  ;;  %805 = vmatmul.bf16.gmra.mxu1 %v1804_v6  ;;  %v1819_v14 = vld [vmem:[%s2414_s30 + $0x68] sm:$0xf] }
  0x5d   : > { %894 = vmatmul.bf16.gmra.mxu2 %v1808_v7  ;;  %v1820_v19 = vor.u32 %v2065_v15, %v1819_v14 }
  0x60   : > { %2144 = vmatpush.bf16.msra.mxu3 %v2406_v17  ;;  %v1912_v17 = vor.u32 %v2087_v11, %v1909_v12 }
  0x64   : > { %2145 = vmatpush.bf16.msra.mxu3 %v2423_v20  ;;  %v1823_v20 = vld [vmem:[%s2414_s30 + $0x78] sm:$0xf] }
  0x65   : > { %v1824_v28 = vor.u32 %v2067_v21, %v1823_v20  ;;  %v1927_v20 = vld [vmem:[%s2414_s30 + $0x140] sm:$0xf]  ;;  %v2092_v21 = vld [vmem:[%s2414_s30 + $0x148] sm:$0xf0] }
  0x68   : > { %2146 = vmatpush.bf16.msra.mxu3 %v2434_v23  ;;  %v1825_v23 = vld [vmem:[%s2414_s30 + $0x84] sm:$0xf0] }
  0x69   : > { %v1828_v30 = vor.u32 %v2066_v22, %v1825_v23  ;;  %v1873_v22 = vld [vmem:[%s2414_s30 + $0xe4] sm:$0xf0] }
  0x6b   : > { %721 = vmatmul.bf16.gmra.mxu0 %v1812_v16  ;;  %850 = vmatmul.bf16.vlgmr.msrb.gmra.mxu3 %v1912_v17  ;;  %v1871_v16 = vld [vmem:[%s2414_s30 + $0xd8] sm:$0xf]  ;;  %v2079_v17 = vld [vmem:[%s2414_s30 + $0xe0] sm:$0xf0] }
  0x6c   : > { %810 = vmatmul.bf16.gmra.mxu1 %v1816_v18  ;;  %v2078_v18 = vld [vmem:[%s2414_s30 + $0xdc] sm:$0xf] }
  0x6d   : > { %899 = vmatmul.bf16.gmra.mxu2 %v1820_v19  ;;  %v1876_v33 = vor.u32 %v2078_v18, %v1873_v22 }
  0x7b   : > { %726 = vmatmul.bf16.gmra.mxu0 %v1824_v28  ;;  %855 = vmatmul.bf16.gmra.mxu3 %v1924_v29  ;;  %v1872_v29 = vor.u32 %v2079_v17, %v1871_v16 }
  0x7c   : > { %815 = vmatmul.bf16.gmra.mxu1 %v1828_v30  ;;  %v1928_v30 = vor.u32 %v2092_v21, %v1927_v20 }
  0x7d   : > { %904 = vmatmul.bf16.gmra.mxu2 %v1832_v31 }
  0x8b   : > { %731 = vmatmul.bf16.gmra.mxu0 %v1836_v40  ;;  %860 = vmatmul.bf16.gmra.mxu3 %v1936_v41 }
  0x8c   : > { %820 = vmatmul.bf16.gmra.mxu1 %v1840_v42 }
  0x8d   : > { %909 = vmatmul.bf16.gmra.mxu2 %v1844_v43 }
  0x9b   : > { %736 = vmatmul.bf16.gmra.mxu0 %v1848_v52  ;;  %865 = vmatmul.bf16.gmra.mxu3 %v1948_v53  ;;  %v2081_v52 = vld [vmem:[%s2414_s30 + $0xf4] sm:$0xf]  ;;  %v1885_v53 = vld [vmem:[%s2414_s30 + $0xfc] sm:$0xf0] }
  0x9c   : > { %825 = vmatmul.bf16.gmra.mxu1 %v1852_v54 }
  0x9d   : > { %914 = vmatmul.bf16.gmra.mxu2 %v1856_v55  ;;  %v1939_v55 = vld [vmem:[%s2414_s30 + $0x158] sm:$0xf] }
  0xa8   : > { %v702_v3 = vpop.f32.mrf.mxu0 }
  0xa9   : > { %v703_v6 = vadd.f32 %v2517_v56, %v702_v3  ;;  %v791_v7 = vpop.f32.mrf.mxu1  ;;  %v1884_v3 = vor.u32 %v2082_v51, %v1883_v50 }
  0xab   : > { %741 = vmatmul.bf16.gmra.mxu0 %v1860_v1  ;;  %939 = vmatmul.bf16.vlgmr.msra.gmra.mxu3 %v1916_v2  ;;  %v792_v8 = vadd.f32 %v791_v7, %v703_v6 }
  0xac   : > { %830 = vmatmul.bf16.gmra.mxu1 %v1864_v4  ;;  %v1888_v4 = vor.u32 %v2081_v52, %v1885_v53  ;;  %v2098_v52 = vld [vmem:[%s2414_s30 + $0x178] sm:$0xf0] }
  0xad   : > { %919 = vmatmul.bf16.gmra.mxu2 %v1868_v5  ;;  %v1940_v5 = vor.u32 %v2095_v57, %v1939_v55 }
  0xae   : > { %v2528_v9 = vpop.f32.mrf.mxu3 }
  0xb0   : > { %v880_v10 = vpop.f32.mrf.mxu2  ;;  %v704_v12 = vpop.f32.mrf.mxu0 }
  0xb1   : > { %v2530_v11 = vadd.f32 %v880_v10, %v792_v8  ;;  %v793_v13 = vpop.f32.mrf.mxu1  ;;  %v705_v15 = vadd.f32 %v2517_v56, %v704_v12  ;;  %v1892_v10 = vor.u32 %v2083_v59, %v1891_v58 }
  0xb3   : > { %v960_v14 = vand.u32 2147483647, %v2530_v11  ;;  %v794_v26 = vadd.f32 %v793_v13, %v705_v15  ;;  %vm1088_vm2 = vcmp.ge.f32.partialorder %v2530_v11, 0.0 }
  0xb5   : > { %v992_v19 = vsub.f32 0.0, %v960_v14 }
  0xb6   : > { %v2542_v27 = vpop.f32.mrf.mxu3 }
  0xb7   : > { %v1024_v23 = vmul.f32 1.442695, %v992_v19 }
  0xb8   : > { %v882_v28 = vpop.f32.mrf.mxu2  ;;  %v707_v32 = vpop.f32.mrf.mxu0 }
  0xb9   : > { %2157 = vpow2.f32 %v1024_v23  ;;  %v2544_v31 = vadd.f32 %v882_v28, %v794_v26  ;;  %v708_v35 = vadd.f32 %v2517_v56, %v707_v32  ;;  %v796_v36 = vpop.f32.mrf.mxu1 }
  0xbb   : > { %v961_v37 = vand.u32 2147483647, %v2544_v31  ;;  %746 = vmatmul.bf16.gmra.mxu0 %v1872_v29  ;;  %944 = vmatmul.bf16.gmra.mxu3 %v1928_v30  ;;  %v797_v39 = vadd.f32 %v796_v36, %v708_v35  ;;  %vm1089_vm6 = vcmp.ge.f32.partialorder %v2544_v31, 0.0 }
  0xbc   : > { %835 = vmatmul.bf16.gmra.mxu1 %v1876_v33 }
  0xbd   : > { %v993_v38 = vsub.f32 0.0, %v961_v37  ;;  %924 = vmatmul.bf16.gmra.mxu2 %v1880_v34  ;;  %v1895_v34 = vld [vmem:[%s2414_s30 + $0x108] sm:$0xf]  ;;  %v2085_v37 = vld [vmem:[%s2414_s30 + $0x110] sm:$0xf0] }
  0xbe   : > { %v2550_v42 = vpop.f32.mrf.mxu3 }
  0xbf   : > { %v2548_v40 = vpop.eup %2157  ;;  %v1026_v41 = vmul.f32 1.442695, %v993_v38  ;;  %v2084_v38 = vld [vmem:[%s2414_s30 + $0x10c] sm:$0xf] }
  0xc0   : > { %v1152_v43 = vadd.f32 1.0, %v2548_v40  ;;  %v885_v44 = vpop.f32.mrf.mxu2  ;;  %v709_v46 = vpop.f32.mrf.mxu0  ;;  %v1120_v11 = vsel %vm1088_vm2, 1.0, %v2548_v40 }
  0xc1   : > { %2159 = vpow2.f32 %v1026_v41  ;;  %v2553_v45 = vadd.f32 %v885_v44, %v797_v39  ;;  %v798_v47 = vpop.f32.mrf.mxu1  ;;  %v710_v49 = vadd.f32 %v2517_v56, %v709_v46  ;;  %v1897_v44 = vld [vmem:[%s2414_s30 + $0x114] sm:$0xf0]  ;;  %v1903_v46 = vld [vmem:[%s2414_s30 + $0x110] sm:$0xf] }
  0xc2   : > { %2161 = vrcp.f32 %v1152_v43  ;;  %v1195_v16 = vand.u32 2147483648, %v1152_v43  ;;  %v1193_v18 = vand.u32 2147483647, %v1152_v43  ;;  %vm1189_vm1 = vweird.f32 %v1152_v43 }
  0xc3   : > { %v962_v48 = vand.u32 2147483647, %v2553_v45  ;;  %v799_v62 = vadd.f32 %v798_v47, %v710_v49  ;;  %v1951_v49 = vld [vmem:[%s2414_s30 + $0x170] sm:$0xf]  ;;  %vm1090_vm12 = vcmp.ge.f32.partialorder %v2553_v45, 0.0 }
  0xc4   : > { %v1196_v26 = vor.u32 1.1754944e-38, %v1195_v16  ;;  %vm1194_vm4 = vcmp.eq.f32.partialorder %v1193_v18, 8.507059e+37 }
  0xc5   : > { %v994_v54 = vsub.f32 0.0, %v962_v48  ;;  %v2086_v48 = vld [vmem:[%s2414_s30 + $0x118] sm:$0xf0] }
  0xc6   : > { %v2567_v63 = vpop.f32.mrf.mxu3 }
  0xc7   : > { %v2565_v60 = vpop.eup %2159  ;;  %v1028_v61 = vmul.f32 1.442695, %v994_v54  ;;  %v1896_v54 = vor.u32 %v2085_v37, %v1895_v34 }
  0xc8   : > { %v2162_v0 = vpop.eup %2161  ;;  %v2570_v1 = vadd.f32 1.0, %v2565_v60  ;;  %v887_v2 = vpop.f32.mrf.mxu2 }
  0xc9   : > { %v1185_v6 = vmul.f32 %v2162_v0, %v1152_v43  ;;  %2163 = vpow2.f32 %v1028_v61  ;;  %v2572_v7 = vadd.f32 %v887_v2, %v799_v62  ;;  %v712_v8 = vpop.f32.mrf.mxu0  ;;  %v801_v12 = vpop.f32.mrf.mxu1  ;;  %vm1190_vm0 = vweird.f32 %v2162_v0 }
  0xca   : > { %2165 = vrcp.f32 %v2570_v1  ;;  %v713_v15 = vadd.f32 %v2517_v56, %v712_v8  ;;  %vm1191_vm3 = vmor %vm1189_vm1, %vm1190_vm0  ;;  %v1210_v47 = vand.u32 2147483648, %v2570_v1  ;;  %v1208_v40 = vand.u32 2147483647, %v2570_v1 }
  0xcb   : > { %v1186_v13 = vsub.f32 1.0, %v1185_v6  ;;  %v963_v14 = vand.u32 2147483647, %v2572_v7  ;;  %751 = vmatmul.bf16.gmra.mxu0 %v1884_v3  ;;  %949 = vmatmul.bf16.gmra.mxu3 %v1940_v5  ;;  %vm1204_vm7 = vweird.f32 %v2570_v1  ;;  %v1900_v61 = vor.u32 %v2084_v38, %v1897_v44 }
  0xcc   : > { %840 = vmatmul.bf16.gmra.mxu1 %v1888_v4  ;;  %v802_v24 = vadd.f32 %v801_v12, %v713_v15  ;;  %v1904_v4 = vor.u32 %v2086_v48, %v1903_v46  ;;  %v1952_v5 = vor.u32 %v2098_v52, %v1951_v49  ;;  %vm1209_vm9 = vcmp.eq.f32.partialorder %v1208_v40, 8.507059e+37 }
  0xcd   : > { %v1187_v17 = vmul.f32 %v2162_v0, %v1186_v13  ;;  %v995_v19 = vsub.f32 0.0, %v963_v14  ;;  %929 = vmatmul.bf16.gmra.mxu2 %v1892_v10  ;;  %v1121_v12 = vsel %vm1089_vm6, 1.0, %v2565_v60  ;;  %vm1091_vm1 = vcmp.ge.f32.partialorder %v2572_v7, 0.0 }
  0xce   : > { %v2580_v25 = vpop.f32.mrf.mxu3 }
  0xcf   : > { %v2577_v20 = vpop.eup %2163  ;;  %v1188_v21 = vadd.f32 %v2162_v0, %v1187_v17  ;;  %v1030_v22 = vmul.f32 1.442695, %v995_v19 }
  0xd0   : > { %v2166_v23 = vpop.eup %2165  ;;  %v2584_v28 = vadd.f32 1.0, %v2577_v20  ;;  %v890_v29 = vpop.f32.mrf.mxu2 }
  0xd1   : > { %v1192_v30 = vsel %vm1191_vm3, %v2162_v0, %v1188_v21  ;;  %v1200_v32 = vmul.f32 %v2166_v23, %v2570_v1  ;;  %2167 = vpow2.f32 %v1030_v22  ;;  %v714_v33 = vpop.f32.mrf.mxu0  ;;  %v803_v36 = vpop.f32.mrf.mxu1  ;;  %v2597_v43 = vadd.f32 %v890_v29, %v802_v24 }
  0xd2   : > { %v1197_v35 = vsel %vm1194_vm4, %v1196_v26, %v1192_v30  ;;  %2169 = vrcp.f32 %v2584_v28  ;;  %vm1205_vm5 = vweird.f32 %v2166_v23  ;;  %v715_v53 = vadd.f32 %v2517_v56, %v714_v33 }
  0xd3   : > { %v1198_v39 = vmul.f32 %v1197_v35, %v1120_v11  ;;  %v1201_v41 = vsub.f32 1.0, %v1200_v32  ;;  %v964_v51 = vand.u32 2147483647, %v2597_v43  ;;  %vm1206_vm8 = vmor %vm1204_vm7, %vm1205_vm5  ;;  %v1211_v0 = vor.u32 1.1754944e-38, %v1210_v47 }
  0xd4   : > { %v804_v14 = vadd.f32 %v803_v36, %v715_v53  ;;  %v1225_v18 = vand.u32 2147483648, %v2584_v28  ;;  %v1223_v31 = vand.u32 2147483647, %v2584_v28  ;;  %vm1219_vm11 = vweird.f32 %v2584_v28 }
  0xd5   : > { %1664 = vst [vmem:[%s2591_s20] sm:$0xff] %v1198_v39  ;;  %v1202_v50 = vmul.f32 %v2166_v23, %v1201_v41  ;;  %v996_v58 = vsub.f32 0.0, %v964_v51  ;;  %vm1092_vm7 = vcmp.ge.f32.partialorder %v2597_v43, 0.0 }
  0xd6   : > { %v2613_v59 = vpop.f32.mrf.mxu3  ;;  %v1226_v30 = vor.u32 1.1754944e-38, %v1225_v18  ;;  %vm1224_vm14 = vcmp.eq.f32.partialorder %v1223_v31, 8.507059e+37 }
  0xd7   : > { %v2610_v55 = vpop.eup %2167  ;;  %v1203_v57 = vadd.f32 %v2166_v23, %v1202_v50  ;;  %v1032_v10 = vmul.f32 1.442695, %v996_v58 }
  0xd8   : > { %v2170_v62 = vpop.eup %2169  ;;  %v2616_v2 = vadd.f32 1.0, %v2610_v55  ;;  %v892_v3 = vpop.f32.mrf.mxu2 }
  0xd9   : > { %v1207_v6 = vsel %vm1206_vm8, %v2166_v23, %v1203_v57  ;;  %v1215_v8 = vmul.f32 %v2170_v62, %v2584_v28  ;;  %v717_v1 = vpop.f32.mrf.mxu0  ;;  %v806_v15 = vpop.f32.mrf.mxu1  ;;  %v2624_v19 = vadd.f32 %v892_v3, %v804_v14  ;;  %vm1220_vm10 = vweird.f32 %v2170_v62 }
  0xda   : > { %v1212_v13 = vsel %vm1209_vm9, %v1211_v0, %v1207_v6  ;;  %2171 = vrcp.f32 %v2616_v2  ;;  %v718_v21 = vadd.f32 %v2517_v56, %v717_v1  ;;  %vm1221_vm13 = vmor %vm1219_vm11, %vm1220_vm10  ;;  %v1122_v28 = vsel %vm1090_vm12, 1.0, %v2577_v20 }
  0xdb   : > { %v1213_v16 = vmul.f32 %v1212_v13, %v1121_v12  ;;  %v1216_v17 = vsub.f32 1.0, %v1215_v8  ;;  %2173 = vpow2.f32 %v1032_v10  ;;  %756 = vmatmul.bf16.gmra.mxu0 %v1896_v54  ;;  %954 = vmatmul.bf16.gmra.mxu3 %v1952_v5  ;;  %v965_v60 = vand.u32 2147483647, %v2624_v19 }
  0xdc   : > { %845 = vmatmul.bf16.gmra.mxu1 %v1900_v61  ;;  %v807_v24 = vadd.f32 %v806_v15, %v718_v21  ;;  %v1238_v48 = vand.u32 2147483647, %v2616_v2  ;;  %v1240_v49 = vand.u32 2147483648, %v2616_v2  ;;  %vm1234_vm0 = vweird.f32 %v2616_v2 }
  0xdd   : > { %1665 = vst [vmem:[%s2591_s20 + $0x8] sm:$0xff] %v1213_v16  ;;  %v1217_v22 = vmul.f32 %v2170_v62, %v1216_v17  ;;  %934 = vmatmul.bf16.gmra.mxu2 %v1904_v4  ;;  %v997_v32 = vsub.f32 0.0, %v965_v60  ;;  %vm1093_vm10 = vcmp.ge.f32.partialorder %v2624_v19, 0.0 }
  0xde   : > { %v2631_v26 = vpop.f32.mrf.mxu3  ;;  %v1241_v57 = vor.u32 1.1754944e-38, %v1240_v49  ;;  %vm1239_vm3 = vcmp.eq.f32.partialorder %v1238_v48, 8.507059e+37 }
  0xdf   : > { %v1218_v23 = vadd.f32 %v2170_v62, %v1217_v22  ;;  %v1034_v45 = vmul.f32 1.442695, %v997_v32 }
  0xe0   : > { %v2172_v29 = vpop.eup %2171  ;;  %v895_v33 = vpop.f32.mrf.mxu2 }
  0xe1   : > { %v2634_v34 = vpop.eup %2173  ;;  %v1222_v11 = vsel %vm1221_vm13, %v2170_v62, %v1218_v23  ;;  %v1230_v35 = vmul.f32 %v2172_v29, %v2616_v2  ;;  %v2637_v36 = vadd.f32 %v895_v33, %v807_v24  ;;  %v719_v37 = vpop.f32.mrf.mxu0  ;;  %vm1235_vm15 = vweird.f32 %v2172_v29 }
  0xe2   : > { %v1227_v38 = vsel %vm1224_vm14, %v1226_v30, %v1222_v11  ;;  %v2641_v39 = vadd.f32 1.0, %v2634_v34  ;;  %v808_v41 = vpop.f32.mrf.mxu1  ;;  %v720_v40 = vadd.f32 %v2517_v56, %v719_v37  ;;  %vm1236_vm2 = vmor %vm1234_vm0, %vm1235_vm15  ;;  %v1123_v2 = vsel %vm1091_vm1, 1.0, %v2610_v55 }
  0xe3   : > { %v1228_v44 = vmul.f32 %v1227_v38, %v1122_v28  ;;  %v1231_v46 = vsub.f32 1.0, %v1230_v35  ;;  %v966_v47 = vand.u32 2147483647, %v2637_v36  ;;  %v763_v55 = vadd.f32 %v2517_v56, %v2528_v9 }
  0xe4   : > { %2175 = vrcp.f32 %v2641_v39  ;;  %v809_v53 = vadd.f32 %v808_v41, %v720_v40  ;;  %v1255_v16 = vand.u32 2147483648, %v2641_v39  ;;  %v1253_v21 = vand.u32 2147483647, %v2641_v39 }
  0xe5   : > { %1666 = vst [vmem:[%s2591_s20 + $0x10] sm:$0xff] %v1228_v44  ;;  %v1232_v50 = vmul.f32 %v2172_v29, %v1231_v46  ;;  %2177 = vpow2.f32 %v1034_v45  ;;  %v998_v20 = vsub.f32 0.0, %v966_v47  ;;  %vm1249_vm5 = vweird.f32 %v2641_v39 }
  0xe6   : > { %v2650_v54 = vpop.f32.mrf.mxu3  ;;  %v1256_v32 = vor.u32 1.1754944e-38, %v1255_v16  ;;  %vm1254_vm8 = vcmp.eq.f32.partialorder %v1253_v21, 8.507059e+37  ;;  %v1124_v28 = vsel %vm1092_vm7, 1.0, %v2634_v34  ;;  %vm1094_vm15 = vcmp.ge.f32.partialorder %v2637_v36, 0.0 }
  0xe7   : > { %v1233_v51 = vadd.f32 %v2172_v29, %v1232_v50  ;;  %v1036_v52 = vmul.f32 1.442695, %v998_v20  ;;  %v770_v36 = vadd.f32 %v2517_v56, %v2567_v63 }
  0xe8   : > { %v897_v58 = vpop.f32.mrf.mxu2 }
  0xe9   : > { %v1237_v61 = vsel %vm1236_vm2, %v2172_v29, %v1233_v51  ;;  %2179 = vpow2.f32 %v1036_v52  ;;  %v2654_v62 = vadd.f32 %v897_v58, %v809_v53  ;;  %v722_v0 = vpop.f32.mrf.mxu0 }
  0xea   : > { %v2176_v3 = vpop.eup %2175  ;;  %v1242_v4 = vsel %vm1239_vm3, %v1241_v57, %v1237_v61  ;;  %v723_v5 = vadd.f32 %v2517_v56, %v722_v0  ;;  %v811_v6 = vpop.f32.mrf.mxu1 }
  0xeb   : > { %v2658_v8 = vpop.eup %2177  ;;  %v1243_v7 = vmul.f32 %v1242_v4, %v1123_v2  ;;  %v1245_v10 = vmul.f32 %v2176_v3, %v2641_v39  ;;  %v967_v1 = vand.u32 2147483647, %v2654_v62  ;;  %vm1250_vm4 = vweird.f32 %v2176_v3 }
  0xec   : > { %v1157_v12 = vadd.f32 1.0, %v2658_v8  ;;  %v812_v15 = vadd.f32 %v811_v6, %v723_v5  ;;  %vm1251_vm6 = vmor %vm1249_vm5, %vm1250_vm4  ;;  %vm1095_vm5 = vcmp.ge.f32.partialorder %v2654_v62, 0.0 }
  0xed   : > { %1667 = vst [vmem:[%s2591_s20 + $0x18] sm:$0xff] %v1243_v7  ;;  %v1246_v13 = vsub.f32 1.0, %v1245_v10  ;;  %v999_v14 = vsub.f32 0.0, %v967_v1 }
  0xee   : > { %2181 = vrcp.f32 %v1157_v12  ;;  %v851_v31 = vpop.f32.mrf.mxu3  ;;  %v1268_v48 = vand.u32 2147483647, %v1157_v12  ;;  %v1270_v20 = vand.u32 2147483648, %v1157_v12  ;;  %vm1264_vm11 = vweird.f32 %v1157_v12 }
  0xef   : > { %v2667_v17 = vpop.eup %2179  ;;  %v1247_v18 = vmul.f32 %v2176_v3, %v1246_v13  ;;  %v1038_v22 = vmul.f32 1.442695, %v999_v14  ;;  %v2674_v9 = vadd.f32 %v851_v31, %v763_v55  ;;  %v1125_v13 = vsel %vm1093_vm10, 1.0, %v2658_v8 }
  0xf0   : > { %v2672_v60 = vadd.f32 1.0, %v2667_v17  ;;  %v900_v24 = vpop.f32.mrf.mxu2  ;;  %vm1269_vm12 = vcmp.eq.f32.partialorder %v1268_v48, 8.507059e+37  ;;  %v1271_v2 = vor.u32 1.1754944e-38, %v1270_v20 }
  0xf1   : > { %v1248_v23 = vadd.f32 %v2176_v3, %v1247_v18  ;;  %2183 = vpow2.f32 %v1038_v22  ;;  %v2676_v29 = vadd.f32 %v900_v24, %v812_v15  ;;  %v724_v30 = vpop.f32.mrf.mxu0 }
  0xf2   : > { %2185 = vrcp.f32 %v2672_v60  ;;  %v813_v33 = vpop.f32.mrf.mxu1  ;;  %v725_v44 = vadd.f32 %v2517_v56, %v724_v30  ;;  %v1283_v4 = vand.u32 2147483647, %v2672_v60  ;;  %v1285_v5 = vand.u32 2147483648, %v2672_v60 }
  0xf3   : > { %v1252_v11 = vsel %vm1251_vm6, %v2176_v3, %v1248_v23  ;;  %v968_v35 = vand.u32 2147483647, %v2676_v29  ;;  %vm1279_vm0 = vweird.f32 %v2672_v60  ;;  %vm1096_vm10 = vcmp.ge.f32.partialorder %v2676_v29, 0.0 }
  0xf4   : > { %v2182_v37 = vpop.eup %2181  ;;  %v1257_v38 = vsel %vm1254_vm8, %v1256_v32, %v1252_v11  ;;  %v814_v53 = vadd.f32 %v813_v33, %v725_v44  ;;  %v1286_v31 = vor.u32 1.1754944e-38, %v1285_v5  ;;  %vm1284_vm2 = vcmp.eq.f32.partialorder %v1283_v4, 8.507059e+37 }
  0xf5   : > { %v1258_v39 = vmul.f32 %v1257_v38, %v1124_v28  ;;  %v1260_v45 = vmul.f32 %v2182_v37, %v1157_v12  ;;  %v1000_v41 = vsub.f32 0.0, %v968_v35  ;;  %vm1265_vm9 = vweird.f32 %v2182_v37 }
  0xf6   : > { %v2686_v43 = vpop.f32.mrf.mxu3  ;;  %vm1266_vm13 = vmor %vm1264_vm11, %vm1265_vm9  ;;  %v768_v12 = vadd.f32 %v2517_v56, %v2550_v42  ;;  %v1126_v33 = vsel %vm1094_vm15, 1.0, %v2667_v17 }
  0xf7   : > { %v2683_v46 = vpop.eup %2183  ;;  %1668 = vst [vmem:[%s2591_s20 + $0x20] sm:$0xff] %v1258_v39  ;;  %v1261_v47 = vsub.f32 1.0, %v1260_v45  ;;  %v1040_v49 = vmul.f32 1.442695, %v1000_v41 }
  0xf8   : > { %v2186_v50 = vpop.eup %2185  ;;  %v2689_v40 = vadd.f32 1.0, %v2683_v46  ;;  %v902_v34 = vpop.f32.mrf.mxu2 }
  0xf9   : > { %v1262_v51 = vmul.f32 %v2182_v37, %v1261_v47  ;;  %v1275_v52 = vmul.f32 %v2186_v50, %v2672_v60  ;;  %2187 = vpow2.f32 %v1040_v49  ;;  %v727_v57 = vpop.f32.mrf.mxu0  ;;  %v2694_v3 = vadd.f32 %v902_v34, %v814_v53 }
  0xfa   : > { %2189 = vrcp.f32 %v2689_v40  ;;  %v816_v58 = vpop.f32.mrf.mxu1  ;;  %v728_v6 = vadd.f32 %v2517_v56, %v727_v57  ;;  %vm1280_vm14 = vweird.f32 %v2186_v50  ;;  %v1300_v38 = vand.u32 2147483648, %v2689_v40 }
  0xfb   : > { %v1263_v61 = vadd.f32 %v2182_v37, %v1262_v51  ;;  %v1276_v0 = vsub.f32 1.0, %v1275_v52  ;;  %v969_v1 = vand.u32 2147483647, %v2694_v3  ;;  %vm1281_vm1 = vmor %vm1279_vm0, %vm1280_vm14  ;;  %v1298_v44 = vand.u32 2147483647, %v2689_v40 }
  0xfc   : > { %v817_v19 = vadd.f32 %v816_v58, %v728_v6  ;;  %vm1294_vm4 = vweird.f32 %v2689_v40  ;;  %v1301_v20 = vor.u32 1.1754944e-38, %v1300_v38  ;;  %vm1097_vm15 = vcmp.ge.f32.partialorder %v2694_v3, 0.0 }
  0xfd   : > { %v1267_v7 = vsel %vm1266_vm13, %v2182_v37, %v1263_v61  ;;  %v1277_v10 = vmul.f32 %v2186_v50, %v1276_v0  ;;  %v1001_v18 = vsub.f32 0.0, %v969_v1  ;;  %vm1299_vm7 = vcmp.eq.f32.partialorder %v1298_v44, 8.507059e+37 }
  0xfe   : > { %v1272_v14 = vsel %vm1269_vm12, %v1271_v2, %v1267_v7  ;;  %v856_v21 = vpop.f32.mrf.mxu3  ;;  %v1127_v61 = vsel %vm1095_vm5, 1.0, %v2683_v46 }
  0xff   : > { %v2707_v15 = vpop.eup %2187  ;;  %v1273_v55 = vmul.f32 %v1272_v14, %v1125_v13  ;;  %v1278_v16 = vadd.f32 %v2186_v50, %v1277_v10  ;;  %v2713_v8 = vadd.f32 %v856_v21, %v768_v12  ;;  %v1042_v32 = vmul.f32 1.442695, %v1001_v18 }
 0x100   : > { %v2190_v22 = vpop.eup %2189  ;;  %v2711_v42 = vadd.f32 1.0, %v2707_v15  ;;  %v905_v24 = vpop.f32.mrf.mxu2  ;;  %v773_v14 = vadd.f32 %v2517_v56, %v2580_v25 }
 0x101   : > { %1669 = vst [vmem:[%s2591_s20 + $0x28] sm:$0xff] %v1273_v55  ;;  %v1282_v23 = vsel %vm1281_vm1, %v2186_v50, %v1278_v16  ;;  %v1290_v30 = vmul.f32 %v2190_v22, %v2689_v40  ;;  %v729_v60 = vpop.f32.mrf.mxu0  ;;  %v2722_v39 = vadd.f32 %v905_v24, %v817_v19  ;;  %vm1295_vm3 = vweird.f32 %v2190_v22 }
 0x102   : > { %v1287_v11 = vsel %vm1284_vm2, %v1286_v31, %v1282_v23  ;;  %2191 = vrcp.f32 %v2711_v42  ;;  %v818_v35 = vpop.f32.mrf.mxu1  ;;  %v730_v45 = vadd.f32 %v2517_v56, %v729_v60  ;;  %vm1296_vm6 = vmor %vm1294_vm4, %vm1295_vm3  ;;  %v1313_v10 = vand.u32 2147483647, %v2711_v42 }
 0x103   : > { %v1288_v37 = vmul.f32 %v1287_v11, %v1126_v33  ;;  %v1291_v28 = vsub.f32 1.0, %v1290_v30  ;;  %2193 = vpow2.f32 %v1042_v32  ;;  %v970_v17 = vand.u32 2147483647, %v2722_v39 }
 0x104   : > { %v819_v48 = vadd.f32 %v818_v35, %v730_v45  ;;  %v1315_v1 = vand.u32 2147483648, %v2711_v42  ;;  %vm1309_vm9 = vweird.f32 %v2711_v42  ;;  %vm1314_vm12 = vcmp.eq.f32.partialorder %v1313_v10, 8.507059e+37 }
 0x105   : > { %1670 = vst [vmem:[%s2591_s20 + $0x30] sm:$0xff] %v1288_v37  ;;  %v1292_v41 = vmul.f32 %v2190_v22, %v1291_v28  ;;  %v1002_v34 = vsub.f32 0.0, %v970_v17  ;;  %v778_v10 = vadd.f32 %v2517_v56, %v2631_v26  ;;  %vm1098_vm3 = vcmp.ge.f32.partialorder %v2722_v39, 0.0 }
 0x106   : > { %v858_v49 = vpop.f32.mrf.mxu3 }
 0x107   : > { %v1293_v47 = vadd.f32 %v2190_v22, %v1292_v41  ;;  %v2732_v51 = vadd.f32 %v858_v49, %v770_v36  ;;  %v1044_v2 = vmul.f32 1.442695, %v1002_v34 }
 0x108   : > { %v2192_v50 = vpop.eup %2191  ;;  %v907_v52 = vpop.f32.mrf.mxu2 }
 0x109   : > { %v2734_v53 = vpop.eup %2193  ;;  %v1297_v57 = vsel %vm1296_vm6, %v2190_v22, %v1293_v47  ;;  %v1305_v63 = vmul.f32 %v2192_v50, %v2711_v42  ;;  %v2737_v58 = vadd.f32 %v907_v52, %v819_v48  ;;  %v732_v40 = vpop.f32.mrf.mxu0  ;;  %vm1310_vm8 = vweird.f32 %v2192_v50 }
 0x10a   : > { %v1302_v0 = vsel %vm1299_vm7, %v1301_v20, %v1297_v57  ;;  %v2741_v62 = vadd.f32 1.0, %v2734_v53  ;;  %v821_v4 = vpop.f32.mrf.mxu1  ;;  %v733_v13 = vadd.f32 %v2517_v56, %v732_v40  ;;  %vm1311_vm11 = vmor %vm1309_vm9, %vm1310_vm8  ;;  %v1316_v22 = vor.u32 1.1754944e-38, %v1315_v1 }
 0x10b   : > { %v1303_v5 = vmul.f32 %v1302_v0, %v1127_v61  ;;  %v1306_v6 = vsub.f32 1.0, %v1305_v63  ;;  %v971_v7 = vand.u32 2147483647, %v2737_v58  ;;  %v1128_v42 = vsel %vm1096_vm10, 1.0, %v2707_v15 }
 0x10c   : > { %2195 = vrcp.f32 %v2741_v62  ;;  %v822_v18 = vadd.f32 %v821_v4, %v733_v13  ;;  %v775_v15 = vadd.f32 %v2517_v56, %v2613_v59  ;;  %v1328_v41 = vand.u32 2147483647, %v2741_v62 }
 0x10d   : > { %1671 = vst [vmem:[%s2591_s20 + $0x38] sm:$0xff] %v1303_v5  ;;  %v1307_v12 = vmul.f32 %v2192_v50, %v1306_v6  ;;  %2197 = vpow2.f32 %v1044_v2  ;;  %v1003_v46 = vsub.f32 0.0, %v971_v7  ;;  %v1330_v44 = vand.u32 2147483648, %v2741_v62 }
 0x10e   : > { %v861_v21 = vpop.f32.mrf.mxu3  ;;  %vm1324_vm14 = vweird.f32 %v2741_v62  ;;  %vm1329_vm1 = vcmp.eq.f32.partialorder %v1328_v41, 8.507059e+37  ;;  %v1129_v4 = vsel %vm1097_vm15, 1.0, %v2734_v53  ;;  %vm1099_vm9 = vcmp.ge.f32.partialorder %v2737_v58, 0.0 }
 0x10f   : > { %v1308_v55 = vadd.f32 %v2192_v50, %v1307_v12  ;;  %v1046_v16 = vmul.f32 1.442695, %v1003_v46  ;;  %v2754_v31 = vadd.f32 %v861_v21, %v773_v14  ;;  %v1331_v63 = vor.u32 1.1754944e-38, %v1330_v44 }
 0x110   : > { %v910_v19 = vpop.f32.mrf.mxu2 }
 0x111   : > { %v1312_v24 = vsel %vm1311_vm11, %v2192_v50, %v1308_v55  ;;  %2199 = vpow2.f32 %v1046_v16  ;;  %v2756_v23 = vadd.f32 %v910_v19, %v822_v18  ;;  %v734_v25 = vpop.f32.mrf.mxu0 }
 0x112   : > { %v2196_v30 = vpop.eup %2195  ;;  %v1317_v32 = vsel %vm1314_vm12, %v1316_v22, %v1312_v24  ;;  %v823_v60 = vpop.f32.mrf.mxu1  ;;  %v735_v37 = vadd.f32 %v2517_v56, %v734_v25 }
 0x113   : > { %v2759_v33 = vpop.eup %2197  ;;  %v1318_v29 = vmul.f32 %v1317_v32, %v1128_v42  ;;  %v1320_v11 = vmul.f32 %v2196_v30, %v2741_v62  ;;  %v972_v35 = vand.u32 2147483647, %v2756_v23  ;;  %vm1325_vm13 = vweird.f32 %v2196_v30 }
 0x114   : > { %v2765_v28 = vadd.f32 1.0, %v2759_v33  ;;  %v824_v48 = vadd.f32 %v823_v60, %v735_v37  ;;  %vm1326_vm0 = vmor %vm1324_vm14, %vm1325_vm13  ;;  %vm1100_vm14 = vcmp.ge.f32.partialorder %v2756_v23, 0.0 }
 0x115   : > { %1672 = vst [vmem:[%s2591_s20 + $0x40] sm:$0xff] %v1318_v29  ;;  %v1321_v38 = vsub.f32 1.0, %v1320_v11  ;;  %v1004_v45 = vsub.f32 0.0, %v972_v35 }
 0x116   : > { %2201 = vrcp.f32 %v2765_v28  ;;  %v863_v49 = vpop.f32.mrf.mxu3  ;;  %v1343_v16 = vand.u32 2147483647, %v2765_v28  ;;  %v1345_v53 = vand.u32 2147483648, %v2765_v28  ;;  %vm1339_vm4 = vweird.f32 %v2765_v28 }
 0x117   : > { %v2773_v36 = vpop.eup %2199  ;;  %v1322_v17 = vmul.f32 %v2196_v30, %v1321_v38  ;;  %v1048_v47 = vmul.f32 1.442695, %v1004_v45  ;;  %v2779_v34 = vadd.f32 %v863_v49, %v775_v15  ;;  %v780_v45 = vadd.f32 %v2517_v56, %v2650_v54 }
 0x118   : > { %v2777_v50 = vadd.f32 1.0, %v2773_v36  ;;  %v912_v20 = vpop.f32.mrf.mxu2  ;;  %vm1344_vm6 = vcmp.eq.f32.partialorder %v1343_v16, 8.507059e+37  ;;  %v1346_v60 = vor.u32 1.1754944e-38, %v1345_v53 }
 0x119   : > { %v1323_v59 = vadd.f32 %v2196_v30, %v1322_v17  ;;  %2203 = vpow2.f32 %v1048_v47  ;;  %v2781_v52 = vadd.f32 %v912_v20, %v824_v48  ;;  %v737_v57 = vpop.f32.mrf.mxu0 }
 0x11a   : > { %2205 = vrcp.f32 %v2777_v50  ;;  %v826_v40 = vpop.f32.mrf.mxu1  ;;  %v738_v62 = vadd.f32 %v2517_v56, %v737_v57  ;;  %v1358_v29 = vand.u32 2147483647, %v2777_v50  ;;  %v1360_v11 = vand.u32 2147483648, %v2777_v50 }
 0x11b   : > { %v1327_v61 = vsel %vm1326_vm0, %v2196_v30, %v1323_v59  ;;  %v973_v0 = vand.u32 2147483647, %v2781_v52  ;;  %vm1354_vm8 = vweird.f32 %v2777_v50 }
 0x11c   : > { %v2202_v2 = vpop.eup %2201  ;;  %v1332_v5 = vsel %vm1329_vm1, %v1331_v63, %v1327_v61  ;;  %v827_v13 = vadd.f32 %v826_v40, %v738_v62  ;;  %v1361_v54 = vor.u32 1.1754944e-38, %v1360_v11  ;;  %vm1359_vm11 = vcmp.eq.f32.partialorder %v1358_v29, 8.507059e+37 }
 0x11d   : > { %v1333_v6 = vmul.f32 %v1332_v5, %v1129_v4  ;;  %v1335_v7 = vmul.f32 %v2202_v2, %v2765_v28  ;;  %v1005_v3 = vsub.f32 0.0, %v973_v0  ;;  %vm1340_vm2 = vweird.f32 %v2202_v2 }
 0x11e   : > { %v866_v14 = vpop.f32.mrf.mxu3  ;;  %vm1341_vm5 = vmor %vm1339_vm4, %vm1340_vm2  ;;  %v1130_v28 = vsel %vm1098_vm3, 1.0, %v2759_v33  ;;  %v1131_v40 = vsel %vm1099_vm9, 1.0, %v2773_v36  ;;  %vm1101_vm3 = vcmp.ge.f32.partialorder %v2781_v52, 0.0 }
 0x11f   : > { %v2791_v1 = vpop.eup %2203  ;;  %1673 = vst [vmem:[%s2591_s20 + $0x48] sm:$0xff] %v1333_v6  ;;  %v1336_v12 = vsub.f32 1.0, %v1335_v7  ;;  %v1050_v46 = vmul.f32 1.442695, %v1005_v3  ;;  %v2799_v21 = vadd.f32 %v866_v14, %v778_v10  ;;  %v2836_v7 = vld [vmem:[%s3195_s2] ss:$0 sm:$0xff] }
 0x120   : > { %v2206_v55 = vpop.eup %2205  ;;  %v2797_v18 = vadd.f32 1.0, %v2791_v1  ;;  %v915_v22 = vpop.f32.mrf.mxu2  ;;  %v765_v29 = vadd.f32 %v2836_v7, %v2542_v27 }
 0x121   : > { %v1337_v19 = vmul.f32 %v2202_v2, %v1336_v12  ;;  %v1350_v26 = vmul.f32 %v2206_v55, %v2777_v50  ;;  %2207 = vpow2.f32 %v1050_v46  ;;  %v739_v24 = vpop.f32.mrf.mxu0  ;;  %v2805_v32 = vadd.f32 %v915_v22, %v827_v13 }
 0x122   : > { %2209 = vrcp.f32 %v2797_v18  ;;  %v828_v25 = vpop.f32.mrf.mxu1  ;;  %vm1355_vm7 = vweird.f32 %v2206_v55  ;;  %v740_v41 = vadd.f32 %v2517_v56, %v739_v24  ;;  %v1373_v4 = vand.u32 2147483647, %v2797_v18 }
 0x123   : > { %v1338_v30 = vadd.f32 %v2202_v2, %v1337_v19  ;;  %v1351_v42 = vsub.f32 1.0, %v1350_v26  ;;  %v974_v38 = vand.u32 2147483647, %v2805_v32  ;;  %vm1356_vm10 = vmor %vm1354_vm8, %vm1355_vm7  ;;  %v1375_v5 = vand.u32 2147483648, %v2797_v18 }
 0x124   : > { %v829_v58 = vadd.f32 %v828_v25, %v740_v41  ;;  %vm1369_vm13 = vweird.f32 %v2797_v18  ;;  %vm1374_vm0 = vcmp.eq.f32.partialorder %v1373_v4, 8.507059e+37  ;;  %v854_v27 = vadd.f32 %v2686_v43, %v765_v29 }
 0x125   : > { %v1342_v35 = vsel %vm1341_vm5, %v2202_v2, %v1338_v30  ;;  %v1352_v37 = vmul.f32 %v2206_v55, %v1351_v42  ;;  %v1006_v48 = vsub.f32 0.0, %v974_v38 }
 0x126   : > { %v1347_v15 = vsel %vm1344_vm6, %v1346_v60, %v1342_v35  ;;  %v868_v49 = vpop.f32.mrf.mxu3  ;;  %vm1102_vm6 = vcmp.ge.f32.partialorder %v2805_v32, 0.0 }
 0x127   : > { %v2816_v44 = vpop.eup %2207  ;;  %v1348_v17 = vmul.f32 %v1347_v15, %v1130_v28  ;;  %v1353_v47 = vadd.f32 %v2206_v55, %v1352_v37  ;;  %v2823_v33 = vadd.f32 %v868_v49, %v780_v45  ;;  %v1052_v50 = vmul.f32 1.442695, %v1006_v48 }
 0x128   : > { %v2210_v20 = vpop.eup %2209  ;;  %v2821_v39 = vadd.f32 1.0, %v2816_v44  ;;  %v917_v59 = vpop.f32.mrf.mxu2 }
 0x129   : > { %1674 = vst [vmem:[%s2591_s20 + $0x50] sm:$0xff] %v1348_v17  ;;  %v1357_v56 = vsel %vm1356_vm10, %v2206_v55, %v1353_v47  ;;  %v1365_v57 = vmul.f32 %v2210_v20, %v2797_v18  ;;  %v742_v63 = vpop.f32.mrf.mxu0  ;;  %v2831_v6 = vadd.f32 %v917_v59, %v829_v58  ;;  %vm1370_vm12 = vweird.f32 %v2210_v20 }
 0x12a   : > { %v1362_v61 = vsel %vm1359_vm11, %v1361_v54, %v1357_v56  ;;  %2211 = vrcp.f32 %v2821_v39  ;;  %v831_v0 = vpop.f32.mrf.mxu1  ;;  %v743_v36 = vadd.f32 %v2836_v7, %v742_v63  ;;  %vm1371_vm15 = vmor %vm1369_vm13, %vm1370_vm12  ;;  %v1376_v55 = vor.u32 1.1754944e-38, %v1375_v5 }
 0x12b   : > { %v1363_v62 = vmul.f32 %v1362_v61, %v1131_v40  ;;  %v1366_v2 = vsub.f32 1.0, %v1365_v57  ;;  %2213 = vpow2.f32 %v1052_v50  ;;  %v975_v10 = vand.u32 2147483647, %v2831_v6 }
 0x12c   : > { %v832_v12 = vadd.f32 %v831_v0, %v743_v36  ;;  %v1132_v18 = vsel %vm1100_vm14, 1.0, %v2791_v1  ;;  %v1388_v38 = vand.u32 2147483647, %v2821_v39  ;;  %vm1384_vm2 = vweird.f32 %v2821_v39 }
 0x12d   : > { %1675 = vst [vmem:[%s2591_s20 + $0x58] sm:$0xff] %v1363_v62  ;;  %v1367_v3 = vmul.f32 %v2210_v20, %v1366_v2  ;;  %v1007_v16 = vsub.f32 0.0, %v975_v10  ;;  %vm1103_vm9 = vcmp.ge.f32.partialorder %v2831_v6, 0.0 }
 0x12e   : > { %v940_v13 = vpop.f32.mrf.mxu3  ;;  %vm1389_vm5 = vcmp.eq.f32.partialorder %v1388_v38, 8.507059e+37 }
 0x12f   : > { %v1368_v46 = vadd.f32 %v2210_v20, %v1367_v3  ;;  %v2849_v25 = vadd.f32 %v940_v13, %v2674_v9  ;;  %v1054_v42 = vmul.f32 1.442695, %v1007_v16  ;;  %v1390_v9 = vand.u32 2147483648, %v2821_v39 }
 0x130   : > { %v2212_v14 = vpop.eup %2211  ;;  %v920_v53 = vpop.f32.mrf.mxu2 }
 0x131   : > { %v2843_v22 = vpop.eup %2213  ;;  %v1372_v19 = vsel %vm1371_vm15, %v2210_v20, %v1368_v46  ;;  %v1380_v26 = vmul.f32 %v2212_v14, %v2821_v39  ;;  %v2846_v24 = vadd.f32 %v920_v53, %v832_v12  ;;  %v744_v60 = vpop.f32.mrf.mxu0  ;;  %vm1385_vm1 = vweird.f32 %v2212_v14 }
 0x132   : > { %v1377_v30 = vsel %vm1374_vm0, %v1376_v55, %v1372_v19  ;;  %v2853_v23 = vadd.f32 1.0, %v2843_v22  ;;  %v833_v1 = vpop.f32.mrf.mxu1  ;;  %v984_v15 = vand.u32 2147483647, %v2849_v25  ;;  %v745_v41 = vadd.f32 %v2836_v7, %v744_v60  ;;  %vm1386_vm4 = vmor %vm1384_vm2, %vm1385_vm1 }
 0x133   : > { %v1378_v11 = vmul.f32 %v1377_v30, %v1132_v18  ;;  %v1381_v35 = vsub.f32 1.0, %v1380_v26  ;;  %v976_v37 = vand.u32 2147483647, %v2846_v24  ;;  %v1391_v20 = vor.u32 1.1754944e-38, %v1390_v9 }
 0x134   : > { %2215 = vrcp.f32 %v2853_v23  ;;  %v1016_v48 = vsub.f32 0.0, %v984_v15  ;;  %v834_v54 = vadd.f32 %v833_v1, %v745_v41  ;;  %v1133_v39 = vsel %vm1101_vm3, 1.0, %v2816_v44 }
 0x135   : > { %1676 = vst [vmem:[%s2591_s20 + $0x60] sm:$0xff] %v1378_v11  ;;  %v1382_v45 = vmul.f32 %v2212_v14, %v1381_v35  ;;  %2217 = vpow2.f32 %v1054_v42  ;;  %v1008_v28 = vsub.f32 0.0, %v976_v37  ;;  %v1403_v3 = vand.u32 2147483647, %v2853_v23 }
 0x136   : > { %v942_v49 = vpop.f32.mrf.mxu3  ;;  %v1072_v43 = vmul.f32 1.442695, %v1016_v48  ;;  %v1405_v10 = vand.u32 2147483648, %v2853_v23  ;;  %v1134_v53 = vsel %vm1102_vm6, 1.0, %v2843_v22  ;;  %vm1399_vm8 = vweird.f32 %v2853_v23 }
 0x137   : > { %v1383_v17 = vadd.f32 %v2212_v14, %v1382_v45  ;;  %v1056_v47 = vmul.f32 1.442695, %v1008_v28  ;;  %v2868_v56 = vadd.f32 %v942_v49, %v854_v27  ;;  %vm1404_vm11 = vcmp.eq.f32.partialorder %v1403_v3, 8.507059e+37 }
 0x138   : > { %v922_v59 = vpop.f32.mrf.mxu2  ;;  %v1406_v60 = vor.u32 1.1754944e-38, %v1405_v10  ;;  %vm1104_vm12 = vcmp.ge.f32.partialorder %v2846_v24, 0.0  ;;  %vm1112_vm13 = vcmp.ge.f32.partialorder %v2849_v25, 0.0 }
 0x139   : > { %v1387_v57 = vsel %vm1386_vm4, %v2212_v14, %v1383_v17  ;;  %2219 = vpow2.f32 %v1056_v47  ;;  %v2871_v40 = vadd.f32 %v922_v59, %v834_v54  ;;  %v985_v52 = vand.u32 2147483647, %v2868_v56  ;;  %v747_v4 = vpop.f32.mrf.mxu0 }
 0x13a   : > { %v2216_v50 = vpop.eup %2215  ;;  %v1392_v63 = vsel %vm1389_vm5, %v1391_v20, %v1387_v57  ;;  %2221 = vpow2.f32 %v1072_v43  ;;  %v748_v36 = vadd.f32 %v2836_v7, %v747_v4  ;;  %v836_v12 = vpop.f32.mrf.mxu1  ;;  %vm1113_vm15 = vcmp.ge.f32.partialorder %v2868_v56, 0.0 }
 0x13b   : > { %v2218_v61 = vpop.eup %2217  ;;  %v1393_v58 = vmul.f32 %v1392_v63, %v1133_v39  ;;  %v1395_v0 = vmul.f32 %v2216_v50, %v2853_v23  ;;  %v977_v2 = vand.u32 2147483647, %v2871_v40  ;;  %v1017_v44 = vsub.f32 0.0, %v985_v52 }
 0x13c   : > { %v2875_v62 = vadd.f32 1.0, %v2218_v61  ;;  %vm1400_vm7 = vweird.f32 %v2216_v50  ;;  %v837_v16 = vadd.f32 %v836_v12, %v748_v36  ;;  %v1135_v15 = vsel %vm1103_vm9, 1.0, %v2218_v61 }
 0x13d   : > { %1677 = vst [vmem:[%s2591_s20 + $0x68] sm:$0xff] %v1393_v58  ;;  %v1396_v5 = vsub.f32 1.0, %v1395_v0  ;;  %v1009_v14 = vsub.f32 0.0, %v977_v2  ;;  %v1074_v55 = vmul.f32 1.442695, %v1017_v44  ;;  %vm1401_vm10 = vmor %vm1399_vm8, %vm1400_vm7 }
 0x13e   : > { %2223 = vrcp.f32 %v2875_v62  ;;  %v1418_v29 = vand.u32 2147483647, %v2875_v62  ;;  %v1420_v23 = vand.u32 2147483648, %v2875_v62  ;;  %v945_v35 = vpop.f32.mrf.mxu3  ;;  %vm1414_vm14 = vweird.f32 %v2875_v62 }
 0x13f   : > { %v2220_v46 = vpop.eup %2219  ;;  %v1397_v13 = vmul.f32 %v2216_v50, %v1396_v5  ;;  %v1058_v30 = vmul.f32 1.442695, %v1009_v14  ;;  %2225 = vpow2.f32 %v1074_v55  ;;  %v2937_v4 = vadd.f32 %v945_v35, %v2713_v8 }
 0x140   : > { %v2887_v32 = vadd.f32 1.0, %v2220_v46  ;;  %v925_v19 = vpop.f32.mrf.mxu2  ;;  %v2222_v26 = vpop.eup %2221  ;;  %vm2909_vm0 = vcmp.eq.f32.partialorder %v1418_v29, 8.507059e+37  ;;  %v1421_v48 = vor.u32 1.1754944e-38, %v1420_v23  ;;  %v1136_v49 = vsel %vm1104_vm12, 1.0, %v2220_v46 }
 0x141   : > { %v1398_v18 = vadd.f32 %v2216_v50, %v1397_v13  ;;  %v2889_v42 = vadd.f32 %v925_v19, %v837_v16  ;;  %v2895_v11 = vadd.f32 1.0, %v2222_v26  ;;  %v2918_v6 = vsel %vm1112_vm13, 1.0, %v2222_v26  ;;  %v749_v57 = vpop.f32.mrf.mxu0 }
 0x142   : > { %2227 = vrcp.f32 %v2887_v32  ;;  %v1433_v28 = vand.u32 2147483647, %v2887_v32  ;;  %v1435_v27 = vand.u32 2147483648, %v2887_v32  ;;  %vm1429_vm1 = vweird.f32 %v2887_v32  ;;  %v838_v55 = vpop.f32.mrf.mxu1 }
 0x143   : > { %v1402_v22 = vsel %vm1401_vm10, %v2216_v50, %v1398_v18  ;;  %2229 = vpow2.f32 %v1058_v30  ;;  %v978_v9 = vand.u32 2147483647, %v2889_v42  ;;  %v1553_v63 = vand.u32 2147483647, %v2895_v11 }
 0x144   : > { %v2224_v37 = vpop.eup %2223  ;;  %v1407_v38 = vsel %vm1404_vm11, %v1406_v60, %v1402_v22  ;;  %2231 = vrcp.f32 %v2895_v11  ;;  %vm2925_vm3 = vcmp.eq.f32.partialorder %v1433_v28, 8.507059e+37  ;;  %v1436_v52 = vor.u32 1.1754944e-38, %v1435_v27 }
 0x145   : > { %v1408_v1 = vmul.f32 %v1407_v38, %v1134_v53  ;;  %v1410_v45 = vmul.f32 %v2224_v37, %v2875_v62  ;;  %v2226_v41 = vpop.eup %2225  ;;  %v1010_v59 = vsub.f32 0.0, %v978_v9  ;;  %vm1415_vm2 = vweird.f32 %v2224_v37 }
 0x146   : > { %v2920_v54 = vadd.f32 1.0, %v2226_v41  ;;  %v1555_v25 = vand.u32 2147483648, %v2895_v11  ;;  %vm1549_vm4 = vweird.f32 %v2895_v11  ;;  %vm1416_vm5 = vmor %vm1414_vm14, %vm1415_vm2  ;;  %v750_v36 = vadd.f32 %v2836_v7, %v749_v57  ;;  %v947_v46 = vpop.f32.mrf.mxu3 }
 0x147   : > { %1678 = vst [vmem:[%s2591_s20 + $0x70] sm:$0xff] %v1408_v1  ;;  %v1411_v17 = vsub.f32 1.0, %v1410_v45  ;;  %v1060_v44 = vmul.f32 1.442695, %v1010_v59  ;;  %vm2944_vm7 = vcmp.eq.f32.partialorder %v1553_v63, 8.507059e+37  ;;  %v2952_v14 = vsel %vm1113_vm15, 1.0, %v2226_v41 }
 0x148   : > { %v2228_v20 = vpop.eup %2227  ;;  %2233 = vrcp.f32 %v2920_v54  ;;  %v1556_v13 = vor.u32 1.1754944e-38, %v1555_v25  ;;  %v927_v16 = vpop.f32.mrf.mxu2  ;;  %vm1564_vm8 = vweird.f32 %v2920_v54  ;;  %v1568_v26 = vand.u32 2147483647, %v2920_v54 }
 0x149   : > { %v2922_v43 = vpop.eup %2229  ;;  %v1412_v50 = vmul.f32 %v2224_v37, %v1411_v17  ;;  %v1425_v39 = vmul.f32 %v2228_v20, %v2887_v32  ;;  %vm1430_vm6 = vweird.f32 %v2228_v20  ;;  %v1570_v18 = vand.u32 2147483648, %v2920_v54  ;;  %v752_v45 = vpop.f32.mrf.mxu0 }
 0x14a   : > { %v2932_v61 = vadd.f32 1.0, %v2922_v43  ;;  %v2232_v58 = vpop.eup %2231  ;;  %vm1431_vm9 = vmor %vm1429_vm1, %vm1430_vm6  ;;  %v986_v56 = vand.u32 2147483647, %v2937_v4  ;;  %v839_v35 = vadd.f32 %v838_v55, %v750_v36  ;;  %v2968_v1 = vadd.f32 %v947_v46, %v2732_v51 }
 0x14b   : > { %v1413_v0 = vadd.f32 %v2224_v37, %v1412_v50  ;;  %v1426_v2 = vsub.f32 1.0, %v1425_v39  ;;  %v1545_v5 = vmul.f32 %v2232_v58, %v2895_v11  ;;  %vm1550_vm10 = vweird.f32 %v2232_v58 }
 0x14c   : > { %2235 = vrcp.f32 %v2932_v61  ;;  %vm1444_vm11 = vweird.f32 %v2932_v61  ;;  %v1448_v22 = vand.u32 2147483647, %v2932_v61  ;;  %v1018_v9 = vsub.f32 0.0, %v986_v56  ;;  %vm1551_vm12 = vmor %vm1549_vm4, %vm1550_vm10 }
 0x14d   : > { %v1417_v3 = vsel %vm1416_vm5, %v2224_v37, %v1413_v0  ;;  %v1427_v10 = vmul.f32 %v2228_v20, %v1426_v2  ;;  %v1546_v62 = vsub.f32 1.0, %v1545_v5  ;;  %2237 = vpow2.f32 %v1060_v44  ;;  %v841_v5 = vpop.f32.mrf.mxu1 }
 0x14e   : > { %v1422_v8 = vsel %vm2909_vm0, %v1421_v48, %v1417_v3  ;;  %v2234_v30 = vpop.eup %2233  ;;  %vm1105_vm13 = vcmp.ge.f32.partialorder %v2871_v40, 0.0  ;;  %v1450_v27 = vand.u32 2147483648, %v2932_v61  ;;  %v1076_v47 = vmul.f32 1.442695, %v1018_v9  ;;  %v950_v25 = vpop.f32.mrf.mxu3 }
 0x14f   : > { %v1423_v53 = vmul.f32 %v1422_v8, %v1135_v15  ;;  %v1428_v19 = vadd.f32 %v2228_v20, %v1427_v10  ;;  %v1547_v60 = vmul.f32 %v2232_v58, %v1546_v62  ;;  %v1560_v23 = vmul.f32 %v2234_v30, %v2920_v54 }
 0x150   : > { %v2976_v48 = vadd.f32 %v927_v16, %v839_v35  ;;  %v987_v51 = vand.u32 2147483647, %v2968_v1  ;;  %vm1565_vm14 = vweird.f32 %v2234_v30  ;;  %vm2983_vm15 = vcmp.eq.f32.partialorder %v1568_v26, 8.507059e+37  ;;  %v930_v44 = vpop.f32.mrf.mxu2 }
 0x151   : > { %1679 = vst [vmem:[%s2591_s20 + $0x78] sm:$0xff] %v1423_v53  ;;  %v1432_v29 = vsel %vm1431_vm9, %v2228_v20, %v1428_v19  ;;  %v1548_v38 = vadd.f32 %v2232_v58, %v1547_v60  ;;  %v1561_v41 = vsub.f32 1.0, %v1560_v23  ;;  %2239 = vpow2.f32 %v1076_v47  ;;  %vm1566_vm1 = vmor %vm1564_vm8, %vm1565_vm14  ;;  %v754_v19 = vpop.f32.mrf.mxu0 }
 0x152   : > { %v2236_v37 = vpop.eup %2235  ;;  %v1437_v32 = vsel %vm2925_vm3, %v1436_v52, %v1432_v29  ;;  %v979_v39 = vand.u32 2147483647, %v2976_v48  ;;  %v753_v2 = vadd.f32 %v2836_v7, %v752_v45  ;;  %vm1449_vm2 = vcmp.eq.f32.partialorder %v1448_v22, 8.507059e+37 }
 0x153   : > { %v1438_v28 = vmul.f32 %v1437_v32, %v1136_v49  ;;  %v1440_v15 = vmul.f32 %v2236_v37, %v2932_v61  ;;  %v1552_v17 = vsel %vm1551_vm12, %v2232_v58, %v1548_v38  ;;  %v1562_v20 = vmul.f32 %v2234_v30, %v1561_v41  ;;  %v2238_v59 = vpop.eup %2237 }
 0x154   : > { %v1557_v49 = vsel %vm2944_vm7, %v1556_v13, %v1552_v17  ;;  %vm1445_vm0 = vweird.f32 %v2236_v37  ;;  %v2988_v52 = vadd.f32 1.0, %v2238_v59  ;;  %v1571_v58 = vor.u32 1.1754944e-38, %v1570_v18 }
 0x155   : > { %1680 = vst [vmem:[%s2591_s20 + $0x80] sm:$0xff] %v1438_v28  ;;  %v1441_v11 = vsub.f32 1.0, %v1440_v15  ;;  %v1558_v57 = vmul.f32 %v1557_v49, %v2918_v6  ;;  %v1563_v63 = vadd.f32 %v2234_v30, %v1562_v20  ;;  %v1011_v0 = vsub.f32 0.0, %v979_v39  ;;  %vm1446_vm3 = vmor %vm1444_vm11, %vm1445_vm0  ;;  %v843_v38 = vpop.f32.mrf.mxu1 }
 0x156   : > { %v1019_v6 = vsub.f32 0.0, %v987_v51  ;;  %2241 = vrcp.f32 %v2988_v52  ;;  %v1451_v10 = vor.u32 1.1754944e-38, %v1450_v27  ;;  %v3001_v46 = vadd.f32 %v950_v25, %v2754_v31  ;;  %v952_v22 = vpop.f32.mrf.mxu3 }
 0x157   : > { %v1442_v24 = vmul.f32 %v2236_v37, %v1441_v11  ;;  %1688 = vst [vmem:[%s2591_s20 + $0xc0] sm:$0xff] %v1558_v57  ;;  %v1567_v3 = vsel %vm1566_vm1, %v2234_v30, %v1563_v63  ;;  %v1062_v12 = vmul.f32 1.442695, %v1011_v0  ;;  %v842_v55 = vadd.f32 %v841_v5, %v753_v2  ;;  %v2240_v16 = vpop.eup %2239 }
 0x158   : > { %v1572_v54 = vsel %vm2983_vm15, %v1571_v58, %v1567_v3  ;;  %v1078_v13 = vmul.f32 1.442695, %v1019_v6  ;;  %v1137_v61 = vsel %vm1105_vm13, 1.0, %v2922_v43  ;;  %v3008_v18 = vadd.f32 1.0, %v2240_v16  ;;  %v932_v9 = vpop.f32.mrf.mxu2 }
 0x159   : > { %v1443_v36 = vadd.f32 %v2236_v37, %v1442_v24  ;;  %v1573_v62 = vmul.f32 %v1572_v54, %v2952_v14  ;;  %2243 = vpow2.f32 %v1062_v12  ;;  %v3010_v31 = vadd.f32 %v930_v44, %v842_v55  ;;  %v757_v0 = vpop.f32.mrf.mxu0 }
 0x15a   : > { %2245 = vpow2.f32 %v1078_v13  ;;  %v988_v30 = vand.u32 2147483647, %v3001_v46  ;;  %v755_v60 = vadd.f32 %v2836_v7, %v754_v19  ;;  %vm1106_vm4 = vcmp.ge.f32.partialorder %v2889_v42, 0.0 }
 0x15b   : > { %v1447_v8 = vsel %vm1446_vm3, %v2236_v37, %v1443_v36  ;;  %1689 = vst [vmem:[%s2591_s20 + $0xc8] sm:$0xff] %v1573_v62  ;;  %2247 = vrcp.f32 %v3008_v18  ;;  %v980_v43 = vand.u32 2147483647, %v3010_v31  ;;  %v1463_v56 = vand.u32 2147483647, %v2988_v52 }
 0x15c   : > { %v1452_v53 = vsel %vm1449_vm2, %v1451_v10, %v1447_v8  ;;  %v2242_v14 = vpop.eup %2241  ;;  %vm1114_vm5 = vcmp.ge.f32.partialorder %v2937_v4, 0.0  ;;  %v1020_v29 = vsub.f32 0.0, %v988_v30  ;;  %v1138_v35 = vsel %vm1106_vm4, 1.0, %v2238_v59 }
 0x15d   : > { %v1453_v26 = vmul.f32 %v1452_v53, %v1137_v61  ;;  %v1455_v40 = vmul.f32 %v2242_v14, %v2988_v52  ;;  %vm1107_vm6 = vcmp.ge.f32.partialorder %v2976_v48, 0.0  ;;  %v1012_v32 = vsub.f32 0.0, %v980_v43 }
 0x15e   : > { %vm1459_vm7 = vweird.f32 %v2988_v52  ;;  %v1465_v42 = vand.u32 2147483648, %v2988_v52  ;;  %v844_v15 = vadd.f32 %v843_v38, %v755_v60  ;;  %vm1460_vm8 = vweird.f32 %v2242_v14  ;;  %v955_v54 = vpop.f32.mrf.mxu3 }
 0x15f   : > { %1681 = vst [vmem:[%s2591_s20 + $0x88] sm:$0xff] %v1453_v26  ;;  %v2244_v23 = vpop.eup %2243  ;;  %v1456_v37 = vsub.f32 1.0, %v1455_v40  ;;  %v1064_v17 = vmul.f32 1.442695, %v1012_v32  ;;  %vm3031_vm9 = vcmp.eq.f32.partialorder %v1463_v56, 8.507059e+37  ;;  %vm1461_vm10 = vmor %vm1459_vm7, %vm1460_vm8  ;;  %v1146_v39 = vsel %vm1114_vm5, 1.0, %v2240_v16  ;;  %v846_v16 = vpop.f32.mrf.mxu1 }
 0x160   : > { %v3022_v45 = vpop.eup %2245  ;;  %v3026_v28 = vadd.f32 1.0, %v2244_v23  ;;  %v1080_v49 = vmul.f32 1.442695, %v1020_v29  ;;  %v3036_v11 = vadd.f32 %v932_v9, %v844_v15  ;;  %v1583_v57 = vand.u32 2147483647, %v3008_v18 }
 0x161   : > { %v1457_v27 = vmul.f32 %v2242_v14, %v1456_v37  ;;  %v3029_v41 = vadd.f32 1.0, %v3022_v45  ;;  %v2248_v47 = vpop.eup %2247  ;;  %v1466_v50 = vor.u32 1.1754944e-38, %v1465_v42  ;;  %vm1579_vm11 = vweird.f32 %v3008_v18 }
 0x162   : > { %2249 = vrcp.f32 %v3026_v28  ;;  %v1575_v59 = vmul.f32 %v2248_v47, %v3008_v18  ;;  %v1585_v24 = vand.u32 2147483648, %v3008_v18  ;;  %v3048_v58 = vadd.f32 %v952_v22, %v2779_v34  ;;  %v935_v22 = vpop.f32.mrf.mxu2 }
 0x163   : > { %v1458_v20 = vadd.f32 %v2242_v14, %v1457_v27  ;;  %2251 = vrcp.f32 %v3029_v41  ;;  %v981_v6 = vand.u32 2147483647, %v3036_v11  ;;  %v758_v4 = vadd.f32 %v2836_v7, %v757_v0 }
 0x164   : > { %v1576_v25 = vsub.f32 1.0, %v1575_v59  ;;  %2253 = vpow2.f32 %v1064_v17  ;;  %vm1580_vm12 = vweird.f32 %v2248_v47  ;;  %vm3054_vm13 = vcmp.eq.f32.partialorder %v1583_v57, 8.507059e+37  ;;  %v759_v57 = vpop.f32.mrf.mxu0 }
 0x165   : > { %v1462_v63 = vsel %vm1461_vm10, %v2242_v14, %v1458_v20  ;;  %2255 = vpow2.f32 %v1080_v49  ;;  %v1586_v34 = vor.u32 1.1754944e-38, %v1585_v24  ;;  %v1139_v3 = vsel %vm1107_vm6, 1.0, %v2244_v23  ;;  %vm1581_vm0 = vmor %vm1579_vm11, %vm1580_vm12 }
 0x166   : > { %v1467_v52 = vsel %vm3031_vm9, %v1466_v50, %v1462_v63  ;;  %v1577_v5 = vmul.f32 %v2248_v47, %v1576_v25  ;;  %vm1474_vm14 = vweird.f32 %v3026_v28  ;;  %v1013_v10 = vsub.f32 0.0, %v981_v6 }
 0x167   : > { %v1468_v2 = vmul.f32 %v1467_v52, %v1138_v35  ;;  %v1478_v13 = vand.u32 2147483647, %v3026_v28  ;;  %vm1115_vm15 = vcmp.ge.f32.partialorder %v2968_v1, 0.0  ;;  %v989_v55 = vand.u32 2147483647, %v3048_v58 }
 0x168   : > { %v2250_v36 = vpop.eup %2249  ;;  %v1578_v8 = vadd.f32 %v2248_v47, %v1577_v5  ;;  %v1480_v48 = vand.u32 2147483648, %v3026_v28  ;;  %v1600_v53 = vand.u32 2147483648, %v3029_v41  ;;  %v847_v19 = vadd.f32 %v846_v16, %v758_v4 }
 0x169   : > { %v2252_v12 = vpop.eup %2251  ;;  %1682 = vst [vmem:[%s2591_s20 + $0x90] sm:$0xff] %v1468_v2  ;;  %v1470_v62 = vmul.f32 %v2250_v36, %v3026_v28  ;;  %vm1475_vm1 = vweird.f32 %v2250_v36  ;;  %v3075_v60 = vadd.f32 %v955_v54, %v2799_v21  ;;  %v1066_v29 = vmul.f32 1.442695, %v1013_v10  ;;  %v848_v10 = vpop.f32.mrf.mxu1 }
 0x16a   : > { %v1590_v61 = vmul.f32 %v2252_v12, %v3029_v41  ;;  %v3072_v26 = vpop.eup %2253  ;;  %v1582_v30 = vsel %vm1581_vm0, %v2248_v47, %v1578_v8  ;;  %v1021_v32 = vsub.f32 0.0, %v989_v55  ;;  %vm1595_vm2 = vweird.f32 %v2252_v12  ;;  %vm1476_vm4 = vmor %vm1474_vm14, %vm1475_vm1  ;;  %v937_v54 = vpop.f32.mrf.mxu2 }
 0x16b   : > { %v1471_v14 = vsub.f32 1.0, %v1470_v62  ;;  %v3077_v40 = vpop.eup %2255  ;;  %v1587_v18 = vsel %vm3054_vm13, %v1586_v34, %v1582_v30  ;;  %v3082_v56 = vadd.f32 1.0, %v3072_v26  ;;  %v1598_v21 = vand.u32 2147483647, %v3029_v41  ;;  %v957_v30 = vpop.f32.mrf.mxu3 }
 0x16c   : > { %v1591_v43 = vsub.f32 1.0, %v1590_v61  ;;  %v1588_v23 = vmul.f32 %v1587_v18, %v1146_v39  ;;  %v3085_v37 = vadd.f32 1.0, %v3077_v40  ;;  %vm1479_vm3 = vcmp.eq.f32.partialorder %v1478_v13, 8.507059e+37 }
 0x16d   : > { %v1472_v35 = vmul.f32 %v2250_v36, %v1471_v14  ;;  %2257 = vrcp.f32 %v3082_v56  ;;  %v3091_v42 = vadd.f32 %v935_v22, %v847_v19  ;;  %v1481_v15 = vor.u32 1.1754944e-38, %v1480_v48 }
 0x16e   : > { %v1592_v38 = vmul.f32 %v2252_v12, %v1591_v43  ;;  %1690 = vst [vmem:[%s2591_s20 + $0xd0] sm:$0xff] %v1588_v23  ;;  %2259 = vrcp.f32 %v3085_v37  ;;  %vm1594_vm5 = vweird.f32 %v3029_v41  ;;  %v990_v17 = vand.u32 2147483647, %v3075_v60 }
 0x16f   : > { %v1473_v9 = vadd.f32 %v2250_v36, %v1472_v35  ;;  %vm1596_vm6 = vmor %vm1594_vm5, %vm1595_vm2  ;;  %v1601_v51 = vor.u32 1.1754944e-38, %v1600_v53  ;;  %2261 = vpow2.f32 %v1066_v29  ;;  %v1082_v49 = vmul.f32 1.442695, %v1021_v32 }
 0x170   : > { %v1593_v27 = vadd.f32 %v2252_v12, %v1592_v38  ;;  %v1147_v59 = vsel %vm1115_vm15, 1.0, %v3022_v45  ;;  %vm1599_vm7 = vcmp.eq.f32.partialorder %v1598_v21, 8.507059e+37  ;;  %v982_v41 = vand.u32 2147483647, %v3091_v42 }
 0x171   : > { %v1477_v47 = vsel %vm1476_vm4, %v2250_v36, %v1473_v9  ;;  %2263 = vpow2.f32 %v1082_v49  ;;  %v1022_v25 = vsub.f32 0.0, %v990_v17  ;;  %v760_v1 = vadd.f32 %v2836_v7, %v759_v57 }
 0x172   : > { %v1482_v20 = vsel %vm1479_vm3, %v1481_v15, %v1477_v47  ;;  %v1597_v28 = vsel %vm1596_vm6, %v2252_v12, %v1593_v27  ;;  %v1014_v6 = vsub.f32 0.0, %v982_v41  ;;  %vm1108_vm8 = vcmp.ge.f32.partialorder %v3010_v31, 0.0 }
 0x173   : > { %v1483_v50 = vmul.f32 %v1482_v20, %v1139_v3  ;;  %v1602_v39 = vsel %vm1599_vm7, %v1601_v51, %v1597_v28  ;;  %v2258_v24 = vpop.eup %2257  ;;  %v1493_v45 = vand.u32 2147483647, %v3082_v56  ;;  %vm1116_vm9 = vcmp.ge.f32.partialorder %v3001_v46, 0.0 }
 0x174   : > { %v1603_v63 = vmul.f32 %v1602_v39, %v1147_v59  ;;  %v2260_v0 = vpop.eup %2259  ;;  %v1485_v52 = vmul.f32 %v2258_v24, %v3082_v56  ;;  %v1084_v2 = vmul.f32 1.442695, %v1022_v25  ;;  %v1495_v36 = vand.u32 2147483648, %v3082_v56 }
 0x175   : > { %1683 = vst [vmem:[%s2591_s20 + $0x98] sm:$0xff] %v1483_v50  ;;  %v1605_v4 = vmul.f32 %v2260_v0, %v3085_v37  ;;  %v2262_v5 = vpop.eup %2261  ;;  %v1613_v34 = vand.u32 2147483647, %v3085_v37  ;;  %v1068_v3 = vmul.f32 1.442695, %v1014_v6  ;;  %v849_v8 = vadd.f32 %v848_v10, %v760_v1 }
 0x176   : > { %1691 = vst [vmem:[%s2591_s20 + $0xd8] sm:$0xff] %v1603_v63  ;;  %v1486_v44 = vsub.f32 1.0, %v1485_v52  ;;  %v3112_v12 = vadd.f32 1.0, %v2262_v5  ;;  %2265 = vpow2.f32 %v1084_v2  ;;  %vm1490_vm10 = vweird.f32 %v2258_v24 }
 0x177   : > { %v1606_v7 = vsub.f32 1.0, %v1605_v4  ;;  %v3114_v62 = vpop.eup %2263  ;;  %v1615_v55 = vand.u32 2147483648, %v3085_v37  ;;  %2267 = vpow2.f32 %v1068_v3  ;;  %vm1610_vm11 = vweird.f32 %v2260_v0 }
 0x178   : > { %v1487_v13 = vmul.f32 %v2258_v24, %v1486_v44  ;;  %2269 = vrcp.f32 %v3112_v12  ;;  %v3118_v48 = vadd.f32 %v937_v54, %v849_v8  ;;  %v1140_v61 = vsel %vm1108_vm8, 1.0, %v3072_v26 }
 0x179   : > { %v1607_v16 = vmul.f32 %v2260_v0, %v1606_v7  ;;  %vm1489_vm12 = vweird.f32 %v3082_v56  ;;  %v3125_v19 = vadd.f32 1.0, %v3114_v62  ;;  %vm1494_vm14 = vcmp.eq.f32.partialorder %v1493_v45, 8.507059e+37 }
 0x17a   : > { %v1488_v53 = vadd.f32 %v2258_v24, %v1487_v13  ;;  %vm1491_vm13 = vmor %vm1489_vm12, %vm1490_vm10  ;;  %v1496_v14 = vor.u32 1.1754944e-38, %v1495_v36  ;;  %vm1609_vm15 = vweird.f32 %v3085_v37  ;;  %vm1614_vm1 = vcmp.eq.f32.partialorder %v1613_v34, 8.507059e+37 }
 0x17b   : > { %v1608_v18 = vadd.f32 %v2260_v0, %v1607_v16  ;;  %vm1611_vm0 = vmor %vm1609_vm15, %vm1610_vm11  ;;  %v1616_v29 = vor.u32 1.1754944e-38, %v1615_v55  ;;  %2271 = vrcp.f32 %v3125_v19  ;;  %v983_v22 = vand.u32 2147483647, %v3118_v48 }
 0x17c   : > { %v1492_v43 = vsel %vm1491_vm13, %v2258_v24, %v1488_v53  ;;  %v3129_v31 = vpop.eup %2265  ;;  %v3133_v23 = vadd.f32 %v957_v30, %v2823_v33  ;;  %v1148_v32 = vsel %vm1116_vm9, 1.0, %v3077_v40  ;;  %vm1109_vm2 = vcmp.ge.f32.partialorder %v3036_v11, 0.0 }
 0x17d   : > { %v1497_v26 = vsel %vm1494_vm14, %v1496_v14, %v1492_v43  ;;  %v1612_v56 = vsel %vm1611_vm0, %v2260_v0, %v1608_v18  ;;  %v3135_v35 = vpop.eup %2267  ;;  %v3141_v21 = vadd.f32 1.0, %v3129_v31  ;;  %v1015_v33 = vsub.f32 0.0, %v983_v22 }
 0x17e   : > { %v1498_v37 = vmul.f32 %v1497_v26, %v1140_v61  ;;  %v1617_v38 = vsel %vm1614_vm1, %v1616_v29, %v1612_v56  ;;  %v2270_v9 = vpop.eup %2269  ;;  %v3146_v17 = vadd.f32 1.0, %v3135_v35  ;;  %v991_v47 = vand.u32 2147483647, %v3133_v23 }
 0x17f   : > { %v1618_v15 = vmul.f32 %v1617_v38, %v1148_v32  ;;  %v1500_v27 = vmul.f32 %v2270_v9, %v3112_v12  ;;  %2273 = vrcp.f32 %v3141_v21  ;;  %v1510_v51 = vand.u32 2147483648, %v3112_v12 }
 0x180   : > { %1684 = vst [vmem:[%s2591_s20 + $0xa0] sm:$0xff] %v1498_v37  ;;  %2275 = vrcp.f32 %v3146_v17  ;;  %v1141_v49 = vsel %vm1109_vm2, 1.0, %v2262_v5  ;;  %v1508_v20 = vand.u32 2147483647, %v3112_v12  ;;  %vm1117_vm3 = vcmp.ge.f32.partialorder %v3048_v58, 0.0 }
 0x181   : > { %1692 = vst [vmem:[%s2591_s20 + $0xe0] sm:$0xff] %v1618_v15  ;;  %v2272_v46 = vpop.eup %2271  ;;  %v1501_v40 = vsub.f32 1.0, %v1500_v27  ;;  %vm1505_vm4 = vweird.f32 %v2270_v9  ;;  %v1628_v57 = vand.u32 2147483647, %v3125_v19  ;;  %v1070_v50 = vmul.f32 1.442695, %v1015_v33 }
 0x182   : > { %v1620_v59 = vmul.f32 %v2272_v46, %v3125_v19  ;;  %vm1504_vm5 = vweird.f32 %v3112_v12  ;;  %v1630_v39 = vand.u32 2147483648, %v3125_v19  ;;  %v1023_v41 = vsub.f32 0.0, %v991_v47 }
 0x183   : > { %v1502_v28 = vmul.f32 %v2270_v9, %v1501_v40  ;;  %v1511_v25 = vor.u32 1.1754944e-38, %v1510_v51  ;;  %v1149_v0 = vsel %vm1117_vm3, 1.0, %v3114_v62  ;;  %2277 = vpow2.f32 %v1070_v50  ;;  %vm1506_vm6 = vmor %vm1504_vm5, %vm1505_vm4 }
 0x184   : > { %v1621_v11 = vsub.f32 1.0, %v1620_v59  ;;  %vm1625_vm7 = vweird.f32 %v2272_v46  ;;  %v1086_v6 = vmul.f32 1.442695, %v1023_v41  ;;  %vm1509_vm8 = vcmp.eq.f32.partialorder %v1508_v20, 8.507059e+37 }
 0x185   : > { %v2274_v24 = vpop.eup %2273  ;;  %v1503_v63 = vadd.f32 %v2270_v9, %v1502_v28  ;;  %vm1624_vm9 = vweird.f32 %v3125_v19  ;;  %vm3163_vm10 = vcmp.eq.f32.partialorder %v1628_v57, 8.507059e+37  ;;  %v1631_v44 = vor.u32 1.1754944e-38, %v1630_v39 }
 0x186   : > { %v1622_v58 = vmul.f32 %v2272_v46, %v1621_v11  ;;  %v1635_v52 = vmul.f32 %v2274_v24, %v3141_v21  ;;  %v2276_v1 = vpop.eup %2275  ;;  %vm1626_vm11 = vmor %vm1624_vm9, %vm1625_vm7  ;;  %v1643_v10 = vand.u32 2147483647, %v3141_v21  ;;  %2279 = vpow2.f32 %v1086_v6 }
 0x187   : > { %v1507_v45 = vsel %vm1506_vm6, %v2270_v9, %v1503_v63  ;;  %v1515_v36 = vmul.f32 %v2276_v1, %v3146_v17  ;;  %v1523_v12 = vand.u32 2147483647, %v3146_v17  ;;  %v1645_v8 = vand.u32 2147483648, %v3141_v21 }
 0x188   : > { %v1512_v2 = vsel %vm1509_vm8, %v1511_v25, %v1507_v45  ;;  %v1623_v5 = vadd.f32 %v2272_v46, %v1622_v58  ;;  %v1636_v3 = vsub.f32 1.0, %v1635_v52  ;;  %v1525_v55 = vand.u32 2147483648, %v3146_v17 }
 0x189   : > { %v1513_v34 = vmul.f32 %v1512_v2, %v1141_v49  ;;  %v1516_v7 = vsub.f32 1.0, %v1515_v36  ;;  %v2278_v62 = vpop.eup %2277  ;;  %vm1640_vm12 = vweird.f32 %v2274_v24  ;;  %vm1520_vm13 = vweird.f32 %v2276_v1 }
 0x18a   : > { %v1627_v54 = vsel %vm1626_vm11, %v2272_v46, %v1623_v5  ;;  %v1637_v16 = vmul.f32 %v2274_v24, %v1636_v3  ;;  %v1175_v19 = vadd.f32 1.0, %v2278_v62  ;;  %vm1110_vm14 = vcmp.ge.f32.partialorder %v3091_v42, 0.0 }
 0x18b   : > { %1685 = vst [vmem:[%s2591_s20 + $0xa8] sm:$0xff] %v1513_v34  ;;  %v1632_v13 = vsel %vm3163_vm10, %v1631_v44, %v1627_v54  ;;  %v1517_v53 = vmul.f32 %v2276_v1, %v1516_v7  ;;  %vm1639_vm15 = vweird.f32 %v3141_v21  ;;  %vm1519_vm0 = vweird.f32 %v3146_v17 }
 0x18c   : > { %v1633_v61 = vmul.f32 %v1632_v13, %v1149_v0  ;;  %v1638_v30 = vadd.f32 %v2274_v24, %v1637_v16  ;;  %vm1641_vm1 = vmor %vm1639_vm15, %vm1640_vm12  ;;  %v1646_v18 = vor.u32 1.1754944e-38, %v1645_v8  ;;  %2281 = vrcp.f32 %v1175_v19  ;;  %v2280_v43 = vpop.eup %2279 }
 0x18d   : > { %v1518_v14 = vadd.f32 %v2276_v1, %v1517_v53  ;;  %vm1521_vm2 = vmor %vm1519_vm0, %vm1520_vm13  ;;  %v1526_v29 = vor.u32 1.1754944e-38, %v1525_v55  ;;  %vm1118_vm3 = vcmp.ge.f32.partialorder %v3075_v60, 0.0  ;;  %vm1644_vm4 = vcmp.eq.f32.partialorder %v1643_v10, 8.507059e+37 }
 0x18e   : > { %1693 = vst [vmem:[%s2591_s20 + $0xe8] sm:$0xff] %v1633_v61  ;;  %v1642_v26 = vsel %vm1641_vm1, %v2274_v24, %v1638_v30  ;;  %vm1524_vm5 = vcmp.eq.f32.partialorder %v1523_v12, 8.507059e+37  ;;  %v1150_v22 = vsel %vm1118_vm3, 1.0, %v3129_v31  ;;  %v1142_v32 = vsel %vm1110_vm14, 1.0, %v3135_v35 }
 0x18f   : > { %v1522_v56 = vsel %vm1521_vm2, %v2276_v1, %v1518_v14  ;;  %v1647_v37 = vsel %vm1644_vm4, %v1646_v18, %v1642_v26  ;;  %v1183_v9 = vadd.f32 1.0, %v2280_v43  ;;  %v1540_v33 = vand.u32 2147483648, %v1175_v19 }
 0x190   : > { %v1527_v38 = vsel %vm1524_vm5, %v1526_v29, %v1522_v56  ;;  %v1648_v21 = vmul.f32 %v1647_v37, %v1150_v22  ;;  %v1538_v31 = vand.u32 2147483647, %v1175_v19  ;;  %vm1534_vm7 = vweird.f32 %v1175_v19 }
 0x191   : > { %v1528_v15 = vmul.f32 %v1527_v38, %v1142_v32  ;;  %2283 = vrcp.f32 %v1183_v9  ;;  %vm1111_vm8 = vcmp.ge.f32.partialorder %v3118_v48, 0.0  ;;  %v1541_v42 = vor.u32 1.1754944e-38, %v1540_v33 }
 0x192   : > { %1694 = vst [vmem:[%s2591_s20 + $0xf0] sm:$0xff] %v1648_v21  ;;  %v2282_v27 = vpop.eup %2281  ;;  %v1143_v49 = vsel %vm1111_vm8, 1.0, %v2278_v62  ;;  %vm1539_vm10 = vcmp.eq.f32.partialorder %v1538_v31, 8.507059e+37  ;;  %v1660_v59 = vand.u32 2147483648, %v1183_v9  ;;  %v1658_v50 = vand.u32 2147483647, %v1183_v9 }
 0x193   : > { %1686 = vst [vmem:[%s2591_s20 + $0xb0] sm:$0xff] %v1528_v15  ;;  %v1530_v60 = vmul.f32 %v2282_v27, %v1175_v19  ;;  %vm1535_vm6 = vweird.f32 %v2282_v27  ;;  %vm1654_vm12 = vweird.f32 %v1183_v9  ;;  %vm1119_vm14 = vcmp.ge.f32.partialorder %v3133_v23, 0.0 }
 0x194   : > { %vm1536_vm9 = vmor %vm1534_vm7, %vm1535_vm6  ;;  %v1661_v41 = vor.u32 1.1754944e-38, %v1660_v59  ;;  %vm1659_vm15 = vcmp.eq.f32.partialorder %v1658_v50, 8.507059e+37  ;;  %v1151_v24 = vsel %vm1119_vm14, 1.0, %v2280_v43 }
 0x195   : > { %v1531_v17 = vsub.f32 1.0, %v1530_v60 }
 0x197   : > { %v2284_v47 = vpop.eup %2283  ;;  %v1532_v46 = vmul.f32 %v2282_v27, %v1531_v17 }
 0x198   : > { %v1650_v40 = vmul.f32 %v2284_v47, %v1183_v9  ;;  %vm1655_vm11 = vweird.f32 %v2284_v47 }
 0x199   : > { %v1533_v51 = vadd.f32 %v2282_v27, %v1532_v46  ;;  %vm1656_vm13 = vmor %vm1654_vm12, %vm1655_vm11 }
 0x19a   : > { %v1651_v35 = vsub.f32 1.0, %v1650_v40 }
 0x19b   : > { %v1537_v20 = vsel %vm1536_vm9, %v2282_v27, %v1533_v51 }
 0x19c   : > { %v1542_v28 = vsel %vm1539_vm10, %v1541_v42, %v1537_v20  ;;  %v1652_v57 = vmul.f32 %v2284_v47, %v1651_v35 }
 0x19d   : > { %v1543_v11 = vmul.f32 %v1542_v28, %v1143_v49 }
 0x19e   : > { %v1653_v39 = vadd.f32 %v2284_v47, %v1652_v57 }
 0x19f   : > { %1687 = vst [vmem:[%s2591_s20 + $0xb8] sm:$0xff] %v1543_v11 }
 0x1a0   : > { %v1657_v48 = vsel %vm1656_vm13, %v2284_v47, %v1653_v39 }
 0x1a1   : > { %v1662_v63 = vsel %vm1659_vm15, %v1661_v41, %v1657_v48 }
 0x1a2   : > { %v1663_v25 = vmul.f32 %v1662_v63, %v1151_v24 }
 0x1a4   : > { %1695 = vst [vmem:[%s2591_s20 + $0xf8] sm:$0xff] %v1663_v25 }
 0x1a5 PF: > { %s13_s12 = sadd.s32 1, %s2292_s12  }
 0x1a6   : > { %p10_p4 = scmp.ge.s32.totalorder %s13_s12, 4  }
 0x1a8   :  { %12 = sbr.rel (!%p10_p4) target bundleno = 1 (0x1), region = 62 }

</bundles_post_ra>
